<compile_context>
chip_gen: v7x
topology: tpu7x:2x2x1
jax: 0.10.0
libtpu: 0.0.40
codegen_flags: <defaults>
</compile_context>

<pallas_src>
import jax
import jax.numpy as jnp
from jax.experimental import pallas as pl
from jax.experimental.pallas import tpu as pltpu


def _round_up(x, m):
    return (x + m - 1) // m * m


def _gemm_tiling(M, K):
    tm = min(512, _round_up(M, 8))
    if M >= 256:                      # >=2 grid steps -> both v7x TCs get work
        tm = min(tm, _round_up(M // 2, 8))
    if K > 2048:                      # keep double-buffered tiles inside VMEM
        tm = min(tm, 256)
    Mp = _round_up(M, tm)
    return tm, Mp, Mp // tm


# ----------------------------------------------------------------- kernels --

def _matmul_kernel(a_ref, b_ref, o_ref):
    o_ref[...] = jnp.dot(a_ref[...], b_ref[...],
                         preferred_element_type=jnp.float32)


def _matmul_tanh_kernel(a_ref, b_ref, o_ref):
    acc = jnp.dot(a_ref[...], b_ref[...], preferred_element_type=jnp.float32)
    o_ref[...] = jnp.tanh(acc)          # EUP epilogue, overlaps with MXU work


def _matmul_stats_kernel(a_ref, b_ref, o_ref, s_ref):
    # GEMM + per-tile column sum / sum-of-squares for fused BatchNorm stats.
    acc = jnp.dot(a_ref[...], b_ref[...], preferred_element_type=jnp.float32)
    o_ref[...] = acc
    s1 = jnp.sum(acc, axis=0, keepdims=True)           # (1, Np)
    s2 = jnp.sum(acc * acc, axis=0, keepdims=True)     # (1, Np)
    z = jnp.zeros((6, acc.shape[1]), jnp.float32)
    s_ref[...] = jnp.concatenate([s1, s2, z], axis=0)  # (8, Np)


def _bn_lrelu_kernel(x_ref, scale_ref, shift_ref, o_ref):
    z = x_ref[...] * scale_ref[...] + shift_ref[...]
    o_ref[...] = jnp.where(z > 0, z, 0.2 * z)          # LeakyReLU(0.2)


# -------------------------------------------------------------------- GEMMs --

def pallas_matmul(a, b, *, epilogue=None):
    """(M, K) @ (K, N) -> (M, N) f32.  bf16 MXU inputs, f32 accumulation."""
    M, K = a.shape
    _, Nc = b.shape
    a = a.astype(jnp.bfloat16)
    b = b.astype(jnp.bfloat16)
    Np = _round_up(Nc, 128)
    if Np != Nc:
        b = jnp.pad(b, ((0, 0), (0, Np - Nc)))
    tm, Mp, g = _gemm_tiling(M, K)
    if Mp != M:
        a = jnp.pad(a, ((0, Mp - M), (0, 0)))

    kernel = _matmul_tanh_kernel if epilogue == "tanh" else _matmul_kernel
    out = pl.pallas_call(
        kernel,
        out_shape=jax.ShapeDtypeStruct((Mp, Np), jnp.float32),
        grid=(g,),
        in_specs=[pl.BlockSpec((tm, K), lambda i: (i, 0)),
                  pl.BlockSpec((K, Np), lambda i: (0, 0))],
        out_specs=pl.BlockSpec((tm, Np), lambda i: (i, 0)),
        compiler_params=pltpu.CompilerParams(
            dimension_semantics=("parallel",)),
    )(a, b)
    return out[:M, :Nc]


def pallas_matmul_bn_lrelu(a, b, gamma, beta, *, phases, eps=1e-5):
    """GEMM whose columns are (phase, channel) packed, with fused per-column
    batch-statistics accumulation, followed by a lane-dense tiled pass applying
    training-mode BatchNorm (biased variance) + LeakyReLU(0.2)."""
    M, K = a.shape
    _, Nc = b.shape
    C = gamma.shape[0]
    P = phases
    assert Nc == P * C
    a = a.astype(jnp.bfloat16)
    b = b.astype(jnp.bfloat16)
    Np = _round_up(Nc, 128)
    if Np != Nc:
        b = jnp.pad(b, ((0, 0), (0, Np - Nc)))
    tm, Mp, g = _gemm_tiling(M, K)
    if Mp != M:
        a = jnp.pad(a, ((0, Mp - M), (0, 0)))   # zero rows: no effect on stats

    y, stats = pl.pallas_call(
        _matmul_stats_kernel,
        out_shape=(jax.ShapeDtypeStruct((Mp, Np), jnp.float32),
                   jax.ShapeDtypeStruct((8 * g, Np), jnp.float32)),
        grid=(g,),
        in_specs=[pl.BlockSpec((tm, K), lambda i: (i, 0)),
                  pl.BlockSpec((K, Np), lambda i: (0, 0))],
        out_specs=(pl.BlockSpec((tm, Np), lambda i: (i, 0)),
                   pl.BlockSpec((8, Np), lambda i: (i, 0))),
        compiler_params=pltpu.CompilerParams(
            dimension_semantics=("parallel",)),
    )(a, b)

    # Reduce the tiny per-tile stats and fold spatial phases into channels.
    stats = stats.reshape(g, 8, Np)
    count = jnp.float32(M * P)                               # N*Hout*Wout
    col_sum = stats[:, 0, :Nc].sum(axis=0).reshape(P, C)
    col_sq = stats[:, 1, :Nc].sum(axis=0).reshape(P, C)
    mean = col_sum.sum(axis=0) / count
    var = jnp.maximum(col_sq.sum(axis=0) / count - mean * mean, 0.0)
    scale_c = gamma * jax.lax.rsqrt(var + eps)
    shift_c = beta - mean * scale_c
    scale = jnp.broadcast_to(scale_c, (P, C)).reshape(1, Nc)
    shift = jnp.broadcast_to(shift_c, (P, C)).reshape(1, Nc)
    if Np != Nc:
        scale = jnp.pad(scale, ((0, 0), (0, Np - Nc)))
        shift = jnp.pad(shift, ((0, 0), (0, Np - Nc)))

    # Normalize + LeakyReLU on the padded (lane-dense) GEMM output.
    out = pl.pallas_call(
        _bn_lrelu_kernel,
        out_shape=jax.ShapeDtypeStruct((Mp, Np), jnp.float32),
        grid=(g,),
        in_specs=[pl.BlockSpec((tm, Np), lambda i: (i, 0)),
                  pl.BlockSpec((1, Np), lambda i: (0, 0)),
                  pl.BlockSpec((1, Np), lambda i: (0, 0))],
        out_specs=pl.BlockSpec((tm, Np), lambda i: (i, 0)),
        compiler_params=pltpu.CompilerParams(
            dimension_semantics=("parallel",)),
    )(y, scale, shift)
    return out[:M, :Nc]


# --------------------------------------------------------- conv lowering ----

def _im2col(xp, kH, kW):
    """Stride-1 patch matrix of a pre-padded NHWC tensor, columns = (tap, C)."""
    N, Hp, Wp, C = xp.shape
    Ho, Wo = Hp - kH + 1, Wp - kW + 1
    # TODO(synk): pull patch extraction inside the pallas_call (per-tap index
    # maps) instead of materializing the im2col matrix through HBM.
    cols = [xp[:, i:i + Ho, j:j + Wo, :] for i in range(kH) for j in range(kW)]
    patches = jnp.stack(cols, axis=3).reshape(N * Ho * Wo, kH * kW * C)
    return patches, Ho, Wo


# window-offset -> kernel-tap mapping for the stride-2 / k=4 / p=1 deconv
_PHASE_TAPS = (((0, 3), (1, 1)),      # output phase 0 (even rows/cols)
               ((1, 2), (2, 0)))      # output phase 1 (odd rows/cols)


def _deconv_s2_weight(w_iohw):
    """Pack the 4x4 stride-2 transposed-conv kernel into a (9*Cin, 4*Cout)
    matrix whose columns are (phase_y, phase_x, Cout)."""
    Ci, O, kH, kW = w_iohw.shape
    E = jnp.zeros((3, 3, Ci, 2, 2, O), w_iohw.dtype)
    for py, rtaps in enumerate(_PHASE_TAPS):
        for px, ctaps in enumerate(_PHASE_TAPS):
            for dq, kh in rtaps:
                for dr, kw_ in ctaps:
                    E = E.at[dq, dr, :, py, px, :].set(w_iohw[:, :, kh, kw_])
    return E.reshape(9 * Ci, 4 * O)


def conv2d_bn_lrelu(x, w_oihw, pad, gamma, beta):
    """Conv2d(k=3, s=1, p=1, bias=False) + BatchNorm + LeakyReLU(0.2)."""
    O, Ci, kH, kW = w_oihw.shape
    N = x.shape[0]
    B = jnp.transpose(w_oihw, (2, 3, 1, 0)).reshape(kH * kW * Ci, O)
    xp = jnp.pad(x.astype(jnp.bfloat16),
                 ((0, 0), (pad, pad), (pad, pad), (0, 0)))
    patches, Ho, Wo = _im2col(xp, kH, kW)
    y = pallas_matmul_bn_lrelu(patches, B, gamma, beta, phases=1)
    return y.reshape(N, Ho, Wo, O)


def conv_transpose2d(x, w_iohw, stride, pad, gamma=None, beta=None,
                     activation=None):
    """ConvTranspose2d (bias=False), optionally fused with BN+LeakyReLU or an
    activation epilogue.  Weight layout (I, O, kH, kW)."""
    N, H, W, C = x.shape
    Ci, O, kH, kW = w_iohw.shape
    assert Ci == C
    x = x.astype(jnp.bfloat16)
    w = w_iohw.astype(jnp.bfloat16)

    if stride == 1 and pad == 0 and H == 1 and W == 1:
        # 1x1 latent: deconv == (N, Cin) x (Cin, kH*kW*Cout) GEMM, no im2col
        B = jnp.transpose(w, (0, 2, 3, 1)).reshape(Ci, kH * kW * O)
        patches = x.reshape(N, Ci)
        if gamma is not None:
            y = pallas_matmul_bn_lrelu(patches, B, gamma, beta, phases=kH * kW)
        else:
            y = pallas_matmul(patches, B, epilogue=activation)
        return y.reshape(N, kH, kW, O)

    # stride-2, k=4, p=1: sub-pixel decomposition.  Each 2x2 output phase is a
    # stride-1 conv over a 3x3 window of the once-padded input; all four phases
    # are packed into the columns of one (9*Cin, 4*Cout) weight matrix.
    assert stride == 2 and kH == 4 and kW == 4 and pad == 1, \
        "only the DCGAN deconv configurations are implemented"
    B = _deconv_s2_weight(w)
    xp = jnp.pad(x, ((0, 0), (1, 1), (1, 1), (0, 0)))
    patches, Ho, Wo = _im2col(xp, 3, 3)                  # Ho == H, Wo == W
    if gamma is not None:
        y = pallas_matmul_bn_lrelu(patches, B, gamma, beta, phases=4)
    else:
        y = pallas_matmul(patches, B, epilogue=activation)
    y = y.reshape(N, Ho, Wo, 2, 2, O).transpose(0, 1, 3, 2, 4, 5)
    return y.reshape(N, 2 * Ho, 2 * Wo, O)


# ------------------------------------------------------------------ model ---

def init_params(key, nz, nc, ngf, n_extra_layers_g):
    keys = iter(jax.random.split(key, 8 + n_extra_layers_g))

    def nrm(shape):
        return 0.05 * jax.random.normal(next(keys), shape, jnp.float32)

    def bn(c):
        return (jnp.ones((c,), jnp.float32), jnp.zeros((c,), jnp.float32))

    layers = []
    # ConvTranspose2d(nz, ngf*8, 4, 1, 0) + BN + LeakyReLU(0.2)
    layers.append(dict(kind="deconv", w=nrm((nz, ngf * 8, 4, 4)),
                       stride=1, pad=0, bn=bn(ngf * 8), act=None))
    # three ConvTranspose2d(., ., 4, 2, 1) + BN + LeakyReLU stages
    for cin, cout in [(ngf * 8, ngf * 4), (ngf * 4, ngf * 2), (ngf * 2, ngf)]:
        layers.append(dict(kind="deconv", w=nrm((cin, cout, 4, 4)),
                           stride=2, pad=1, bn=bn(cout), act=None))
    # extra layers: Conv2d(ngf, ngf, 3, 1, 1) + BN + LeakyReLU
    for _ in range(n_extra_layers_g):
        layers.append(dict(kind="conv", w=nrm((ngf, ngf, 3, 3)),
                           pad=1, bn=bn(ngf)))
    # final ConvTranspose2d(ngf, nc, 4, 2, 1) with Tanh fused into the GEMM
    layers.append(dict(kind="deconv", w=nrm((ngf, nc, 4, 4)),
                       stride=2, pad=1, bn=None, act="tanh"))
    return layers


def netG_forward(layers, x_nchw):
    x = jnp.transpose(x_nchw, (0, 2, 3, 1)).astype(jnp.float32)  # NCHW -> NHWC
    for layer in layers:
        if layer["kind"] == "deconv":
            g, b = layer["bn"] if layer["bn"] is not None else (None, None)
            x = conv_transpose2d(x, layer["w"], layer["stride"], layer["pad"],
                                 gamma=g, beta=b, activation=layer["act"])
        else:  # conv
            g, b = layer["bn"]
            x = conv2d_bn_lrelu(x, layer["w"], layer["pad"], g, b)
    out = jnp.transpose(x, (0, 3, 1, 2))   # back to NCHW
    return out, 0                           # mirrors `return (main(input), 0)`


# -------------------------------------------------------------------- main --

if __name__ == "__main__":
    # small, shape-consistent config (latent is 1x1 spatial as in DCGAN)
    ngpu, nz, nc, ngf, n_extra_layers_g = 1, 16, 3, 8, 1
    batch = 2

    key = jax.random.PRNGKey(0)
    kp, kx = jax.random.split(key)
    params = init_params(kp, nz, nc, ngf, n_extra_layers_g)
    x = jax.random.normal(kx, (batch, nz, 1, 1), jnp.float32)

    fwd = jax.jit(lambda inp: netG_forward(params, inp))
    out, aux = fwd(x)
    out = jax.block_until_ready(out)

    assert out.shape == (batch, nc, 64, 64), out.shape
    assert bool(jnp.all(jnp.isfinite(out)))
    assert float(jnp.max(jnp.abs(out))) <= 1.0 + 1e-5   # Tanh range
    assert aux == 0
    print("KERNEL_OK")
</pallas_src>

<mosaic_0001>
module attributes {stable_mosaic.version = 11 : i64} {
  func.func @_matmul_stats_kernel(%arg0: i32, %arg1: memref<8x16xbf16, #tpu.memory_space<vmem>>, %arg2: memref<16x1024xbf16, #tpu.memory_space<vmem>>, %arg3: memref<8x1024xf32, #tpu.memory_space<vmem>>, %arg4: memref<8x1024xf32, #tpu.memory_space<vmem>>) attributes {dimension_semantics = [#tpu.dimension_semantics<parallel>], iteration_bounds = array<i64: 1>, scalar_prefetch = 0 : i64, scratch_operands = 0 : i64, tpu.core_type = #tpu.core_type<tc>, window_params = [{transform_indices = @transform_0, window_bounds = array<i64: 8, 16>}, {pipeline_mode = #tpu.pipeline_mode<synchronous>, transform_indices = @transform_1, window_bounds = array<i64: 16, 1024>}, {transform_indices = @transform_2, window_bounds = array<i64: 8, 1024>}, {transform_indices = @transform_3, window_bounds = array<i64: 8, 1024>}]} {
    %c0 = arith.constant 0 : index
    %c0_0 = arith.constant 0 : index
    %0 = vector.load %arg1[%c0, %c0_0] : memref<8x16xbf16, #tpu.memory_space<vmem>>, vector<8x16xbf16>
    %c0_1 = arith.constant 0 : index
    %c0_2 = arith.constant 0 : index
    %1 = vector.load %arg2[%c0_1, %c0_2] : memref<16x1024xbf16, #tpu.memory_space<vmem>>, vector<16x1024xbf16>
    %cst = arith.constant dense<0.000000e+00> : vector<8x1024xf32>
    %2 = tpu.matmul %0, %1, %cst {dimension_numbers = #tpu.dot_dimension_numbers<[1], [0], [0], [1], [0, 0, 1, 1], [], []>} : vector<8x16xbf16>, vector<16x1024xbf16>, vector<8x1024xf32> -> vector<8x1024xf32>
    %c0_3 = arith.constant 0 : index
    %c0_4 = arith.constant 0 : index
    %3 = vector.load %arg3[%c0_3, %c0_4] : memref<8x1024xf32, #tpu.memory_space<vmem>>, vector<8x1024xf32>
    tpu.vector_store %arg3[%c0_3, %c0_4], %2 {strides = array<i32>} : memref<8x1024xf32, #tpu.memory_space<vmem>>, vector<8x1024xf32>,
    %cst_5 = arith.constant dense<0.000000e+00> : vector<1024xf32>
    %4 = vector.multi_reduction <add>, %2, %cst_5 [0] : vector<8x1024xf32> to vector<1024xf32>
    %5 = vector.shape_cast %4 : vector<1024xf32> to vector<1x1024xf32>
    %6 = arith.mulf %2, %2 : vector<8x1024xf32>
    %cst_6 = arith.constant dense<0.000000e+00> : vector<1024xf32>
    %7 = vector.multi_reduction <add>, %6, %cst_6 [0] : vector<8x1024xf32> to vector<1024xf32>
    %8 = vector.shape_cast %7 : vector<1024xf32> to vector<1x1024xf32>
    %cst_7 = arith.constant 0.000000e+00 : f32
    %9 = vector.broadcast %cst_7 : f32 to vector<6x1024xf32>
    %10 = tpu.concatenate %5, %8, %9 in 0 : vector<1x1024xf32>, vector<1x1024xf32>, vector<6x1024xf32> -> vector<8x1024xf32>
    %c0_8 = arith.constant 0 : index
    %c0_9 = arith.constant 0 : index
    %11 = vector.load %arg4[%c0_8, %c0_9] : memref<8x1024xf32, #tpu.memory_space<vmem>>, vector<8x1024xf32>
    tpu.vector_store %arg4[%c0_8, %c0_9], %10 {strides = array<i32>} : memref<8x1024xf32, #tpu.memory_space<vmem>>, vector<8x1024xf32>,
    return
  }
  func.func @transform_0(%arg0: i32) -> (i32, i32) {
    %c0_i32 = arith.constant 0 : i32
    %c0_i32_0 = arith.constant 0 : i32
    return %arg0, %c0_i32 : i32, i32
  }
  func.func @transform_1(%arg0: i32) -> (i32, i32) {
    %c0_i32 = arith.constant 0 : i32
    %c0_i32_0 = arith.constant 0 : i32
    %c0_i32_1 = arith.constant 0 : i32
    return %c0_i32, %c0_i32_0 : i32, i32
  }
  func.func @transform_2(%arg0: i32) -> (i32, i32) {
    %c0_i32 = arith.constant 0 : i32
    %c0_i32_0 = arith.constant 0 : i32
    return %arg0, %c0_i32 : i32, i32
  }
  func.func @transform_3(%arg0: i32) -> (i32, i32) {
    %c0_i32 = arith.constant 0 : i32
    %c0_i32_0 = arith.constant 0 : i32
    return %arg0, %c0_i32 : i32, i32
  }
}

module attributes {stable_mosaic.version = 11 : i64} {
  func.func @_bn_lrelu_kernel(%arg0: i32, %arg1: memref<8x1024xf32, #tpu.memory_space<vmem>>, %arg2: memref<1x1024xf32, #tpu.memory_space<vmem>>, %arg3: memref<1x1024xf32, #tpu.memory_space<vmem>>, %arg4: memref<8x1024xf32, #tpu.memory_space<vmem>>) attributes {dimension_semantics = [#tpu.dimension_semantics<parallel>], iteration_bounds = array<i64: 1>, scalar_prefetch = 0 : i64, scratch_operands = 0 : i64, tpu.core_type = #tpu.core_type<tc>, window_params = [{transform_indices = @transform_0, window_bounds = array<i64: 8, 1024>}, {pipeline_mode = #tpu.pipeline_mode<synchronous>, transform_indices = @transform_1, window_bounds = array<i64: 1, 1024>}, {pipeline_mode = #tpu.pipeline_mode<synchronous>, transform_indices = @transform_2, window_bounds = array<i64: 1, 1024>}, {transform_indices = @transform_3, window_bounds = array<i64: 8, 1024>}]} {
    %c0 = arith.constant 0 : index
    %c0_0 = arith.constant 0 : index
    %0 = vector.load %arg1[%c0, %c0_0] : memref<8x1024xf32, #tpu.memory_space<vmem>>, vector<8x1024xf32>
    %c0_1 = arith.constant 0 : index
    %c0_2 = arith.constant 0 : index
    %1 = vector.load %arg2[%c0_1, %c0_2] : memref<1x1024xf32, #tpu.memory_space<vmem>>, vector<1x1024xf32>
    %2 = vector.broadcast %1 : vector<1x1024xf32> to vector<8x1024xf32>
    %3 = arith.mulf %0, %2 : vector<8x1024xf32>
    %c0_3 = arith.constant 0 : index
    %c0_4 = arith.constant 0 : index
    %4 = vector.load %arg3[%c0_3, %c0_4] : memref<1x1024xf32, #tpu.memory_space<vmem>>, vector<1x1024xf32>
    %5 = vector.broadcast %4 : vector<1x1024xf32> to vector<8x1024xf32>
    %6 = arith.addf %3, %5 : vector<8x1024xf32>
    %cst = arith.constant 0.000000e+00 : f32
    %7 = vector.broadcast %cst : f32 to vector<8x1024xf32>
    %8 = arith.cmpf ogt, %6, %7 : vector<8x1024xf32>
    %cst_5 = arith.constant 2.000000e-01 : f32
    %9 = vector.broadcast %cst_5 : f32 to vector<8x1024xf32>
    %10 = arith.mulf %9, %6 : vector<8x1024xf32>
    %11 = arith.select %8, %6, %10 : vector<8x1024xi1>, vector<8x1024xf32>
    %c0_6 = arith.constant 0 : index
    %c0_7 = arith.constant 0 : index
    %12 = vector.load %arg4[%c0_6, %c0_7] : memref<8x1024xf32, #tpu.memory_space<vmem>>, vector<8x1024xf32>
    tpu.vector_store %arg4[%c0_6, %c0_7], %11 {strides = array<i32>} : memref<8x1024xf32, #tpu.memory_space<vmem>>, vector<8x1024xf32>,
    return
  }
  func.func @transform_0(%arg0: i32) -> (i32, i32) {
    %c0_i32 = arith.constant 0 : i32
    %c0_i32_0 = arith.constant 0 : i32
    return %arg0, %c0_i32 : i32, i32
  }
  func.func @transform_1(%arg0: i32) -> (i32, i32) {
    %c0_i32 = arith.constant 0 : i32
    %c0_i32_0 = arith.constant 0 : i32
    %c0_i32_1 = arith.constant 0 : i32
    return %c0_i32, %c0_i32_0 : i32, i32
  }
  func.func @transform_2(%arg0: i32) -> (i32, i32) {
    %c0_i32 = arith.constant 0 : i32
    %c0_i32_0 = arith.constant 0 : i32
    %c0_i32_1 = arith.constant 0 : i32
    return %c0_i32, %c0_i32_0 : i32, i32
  }
  func.func @transform_3(%arg0: i32) -> (i32, i32) {
    %c0_i32 = arith.constant 0 : i32
    %c0_i32_0 = arith.constant 0 : i32
    return %arg0, %c0_i32 : i32, i32
  }
}

module attributes {stable_mosaic.version = 11 : i64} {
  func.func @_matmul_stats_kernel(%arg0: i32, %arg1: memref<32x576xbf16, #tpu.memory_space<vmem>>, %arg2: memref<576x128xbf16, #tpu.memory_space<vmem>>, %arg3: memref<32x128xf32, #tpu.memory_space<vmem>>, %arg4: memref<8x128xf32, #tpu.memory_space<vmem>>) attributes {dimension_semantics = [#tpu.dimension_semantics<parallel>], iteration_bounds = array<i64: 1>, scalar_prefetch = 0 : i64, scratch_operands = 0 : i64, tpu.core_type = #tpu.core_type<tc>, window_params = [{transform_indices = @transform_0, window_bounds = array<i64: 32, 576>}, {pipeline_mode = #tpu.pipeline_mode<synchronous>, transform_indices = @transform_1, window_bounds = array<i64: 576, 128>}, {transform_indices = @transform_2, window_bounds = array<i64: 32, 128>}, {transform_indices = @transform_3, window_bounds = array<i64: 8, 128>}]} {
    %c0 = arith.constant 0 : index
    %c0_0 = arith.constant 0 : index
    %0 = vector.load %arg1[%c0, %c0_0] : memref<32x576xbf16, #tpu.memory_space<vmem>>, vector<32x576xbf16>
    %c0_1 = arith.constant 0 : index
    %c0_2 = arith.constant 0 : index
    %1 = vector.load %arg2[%c0_1, %c0_2] : memref<576x128xbf16, #tpu.memory_space<vmem>>, vector<576x128xbf16>
    %cst = arith.constant dense<0.000000e+00> : vector<32x128xf32>
    %2 = tpu.matmul %0, %1, %cst {dimension_numbers = #tpu.dot_dimension_numbers<[1], [0], [0], [1], [0, 0, 1, 1], [], []>} : vector<32x576xbf16>, vector<576x128xbf16>, vector<32x128xf32> -> vector<32x128xf32>
    %c0_3 = arith.constant 0 : index
    %c0_4 = arith.constant 0 : index
    %3 = vector.load %arg3[%c0_3, %c0_4] : memref<32x128xf32, #tpu.memory_space<vmem>>, vector<32x128xf32>
    tpu.vector_store %arg3[%c0_3, %c0_4], %2 {strides = array<i32>} : memref<32x128xf32, #tpu.memory_space<vmem>>, vector<32x128xf32>,
    %cst_5 = arith.constant dense<0.000000e+00> : vector<128xf32>
    %4 = vector.multi_reduction <add>, %2, %cst_5 [0] : vector<32x128xf32> to vector<128xf32>
    %5 = vector.shape_cast %4 : vector<128xf32> to vector<1x128xf32>
    %6 = arith.mulf %2, %2 : vector<32x128xf32>
    %cst_6 = arith.constant dense<0.000000e+00> : vector<128xf32>
    %7 = vector.multi_reduction <add>, %6, %cst_6 [0] : vector<32x128xf32> to vector<128xf32>
    %8 = vector.shape_cast %7 : vector<128xf32> to vector<1x128xf32>
    %cst_7 = arith.constant 0.000000e+00 : f32
    %9 = vector.broadcast %cst_7 : f32 to vector<6x128xf32>
    %10 = tpu.concatenate %5, %8, %9 in 0 : vector<1x128xf32>, vector<1x128xf32>, vector<6x128xf32> -> vector<8x128xf32>
    %c0_8 = arith.constant 0 : index
    %c0_9 = arith.constant 0 : index
    %11 = vector.load %arg4[%c0_8, %c0_9] : memref<8x128xf32, #tpu.memory_space<vmem>>, vector<8x128xf32>
    tpu.vector_store %arg4[%c0_8, %c0_9], %10 {strides = array<i32>} : memref<8x128xf32, #tpu.memory_space<vmem>>, vector<8x128xf32>,
    return
  }
  func.func @transform_0(%arg0: i32) -> (i32, i32) {
    %c0_i32 = arith.constant 0 : i32
    %c0_i32_0 = arith.constant 0 : i32
    return %arg0, %c0_i32 : i32, i32
  }
  func.func @transform_1(%arg0: i32) -> (i32, i32) {
    %c0_i32 = arith.constant 0 : i32
    %c0_i32_0 = arith.constant 0 : i32
    %c0_i32_1 = arith.constant 0 : i32
    return %c0_i32, %c0_i32_0 : i32, i32
  }
  func.func @transform_2(%arg0: i32) -> (i32, i32) {
    %c0_i32 = arith.constant 0 : i32
    %c0_i32_0 = arith.constant 0 : i32
    return %arg0, %c0_i32 : i32, i32
  }
  func.func @transform_3(%arg0: i32) -> (i32, i32) {
    %c0_i32 = arith.constant 0 : i32
    %c0_i32_0 = arith.constant 0 : i32
    return %arg0, %c0_i32 : i32, i32
  }
}

module attributes {stable_mosaic.version = 11 : i64} {
  func.func @_bn_lrelu_kernel(%arg0: i32, %arg1: memref<32x128xf32, #tpu.memory_space<vmem>>, %arg2: memref<1x128xf32, #tpu.memory_space<vmem>>, %arg3: memref<1x128xf32, #tpu.memory_space<vmem>>, %arg4: memref<32x128xf32, #tpu.memory_space<vmem>>) attributes {dimension_semantics = [#tpu.dimension_semantics<parallel>], iteration_bounds = array<i64: 1>, scalar_prefetch = 0 : i64, scratch_operands = 0 : i64, tpu.core_type = #tpu.core_type<tc>, window_params = [{transform_indices = @transform_0, window_bounds = array<i64: 32, 128>}, {pipeline_mode = #tpu.pipeline_mode<synchronous>, transform_indices = @transform_1, window_bounds = array<i64: 1, 128>}, {pipeline_mode = #tpu.pipeline_mode<synchronous>, transform_indices = @transform_2, window_bounds = array<i64: 1, 128>}, {transform_indices = @transform_3, window_bounds = array<i64: 32, 128>}]} {
    %c0 = arith.constant 0 : index
    %c0_0 = arith.constant 0 : index
    %0 = vector.load %arg1[%c0, %c0_0] : memref<32x128xf32, #tpu.memory_space<vmem>>, vector<32x128xf32>
    %c0_1 = arith.constant 0 : index
    %c0_2 = arith.constant 0 : index
    %1 = vector.load %arg2[%c0_1, %c0_2] : memref<1x128xf32, #tpu.memory_space<vmem>>, vector<1x128xf32>
    %2 = vector.broadcast %1 : vector<1x128xf32> to vector<32x128xf32>
    %3 = arith.mulf %0, %2 : vector<32x128xf32>
    %c0_3 = arith.constant 0 : index
    %c0_4 = arith.constant 0 : index
    %4 = vector.load %arg3[%c0_3, %c0_4] : memref<1x128xf32, #tpu.memory_space<vmem>>, vector<1x128xf32>
    %5 = vector.broadcast %4 : vector<1x128xf32> to vector<32x128xf32>
    %6 = arith.addf %3, %5 : vector<32x128xf32>
    %cst = arith.constant 0.000000e+00 : f32
    %7 = vector.broadcast %cst : f32 to vector<32x128xf32>
    %8 = arith.cmpf ogt, %6, %7 : vector<32x128xf32>
    %cst_5 = arith.constant 2.000000e-01 : f32
    %9 = vector.broadcast %cst_5 : f32 to vector<32x128xf32>
    %10 = arith.mulf %9, %6 : vector<32x128xf32>
    %11 = arith.select %8, %6, %10 : vector<32x128xi1>, vector<32x128xf32>
    %c0_6 = arith.constant 0 : index
    %c0_7 = arith.constant 0 : index
    %12 = vector.load %arg4[%c0_6, %c0_7] : memref<32x128xf32, #tpu.memory_space<vmem>>, vector<32x128xf32>
    tpu.vector_store %arg4[%c0_6, %c0_7], %11 {strides = array<i32>} : memref<32x128xf32, #tpu.memory_space<vmem>>, vector<32x128xf32>,
    return
  }
  func.func @transform_0(%arg0: i32) -> (i32, i32) {
    %c0_i32 = arith.constant 0 : i32
    %c0_i32_0 = arith.constant 0 : i32
    return %arg0, %c0_i32 : i32, i32
  }
  func.func @transform_1(%arg0: i32) -> (i32, i32) {
    %c0_i32 = arith.constant 0 : i32
    %c0_i32_0 = arith.constant 0 : i32
    %c0_i32_1 = arith.constant 0 : i32
    return %c0_i32, %c0_i32_0 : i32, i32
  }
  func.func @transform_2(%arg0: i32) -> (i32, i32) {
    %c0_i32 = arith.constant 0 : i32
    %c0_i32_0 = arith.constant 0 : i32
    %c0_i32_1 = arith.constant 0 : i32
    return %c0_i32, %c0_i32_0 : i32, i32
  }
  func.func @transform_3(%arg0: i32) -> (i32, i32) {
    %c0_i32 = arith.constant 0 : i32
    %c0_i32_0 = arith.constant 0 : i32
    return %arg0, %c0_i32 : i32, i32
  }
}

module attributes {stable_mosaic.version = 11 : i64} {
  func.func @_bn_lrelu_kernel(%arg0: i32, %arg1: memref<128x128xf32, #tpu.memory_space<vmem>>, %arg2: memref<1x128xf32, #tpu.memory_space<vmem>>, %arg3: memref<1x128xf32, #tpu.memory_space<vmem>>, %arg4: memref<128x128xf32, #tpu.memory_space<vmem>>) attributes {dimension_semantics = [#tpu.dimension_semantics<parallel>], iteration_bounds = array<i64: 1>, scalar_prefetch = 0 : i64, scratch_operands = 0 : i64, tpu.core_type = #tpu.core_type<tc>, window_params = [{transform_indices = @transform_0, window_bounds = array<i64: 128, 128>}, {pipeline_mode = #tpu.pipeline_mode<synchronous>, transform_indices = @transform_1, window_bounds = array<i64: 1, 128>}, {pipeline_mode = #tpu.pipeline_mode<synchronous>, transform_indices = @transform_2, window_bounds = array<i64: 1, 128>}, {transform_indices = @transform_3, window_bounds = array<i64: 128, 128>}]} {
    %c0 = arith.constant 0 : index
    %c0_0 = arith.constant 0 : index
    %0 = vector.load %arg1[%c0, %c0_0] : memref<128x128xf32, #tpu.memory_space<vmem>>, vector<128x128xf32>
    %c0_1 = arith.constant 0 : index
    %c0_2 = arith.constant 0 : index
    %1 = vector.load %arg2[%c0_1, %c0_2] : memref<1x128xf32, #tpu.memory_space<vmem>>, vector<1x128xf32>
    %2 = vector.broadcast %1 : vector<1x128xf32> to vector<128x128xf32>
    %3 = arith.mulf %0, %2 : vector<128x128xf32>
    %c0_3 = arith.constant 0 : index
    %c0_4 = arith.constant 0 : index
    %4 = vector.load %arg3[%c0_3, %c0_4] : memref<1x128xf32, #tpu.memory_space<vmem>>, vector<1x128xf32>
    %5 = vector.broadcast %4 : vector<1x128xf32> to vector<128x128xf32>
    %6 = arith.addf %3, %5 : vector<128x128xf32>
    %cst = arith.constant 0.000000e+00 : f32
    %7 = vector.broadcast %cst : f32 to vector<128x128xf32>
    %8 = arith.cmpf ogt, %6, %7 : vector<128x128xf32>
    %cst_5 = arith.constant 2.000000e-01 : f32
    %9 = vector.broadcast %cst_5 : f32 to vector<128x128xf32>
    %10 = arith.mulf %9, %6 : vector<128x128xf32>
    %11 = arith.select %8, %6, %10 : vector<128x128xi1>, vector<128x128xf32>
    %c0_6 = arith.constant 0 : index
    %c0_7 = arith.constant 0 : index
    %12 = vector.load %arg4[%c0_6, %c0_7] : memref<128x128xf32, #tpu.memory_space<vmem>>, vector<128x128xf32>
    tpu.vector_store %arg4[%c0_6, %c0_7], %11 {strides = array<i32>} : memref<128x128xf32, #tpu.memory_space<vmem>>, vector<128x128xf32>,
    return
  }
  func.func @transform_0(%arg0: i32) -> (i32, i32) {
    %c0_i32 = arith.constant 0 : i32
    %c0_i32_0 = arith.constant 0 : i32
    return %arg0, %c0_i32 : i32, i32
  }
  func.func @transform_1(%arg0: i32) -> (i32, i32) {
    %c0_i32 = arith.constant 0 : i32
    %c0_i32_0 = arith.constant 0 : i32
    %c0_i32_1 = arith.constant 0 : i32
    return %c0_i32, %c0_i32_0 : i32, i32
  }
  func.func @transform_2(%arg0: i32) -> (i32, i32) {
    %c0_i32 = arith.constant 0 : i32
    %c0_i32_0 = arith.constant 0 : i32
    %c0_i32_1 = arith.constant 0 : i32
    return %c0_i32, %c0_i32_0 : i32, i32
  }
  func.func @transform_3(%arg0: i32) -> (i32, i32) {
    %c0_i32 = arith.constant 0 : i32
    %c0_i32_0 = arith.constant 0 : i32
    return %arg0, %c0_i32 : i32, i32
  }
}

module attributes {stable_mosaic.version = 11 : i64} {
  func.func @_matmul_stats_kernel(%arg0: i32, %arg1: memref<128x288xbf16, #tpu.memory_space<vmem>>, %arg2: memref<288x128xbf16, #tpu.memory_space<vmem>>, %arg3: memref<128x128xf32, #tpu.memory_space<vmem>>, %arg4: memref<8x128xf32, #tpu.memory_space<vmem>>) attributes {dimension_semantics = [#tpu.dimension_semantics<parallel>], iteration_bounds = array<i64: 1>, scalar_prefetch = 0 : i64, scratch_operands = 0 : i64, tpu.core_type = #tpu.core_type<tc>, window_params = [{transform_indices = @transform_0, window_bounds = array<i64: 128, 288>}, {pipeline_mode = #tpu.pipeline_mode<synchronous>, transform_indices = @transform_1, window_bounds = array<i64: 288, 128>}, {transform_indices = @transform_2, window_bounds = array<i64: 128, 128>}, {transform_indices = @transform_3, window_bounds = array<i64: 8, 128>}]} {
    %c0 = arith.constant 0 : index
    %c0_0 = arith.constant 0 : index
    %0 = vector.load %arg1[%c0, %c0_0] : memref<128x288xbf16, #tpu.memory_space<vmem>>, vector<128x288xbf16>
    %c0_1 = arith.constant 0 : index
    %c0_2 = arith.constant 0 : index
    %1 = vector.load %arg2[%c0_1, %c0_2] : memref<288x128xbf16, #tpu.memory_space<vmem>>, vector<288x128xbf16>
    %cst = arith.constant dense<0.000000e+00> : vector<128x128xf32>
    %2 = tpu.matmul %0, %1, %cst {dimension_numbers = #tpu.dot_dimension_numbers<[1], [0], [0], [1], [0, 0, 1, 1], [], []>} : vector<128x288xbf16>, vector<288x128xbf16>, vector<128x128xf32> -> vector<128x128xf32>
    %c0_3 = arith.constant 0 : index
    %c0_4 = arith.constant 0 : index
    %3 = vector.load %arg3[%c0_3, %c0_4] : memref<128x128xf32, #tpu.memory_space<vmem>>, vector<128x128xf32>
    tpu.vector_store %arg3[%c0_3, %c0_4], %2 {strides = array<i32>} : memref<128x128xf32, #tpu.memory_space<vmem>>, vector<128x128xf32>,
    %cst_5 = arith.constant dense<0.000000e+00> : vector<128xf32>
    %4 = vector.multi_reduction <add>, %2, %cst_5 [0] : vector<128x128xf32> to vector<128xf32>
    %5 = vector.shape_cast %4 : vector<128xf32> to vector<1x128xf32>
    %6 = arith.mulf %2, %2 : vector<128x128xf32>
    %cst_6 = arith.constant dense<0.000000e+00> : vector<128xf32>
    %7 = vector.multi_reduction <add>, %6, %cst_6 [0] : vector<128x128xf32> to vector<128xf32>
    %8 = vector.shape_cast %7 : vector<128xf32> to vector<1x128xf32>
    %cst_7 = arith.constant 0.000000e+00 : f32
    %9 = vector.broadcast %cst_7 : f32 to vector<6x128xf32>
    %10 = tpu.concatenate %5, %8, %9 in 0 : vector<1x128xf32>, vector<1x128xf32>, vector<6x128xf32> -> vector<8x128xf32>
    %c0_8 = arith.constant 0 : index
    %c0_9 = arith.constant 0 : index
    %11 = vector.load %arg4[%c0_8, %c0_9] : memref<8x128xf32, #tpu.memory_space<vmem>>, vector<8x128xf32>
    tpu.vector_store %arg4[%c0_8, %c0_9], %10 {strides = array<i32>} : memref<8x128xf32, #tpu.memory_space<vmem>>, vector<8x128xf32>,
    return
  }
  func.func @transform_0(%arg0: i32) -> (i32, i32) {
    %c0_i32 = arith.constant 0 : i32
    %c0_i32_0 = arith.constant 0 : i32
    return %arg0, %c0_i32 : i32, i32
  }
  func.func @transform_1(%arg0: i32) -> (i32, i32) {
    %c0_i32 = arith.constant 0 : i32
    %c0_i32_0 = arith.constant 0 : i32
    %c0_i32_1 = arith.constant 0 : i32
    return %c0_i32, %c0_i32_0 : i32, i32
  }
  func.func @transform_2(%arg0: i32) -> (i32, i32) {
    %c0_i32 = arith.constant 0 : i32
    %c0_i32_0 = arith.constant 0 : i32
    return %arg0, %c0_i32 : i32, i32
  }
  func.func @transform_3(%arg0: i32) -> (i32, i32) {
    %c0_i32 = arith.constant 0 : i32
    %c0_i32_0 = arith.constant 0 : i32
    return %arg0, %c0_i32 : i32, i32
  }
}

module attributes {stable_mosaic.version = 11 : i64} {
  func.func @_matmul_stats_kernel(%arg0: i32, %arg1: memref<256x144xbf16, #tpu.memory_space<vmem>>, %arg2: memref<144x128xbf16, #tpu.memory_space<vmem>>, %arg3: memref<256x128xf32, #tpu.memory_space<vmem>>, %arg4: memref<8x128xf32, #tpu.memory_space<vmem>>) attributes {dimension_semantics = [#tpu.dimension_semantics<parallel>], iteration_bounds = array<i64: 2>, scalar_prefetch = 0 : i64, scratch_operands = 0 : i64, tpu.core_type = #tpu.core_type<tc>, window_params = [{transform_indices = @transform_0, window_bounds = array<i64: 256, 144>}, {pipeline_mode = #tpu.pipeline_mode<synchronous>, transform_indices = @transform_1, window_bounds = array<i64: 144, 128>}, {transform_indices = @transform_2, window_bounds = array<i64: 256, 128>}, {transform_indices = @transform_3, window_bounds = array<i64: 8, 128>}]} {
    %c0 = arith.constant 0 : index
    %c0_0 = arith.constant 0 : index
    %0 = vector.load %arg1[%c0, %c0_0] : memref<256x144xbf16, #tpu.memory_space<vmem>>, vector<256x144xbf16>
    %c0_1 = arith.constant 0 : index
    %c0_2 = arith.constant 0 : index
    %1 = vector.load %arg2[%c0_1, %c0_2] : memref<144x128xbf16, #tpu.memory_space<vmem>>, vector<144x128xbf16>
    %cst = arith.constant dense<0.000000e+00> : vector<256x128xf32>
    %2 = tpu.matmul %0, %1, %cst {dimension_numbers = #tpu.dot_dimension_numbers<[1], [0], [0], [1], [0, 0, 1, 1], [], []>} : vector<256x144xbf16>, vector<144x128xbf16>, vector<256x128xf32> -> vector<256x128xf32>
    %c0_3 = arith.constant 0 : index
    %c0_4 = arith.constant 0 : index
    %3 = vector.load %arg3[%c0_3, %c0_4] : memref<256x128xf32, #tpu.memory_space<vmem>>, vector<256x128xf32>
    tpu.vector_store %arg3[%c0_3, %c0_4], %2 {strides = array<i32>} : memref<256x128xf32, #tpu.memory_space<vmem>>, vector<256x128xf32>,
    %cst_5 = arith.constant dense<0.000000e+00> : vector<128xf32>
    %4 = vector.multi_reduction <add>, %2, %cst_5 [0] : vector<256x128xf32> to vector<128xf32>
    %5 = vector.shape_cast %4 : vector<128xf32> to vector<1x128xf32>
    %6 = arith.mulf %2, %2 : vector<256x128xf32>
    %cst_6 = arith.constant dense<0.000000e+00> : vector<128xf32>
    %7 = vector.multi_reduction <add>, %6, %cst_6 [0] : vector<256x128xf32> to vector<128xf32>
    %8 = vector.shape_cast %7 : vector<128xf32> to vector<1x128xf32>
    %cst_7 = arith.constant 0.000000e+00 : f32
    %9 = vector.broadcast %cst_7 : f32 to vector<6x128xf32>
    %10 = tpu.concatenate %5, %8, %9 in 0 : vector<1x128xf32>, vector<1x128xf32>, vector<6x128xf32> -> vector<8x128xf32>
    %c0_8 = arith.constant 0 : index
    %c0_9 = arith.constant 0 : index
    %11 = vector.load %arg4[%c0_8, %c0_9] : memref<8x128xf32, #tpu.memory_space<vmem>>, vector<8x128xf32>
    tpu.vector_store %arg4[%c0_8, %c0_9], %10 {strides = array<i32>} : memref<8x128xf32, #tpu.memory_space<vmem>>, vector<8x128xf32>,
    return
  }
  func.func @transform_0(%arg0: i32) -> (i32, i32) {
    %c0_i32 = arith.constant 0 : i32
    %c0_i32_0 = arith.constant 0 : i32
    return %arg0, %c0_i32 : i32, i32
  }
  func.func @transform_1(%arg0: i32) -> (i32, i32) {
    %c0_i32 = arith.constant 0 : i32
    %c0_i32_0 = arith.constant 0 : i32
    %c0_i32_1 = arith.constant 0 : i32
    return %c0_i32, %c0_i32_0 : i32, i32
  }
  func.func @transform_2(%arg0: i32) -> (i32, i32) {
    %c0_i32 = arith.constant 0 : i32
    %c0_i32_0 = arith.constant 0 : i32
    return %arg0, %c0_i32 : i32, i32
  }
  func.func @transform_3(%arg0: i32) -> (i32, i32) {
    %c0_i32 = arith.constant 0 : i32
    %c0_i32_0 = arith.constant 0 : i32
    return %arg0, %c0_i32 : i32, i32
  }
}

module attributes {stable_mosaic.version = 11 : i64} {
  func.func @_bn_lrelu_kernel(%arg0: i32, %arg1: memref<256x128xf32, #tpu.memory_space<vmem>>, %arg2: memref<1x128xf32, #tpu.memory_space<vmem>>, %arg3: memref<1x128xf32, #tpu.memory_space<vmem>>, %arg4: memref<256x128xf32, #tpu.memory_space<vmem>>) attributes {dimension_semantics = [#tpu.dimension_semantics<parallel>], iteration_bounds = array<i64: 2>, scalar_prefetch = 0 : i64, scratch_operands = 0 : i64, tpu.core_type = #tpu.core_type<tc>, window_params = [{transform_indices = @transform_0, window_bounds = array<i64: 256, 128>}, {pipeline_mode = #tpu.pipeline_mode<synchronous>, transform_indices = @transform_1, window_bounds = array<i64: 1, 128>}, {pipeline_mode = #tpu.pipeline_mode<synchronous>, transform_indices = @transform_2, window_bounds = array<i64: 1, 128>}, {transform_indices = @transform_3, window_bounds = array<i64: 256, 128>}]} {
    %c0 = arith.constant 0 : index
    %c0_0 = arith.constant 0 : index
    %0 = vector.load %arg1[%c0, %c0_0] : memref<256x128xf32, #tpu.memory_space<vmem>>, vector<256x128xf32>
    %c0_1 = arith.constant 0 : index
    %c0_2 = arith.constant 0 : index
    %1 = vector.load %arg2[%c0_1, %c0_2] : memref<1x128xf32, #tpu.memory_space<vmem>>, vector<1x128xf32>
    %2 = vector.broadcast %1 : vector<1x128xf32> to vector<256x128xf32>
    %3 = arith.mulf %0, %2 : vector<256x128xf32>
    %c0_3 = arith.constant 0 : index
    %c0_4 = arith.constant 0 : index
    %4 = vector.load %arg3[%c0_3, %c0_4] : memref<1x128xf32, #tpu.memory_space<vmem>>, vector<1x128xf32>
    %5 = vector.broadcast %4 : vector<1x128xf32> to vector<256x128xf32>
    %6 = arith.addf %3, %5 : vector<256x128xf32>
    %cst = arith.constant 0.000000e+00 : f32
    %7 = vector.broadcast %cst : f32 to vector<256x128xf32>
    %8 = arith.cmpf ogt, %6, %7 : vector<256x128xf32>
    %cst_5 = arith.constant 2.000000e-01 : f32
    %9 = vector.broadcast %cst_5 : f32 to vector<256x128xf32>
    %10 = arith.mulf %9, %6 : vector<256x128xf32>
    %11 = arith.select %8, %6, %10 : vector<256x128xi1>, vector<256x128xf32>
    %c0_6 = arith.constant 0 : index
    %c0_7 = arith.constant 0 : index
    %12 = vector.load %arg4[%c0_6, %c0_7] : memref<256x128xf32, #tpu.memory_space<vmem>>, vector<256x128xf32>
    tpu.vector_store %arg4[%c0_6, %c0_7], %11 {strides = array<i32>} : memref<256x128xf32, #tpu.memory_space<vmem>>, vector<256x128xf32>,
    return
  }
  func.func @transform_0(%arg0: i32) -> (i32, i32) {
    %c0_i32 = arith.constant 0 : i32
    %c0_i32_0 = arith.constant 0 : i32
    return %arg0, %c0_i32 : i32, i32
  }
  func.func @transform_1(%arg0: i32) -> (i32, i32) {
    %c0_i32 = arith.constant 0 : i32
    %c0_i32_0 = arith.constant 0 : i32
    %c0_i32_1 = arith.constant 0 : i32
    return %c0_i32, %c0_i32_0 : i32, i32
  }
  func.func @transform_2(%arg0: i32) -> (i32, i32) {
    %c0_i32 = arith.constant 0 : i32
    %c0_i32_0 = arith.constant 0 : i32
    %c0_i32_1 = arith.constant 0 : i32
    return %c0_i32, %c0_i32_0 : i32, i32
  }
  func.func @transform_3(%arg0: i32) -> (i32, i32) {
    %c0_i32 = arith.constant 0 : i32
    %c0_i32_0 = arith.constant 0 : i32
    return %arg0, %c0_i32 : i32, i32
  }
}

module attributes {stable_mosaic.version = 11 : i64} {
  func.func @_matmul_stats_kernel(%arg0: i32, %arg1: memref<512x72xbf16, #tpu.memory_space<vmem>>, %arg2: memref<72x128xbf16, #tpu.memory_space<vmem>>, %arg3: memref<512x128xf32, #tpu.memory_space<vmem>>, %arg4: memref<8x128xf32, #tpu.memory_space<vmem>>) attributes {dimension_semantics = [#tpu.dimension_semantics<parallel>], iteration_bounds = array<i64: 4>, scalar_prefetch = 0 : i64, scratch_operands = 0 : i64, tpu.core_type = #tpu.core_type<tc>, window_params = [{transform_indices = @transform_0, window_bounds = array<i64: 512, 72>}, {pipeline_mode = #tpu.pipeline_mode<synchronous>, transform_indices = @transform_1, window_bounds = array<i64: 72, 128>}, {transform_indices = @transform_2, window_bounds = array<i64: 512, 128>}, {transform_indices = @transform_3, window_bounds = array<i64: 8, 128>}]} {
    %c0 = arith.constant 0 : index
    %c0_0 = arith.constant 0 : index
    %0 = vector.load %arg1[%c0, %c0_0] : memref<512x72xbf16, #tpu.memory_space<vmem>>, vector<512x72xbf16>
    %c0_1 = arith.constant 0 : index
    %c0_2 = arith.constant 0 : index
    %1 = vector.load %arg2[%c0_1, %c0_2] : memref<72x128xbf16, #tpu.memory_space<vmem>>, vector<72x128xbf16>
    %cst = arith.constant dense<0.000000e+00> : vector<512x128xf32>
    %2 = tpu.matmul %0, %1, %cst {dimension_numbers = #tpu.dot_dimension_numbers<[1], [0], [0], [1], [0, 0, 1, 1], [], []>} : vector<512x72xbf16>, vector<72x128xbf16>, vector<512x128xf32> -> vector<512x128xf32>
    %c0_3 = arith.constant 0 : index
    %c0_4 = arith.constant 0 : index
    %3 = vector.load %arg3[%c0_3, %c0_4] : memref<512x128xf32, #tpu.memory_space<vmem>>, vector<512x128xf32>
    tpu.vector_store %arg3[%c0_3, %c0_4], %2 {strides = array<i32>} : memref<512x128xf32, #tpu.memory_space<vmem>>, vector<512x128xf32>,
    %cst_5 = arith.constant dense<0.000000e+00> : vector<128xf32>
    %4 = vector.multi_reduction <add>, %2, %cst_5 [0] : vector<512x128xf32> to vector<128xf32>
    %5 = vector.shape_cast %4 : vector<128xf32> to vector<1x128xf32>
    %6 = arith.mulf %2, %2 : vector<512x128xf32>
    %cst_6 = arith.constant dense<0.000000e+00> : vector<128xf32>
    %7 = vector.multi_reduction <add>, %6, %cst_6 [0] : vector<512x128xf32> to vector<128xf32>
    %8 = vector.shape_cast %7 : vector<128xf32> to vector<1x128xf32>
    %cst_7 = arith.constant 0.000000e+00 : f32
    %9 = vector.broadcast %cst_7 : f32 to vector<6x128xf32>
    %10 = tpu.concatenate %5, %8, %9 in 0 : vector<1x128xf32>, vector<1x128xf32>, vector<6x128xf32> -> vector<8x128xf32>
    %c0_8 = arith.constant 0 : index
    %c0_9 = arith.constant 0 : index
    %11 = vector.load %arg4[%c0_8, %c0_9] : memref<8x128xf32, #tpu.memory_space<vmem>>, vector<8x128xf32>
    tpu.vector_store %arg4[%c0_8, %c0_9], %10 {strides = array<i32>} : memref<8x128xf32, #tpu.memory_space<vmem>>, vector<8x128xf32>,
    return
  }
  func.func @transform_0(%arg0: i32) -> (i32, i32) {
    %c0_i32 = arith.constant 0 : i32
    %c0_i32_0 = arith.constant 0 : i32
    return %arg0, %c0_i32 : i32, i32
  }
  func.func @transform_1(%arg0: i32) -> (i32, i32) {
    %c0_i32 = arith.constant 0 : i32
    %c0_i32_0 = arith.constant 0 : i32
    %c0_i32_1 = arith.constant 0 : i32
    return %c0_i32, %c0_i32_0 : i32, i32
  }
  func.func @transform_2(%arg0: i32) -> (i32, i32) {
    %c0_i32 = arith.constant 0 : i32
    %c0_i32_0 = arith.constant 0 : i32
    return %arg0, %c0_i32 : i32, i32
  }
  func.func @transform_3(%arg0: i32) -> (i32, i32) {
    %c0_i32 = arith.constant 0 : i32
    %c0_i32_0 = arith.constant 0 : i32
    return %arg0, %c0_i32 : i32, i32
  }
}

module attributes {stable_mosaic.version = 11 : i64} {
  func.func @_bn_lrelu_kernel(%arg0: i32, %arg1: memref<512x128xf32, #tpu.memory_space<vmem>>, %arg2: memref<1x128xf32, #tpu.memory_space<vmem>>, %arg3: memref<1x128xf32, #tpu.memory_space<vmem>>, %arg4: memref<512x128xf32, #tpu.memory_space<vmem>>) attributes {dimension_semantics = [#tpu.dimension_semantics<parallel>], iteration_bounds = array<i64: 4>, scalar_prefetch = 0 : i64, scratch_operands = 0 : i64, tpu.core_type = #tpu.core_type<tc>, window_params = [{transform_indices = @transform_0, window_bounds = array<i64: 512, 128>}, {pipeline_mode = #tpu.pipeline_mode<synchronous>, transform_indices = @transform_1, window_bounds = array<i64: 1, 128>}, {pipeline_mode = #tpu.pipeline_mode<synchronous>, transform_indices = @transform_2, window_bounds = array<i64: 1, 128>}, {transform_indices = @transform_3, window_bounds = array<i64: 512, 128>}]} {
    %c0 = arith.constant 0 : index
    %c0_0 = arith.constant 0 : index
    %0 = vector.load %arg1[%c0, %c0_0] : memref<512x128xf32, #tpu.memory_space<vmem>>, vector<512x128xf32>
    %c0_1 = arith.constant 0 : index
    %c0_2 = arith.constant 0 : index
    %1 = vector.load %arg2[%c0_1, %c0_2] : memref<1x128xf32, #tpu.memory_space<vmem>>, vector<1x128xf32>
    %2 = vector.broadcast %1 : vector<1x128xf32> to vector<512x128xf32>
    %3 = arith.mulf %0, %2 : vector<512x128xf32>
    %c0_3 = arith.constant 0 : index
    %c0_4 = arith.constant 0 : index
    %4 = vector.load %arg3[%c0_3, %c0_4] : memref<1x128xf32, #tpu.memory_space<vmem>>, vector<1x128xf32>
    %5 = vector.broadcast %4 : vector<1x128xf32> to vector<512x128xf32>
    %6 = arith.addf %3, %5 : vector<512x128xf32>
    %cst = arith.constant 0.000000e+00 : f32
    %7 = vector.broadcast %cst : f32 to vector<512x128xf32>
    %8 = arith.cmpf ogt, %6, %7 : vector<512x128xf32>
    %cst_5 = arith.constant 2.000000e-01 : f32
    %9 = vector.broadcast %cst_5 : f32 to vector<512x128xf32>
    %10 = arith.mulf %9, %6 : vector<512x128xf32>
    %11 = arith.select %8, %6, %10 : vector<512x128xi1>, vector<512x128xf32>
    %c0_6 = arith.constant 0 : index
    %c0_7 = arith.constant 0 : index
    %12 = vector.load %arg4[%c0_6, %c0_7] : memref<512x128xf32, #tpu.memory_space<vmem>>, vector<512x128xf32>
    tpu.vector_store %arg4[%c0_6, %c0_7], %11 {strides = array<i32>} : memref<512x128xf32, #tpu.memory_space<vmem>>, vector<512x128xf32>,
    return
  }
  func.func @transform_0(%arg0: i32) -> (i32, i32) {
    %c0_i32 = arith.constant 0 : i32
    %c0_i32_0 = arith.constant 0 : i32
    return %arg0, %c0_i32 : i32, i32
  }
  func.func @transform_1(%arg0: i32) -> (i32, i32) {
    %c0_i32 = arith.constant 0 : i32
    %c0_i32_0 = arith.constant 0 : i32
    %c0_i32_1 = arith.constant 0 : i32
    return %c0_i32, %c0_i32_0 : i32, i32
  }
  func.func @transform_2(%arg0: i32) -> (i32, i32) {
    %c0_i32 = arith.constant 0 : i32
    %c0_i32_0 = arith.constant 0 : i32
    %c0_i32_1 = arith.constant 0 : i32
    return %c0_i32, %c0_i32_0 : i32, i32
  }
  func.func @transform_3(%arg0: i32) -> (i32, i32) {
    %c0_i32 = arith.constant 0 : i32
    %c0_i32_0 = arith.constant 0 : i32
    return %arg0, %c0_i32 : i32, i32
  }
}

module attributes {stable_mosaic.version = 11 : i64} {
  func.func @_matmul_tanh_kernel(%arg0: i32, %arg1: memref<512x72xbf16, #tpu.memory_space<vmem>>, %arg2: memref<72x128xbf16, #tpu.memory_space<vmem>>, %arg3: memref<512x128xf32, #tpu.memory_space<vmem>>) attributes {dimension_semantics = [#tpu.dimension_semantics<parallel>], iteration_bounds = array<i64: 4>, scalar_prefetch = 0 : i64, scratch_operands = 0 : i64, tpu.core_type = #tpu.core_type<tc>, window_params = [{transform_indices = @transform_0, window_bounds = array<i64: 512, 72>}, {pipeline_mode = #tpu.pipeline_mode<synchronous>, transform_indices = @transform_1, window_bounds = array<i64: 72, 128>}, {transform_indices = @transform_2, window_bounds = array<i64: 512, 128>}]} {
    %c0 = arith.constant 0 : index
    %c0_0 = arith.constant 0 : index
    %0 = vector.load %arg1[%c0, %c0_0] : memref<512x72xbf16, #tpu.memory_space<vmem>>, vector<512x72xbf16>
    %c0_1 = arith.constant 0 : index
    %c0_2 = arith.constant 0 : index
    %1 = vector.load %arg2[%c0_1, %c0_2] : memref<72x128xbf16, #tpu.memory_space<vmem>>, vector<72x128xbf16>
    %cst = arith.constant dense<0.000000e+00> : vector<512x128xf32>
    %2 = tpu.matmul %0, %1, %cst {dimension_numbers = #tpu.dot_dimension_numbers<[1], [0], [0], [1], [0, 0, 1, 1], [], []>} : vector<512x72xbf16>, vector<72x128xbf16>, vector<512x128xf32> -> vector<512x128xf32>
    %3 = math.tanh %2 : vector<512x128xf32>
    %c0_3 = arith.constant 0 : index
    %c0_4 = arith.constant 0 : index
    %4 = vector.load %arg3[%c0_3, %c0_4] : memref<512x128xf32, #tpu.memory_space<vmem>>, vector<512x128xf32>
    tpu.vector_store %arg3[%c0_3, %c0_4], %3 {strides = array<i32>} : memref<512x128xf32, #tpu.memory_space<vmem>>, vector<512x128xf32>,
    return
  }
  func.func @transform_0(%arg0: i32) -> (i32, i32) {
    %c0_i32 = arith.constant 0 : i32
    %c0_i32_0 = arith.constant 0 : i32
    return %arg0, %c0_i32 : i32, i32
  }
  func.func @transform_1(%arg0: i32) -> (i32, i32) {
    %c0_i32 = arith.constant 0 : i32
    %c0_i32_0 = arith.constant 0 : i32
    %c0_i32_1 = arith.constant 0 : i32
    return %c0_i32, %c0_i32_0 : i32, i32
  }
  func.func @transform_2(%arg0: i32) -> (i32, i32) {
    %c0_i32 = arith.constant 0 : i32
    %c0_i32_0 = arith.constant 0 : i32
    return %arg0, %c0_i32 : i32, i32
  }
}

</mosaic_0001>

<bundles_post_ra>
// kernel: _lambda_.11
= control target key start
LH: loop header
LB: loop body
LE: loop exit
PB: predicated region body
PF: predicated region fallthrough
CT: control target
= control target key end

     0   :  { %v390_v3 = vmov 0   ;;  %vm63_vm0 = vcmask 130048   ;;  %vm343_vm1 = vcmask 1040384   ;;  %vm352_vm2 = vcmask 1041408   ;;  %s502_s1 = inlined_call_operand.vmem [shape: bf16[16,1024], index: 1, kind: input, shape index: {}]   ;;  %s503_s0 = inlined_call_operand.vmem [shape: bf16[8,16], index: 0, kind: input, shape index: {}]   ;;  %s504_s2 = inlined_call_operand.vmem [shape: f32[8,1024], index: 2, kind: output, shape index: {0}]   ;;  %s505_s3 = inlined_call_operand.vmem [shape: f32[8,1024], index: 3, kind: output, shape index: {1}]  }
   0x1   :  { %v15_v0 = vld [vmem:[%s502_s1] sm:$0xff]  ;;  %v16_v2 = vld [vmem:[%s502_s1 + $0x8] sm:$0xff]  ;;  %99 = vmatprep.mubr.bf16.mxu0 %v390_v3  ;;  %140 = vmatprep.mubr.bf16.mxu1 %v390_v3  ;;  %v17_v7 = vld [vmem:[%s502_s1 + $0x10] sm:$0xff] }
   0x2   :  { %v19_v1 = vld [vmem:[%s502_s1 + $0x20] sm:$0xff]  ;;  %v20_v5 = vld [vmem:[%s502_s1 + $0x28] sm:$0xff]  ;;  %v21_v10 = vld [vmem:[%s502_s1 + $0x30] sm:$0xff] }
   0x3   :  { %v378_v4 = vcombine.high %v15_v0, %v19_v1  ;;  %v377_v6 = vcombine.low %v15_v0, %v19_v1  ;;  %v380_v8 = vcombine.high %v16_v2, %v20_v5  ;;  %v379_v9 = vcombine.low %v16_v2, %v20_v5  ;;  %v18_v11 = vld [vmem:[%s502_s1 + $0x18] sm:$0xff]  ;;  %v14_v15 = vld [vmem:[%s503_s0] sm:$0xf] }
   0x4   :  { %v22_v12 = vld [vmem:[%s502_s1 + $0x38] sm:$0xff]  ;;  %v382_v13 = vcombine.high %v17_v7, %v21_v10  ;;  %v381_v16 = vcombine.low %v17_v7, %v21_v10 }
   0x5   :  { %67 = vmatprep.subr.bf16.mxu0 %v378_v4  ;;  %v384_v14 = vcombine.high %v18_v11, %v22_v12  ;;  %108 = vmatprep.subr.bf16.mxu1 %v380_v8  ;;  %v383_v17 = vcombine.low %v18_v11, %v22_v12 }
   0x6   :  { %68 = vmatpush1.bf16.msra.mxu0 %v377_v6  ;;  %109 = vmatpush1.bf16.msra.mxu1 %v379_v9 }
   0x7   :  { %149 = vmatprep.subr.bf16.mxu0 %v382_v13  ;;  %190 = vmatprep.subr.bf16.mxu1 %v384_v14 }
   0x9   :  { %385 = vmatmul.mubr.msk.bf16.vlgmr.msra.gmra.mrb[0].mxu0 %vm63_vm0, %v14_v15  ;;  %386 = vmatmul.mubr.msk.bf16.vlgmr.msra.gmra.mrb[0].mxu1 %vm63_vm0, %v14_v15 }
   0xa   :  { %150 = vmatpush1.bf16.msra.mxu0 %v381_v16  ;;  %191 = vmatpush1.bf16.msra.mxu1 %v383_v17 }
   0xb   :  { %181 = vmatprep.mubr.bf16.mxu0 %v390_v3  ;;  %222 = vmatprep.mubr.bf16.mxu1 %v390_v3 }
  0x11   :  { %387 = vmatmul.mubr.msk.bf16.vlgmr.msra.gmra.mrb[4].mxu0 %vm63_vm0, %v14_v15  ;;  %388 = vmatmul.mubr.msk.bf16.vlgmr.msra.gmra.mrb[4].mxu1 %vm63_vm0, %v14_v15 }
  0xdc   :  { %v101_v18 = vpop.f32.mrb[0].mxu0  ;;  %v142_v21 = vpop.f32.mrb[0].mxu1 }
  0xdd   :  { %231 = vst [vmem:[%s504_s2] sm:$0xff] %v101_v18  ;;  %v239_v19 = vrot.slane %v101_v18, 4  ;;  %v287_v20 = vmul.f32 %v101_v18, %v101_v18  ;;  %v103_v22 = vpop.f32.mrb[1].mxu0  ;;  %233 = vst [vmem:[%s504_s2 + $0x10] sm:$0xff] %v142_v21  ;;  %v251_v23 = vrot.slane %v142_v21, 4  ;;  %v289_v24 = vmul.f32 %v142_v21, %v142_v21  ;;  %v144_v27 = vpop.f32.mrb[1].mxu1 }
  0xde   :  { %232 = vst [vmem:[%s504_s2 + $0x8] sm:$0xff] %v103_v22  ;;  %v245_v25 = vrot.slane %v103_v22, 4  ;;  %v288_v26 = vmul.f32 %v103_v22, %v103_v22  ;;  %v105_v28 = vpop.f32.mrb[2].mxu0  ;;  %234 = vst [vmem:[%s504_s2 + $0x18] sm:$0xff] %v144_v27  ;;  %v257_v31 = vrot.slane %v144_v27, 4  ;;  %v290_v32 = vmul.f32 %v144_v27, %v144_v27  ;;  %v146_v33 = vpop.f32.mrb[2].mxu1 }
  0xdf   :  { %v240_v29 = vadd.f32 %v239_v19, %v101_v18  ;;  %v295_v30 = vrot.slane %v287_v20, 4  ;;  %v106_v34 = vpop.f32.mrb[3].mxu0  ;;  %v252_v35 = vadd.f32 %v251_v23, %v142_v21  ;;  %v307_v36 = vrot.slane %v289_v24, 4  ;;  %v147_v39 = vpop.f32.mrb[3].mxu1 }
  0xe0   :  { %v246_v37 = vadd.f32 %v245_v25, %v103_v22  ;;  %v301_v38 = vrot.slane %v288_v26, 4  ;;  %v258_v42 = vadd.f32 %v257_v31, %v144_v27  ;;  %v313_v43 = vrot.slane %v290_v32, 4 }
  0xe1   :  { %v241_v40 = vrot.slane %v240_v29, 2  ;;  %v296_v41 = vadd.f32 %v295_v30, %v287_v20  ;;  %v253_v44 = vrot.slane %v252_v35, 2  ;;  %v308_v45 = vadd.f32 %v307_v36, %v289_v24 }
  0xe2   :  { %v247_v46 = vrot.slane %v246_v37, 2  ;;  %v302_v47 = vadd.f32 %v301_v38, %v288_v26  ;;  %v259_v50 = vrot.slane %v258_v42, 2  ;;  %v314_v51 = vadd.f32 %v313_v43, %v290_v32 }
  0xe3   :  { %v242_v48 = vadd.f32 %v241_v40, %v240_v29  ;;  %v297_v49 = vrot.slane %v296_v41, 2  ;;  %v254_v52 = vadd.f32 %v253_v44, %v252_v35  ;;  %v309_v53 = vrot.slane %v308_v45, 2 }
  0xe4   :  { %v248_v54 = vadd.f32 %v247_v46, %v246_v37  ;;  %v303_v55 = vrot.slane %v302_v47, 2  ;;  %v183_v56 = vpop.f32.mrb[4].mxu0  ;;  %v260_v59 = vadd.f32 %v259_v50, %v258_v42  ;;  %v315_v60 = vrot.slane %v314_v51, 2  ;;  %v224_v61 = vpop.f32.mrb[4].mxu1 }
  0xe5   :  { %v243_v57 = vrot.slane %v242_v48, 1  ;;  %v298_v58 = vadd.f32 %v297_v49, %v296_v41  ;;  %235 = vst [vmem:[%s504_s2 + $0x20] sm:$0xff] %v183_v56  ;;  %v185_v62 = vpop.f32.mrb[5].mxu0  ;;  %v255_v63 = vrot.slane %v254_v52, 1  ;;  %v310_v0 = vadd.f32 %v309_v53, %v308_v45  ;;  %237 = vst [vmem:[%s504_s2 + $0x30] sm:$0xff] %v224_v61  ;;  %v226_v3 = vpop.f32.mrb[5].mxu1 }
  0xe6   :  { %v249_v1 = vrot.slane %v248_v54, 1  ;;  %v304_v2 = vadd.f32 %v303_v55, %v302_v47  ;;  %236 = vst [vmem:[%s504_s2 + $0x28] sm:$0xff] %v185_v62  ;;  %v187_v4 = vpop.f32.mrb[6].mxu0  ;;  %v261_v7 = vrot.slane %v260_v59, 1  ;;  %v316_v8 = vadd.f32 %v315_v60, %v314_v51  ;;  %238 = vst [vmem:[%s504_s2 + $0x38] sm:$0xff] %v226_v3  ;;  %v228_v9 = vpop.f32.mrb[6].mxu1 }
  0xe7   :  { %v244_v5 = vadd.f32 %v243_v57, %v242_v48  ;;  %v299_v6 = vrot.slane %v298_v58, 1  ;;  %v188_v10 = vpop.f32.mrb[7].mxu0  ;;  %v256_v11 = vadd.f32 %v255_v63, %v254_v52  ;;  %v311_v12 = vrot.slane %v310_v0, 1  ;;  %v229_v15 = vpop.f32.mrb[7].mxu1 }
  0xe8   :  { %v250_v13 = vadd.f32 %v249_v1, %v248_v54  ;;  %v305_v14 = vrot.slane %v304_v2, 1  ;;  %v262_v17 = vadd.f32 %v261_v7, %v260_v59  ;;  %v317_v18 = vrot.slane %v316_v8, 1 }
  0xe9   :  { %v300_v16 = vadd.f32 %v299_v6, %v298_v58  ;;  %v263_v19 = vrot.slane %v183_v56, 4  ;;  %v312_v20 = vadd.f32 %v311_v12, %v310_v0  ;;  %v291_v22 = vmul.f32 %v183_v56, %v183_v56 }
  0xea   :  { %v306_v21 = vadd.f32 %v305_v14, %v304_v2  ;;  %v275_v23 = vrot.slane %v224_v61, 4  ;;  %v318_v25 = vadd.f32 %v317_v18, %v316_v8  ;;  %v293_v27 = vmul.f32 %v224_v61, %v224_v61 }
  0xeb   :  { %v344_v24 = vsel %vm343_vm1, %v244_v5, %v300_v16  ;;  %v264_v26 = vadd.f32 %v263_v19, %v183_v56  ;;  %v346_v29 = vsel %vm343_vm1, %v256_v11, %v312_v20  ;;  %v319_v31 = vrot.slane %v291_v22, 4 }
  0xec   :  { %v353_v28 = vsel %vm352_vm2, %v344_v24, 0.0  ;;  %v345_v30 = vsel %vm343_vm1, %v250_v13, %v306_v21  ;;  %v355_v32 = vsel %vm352_vm2, %v346_v29, 0.0  ;;  %v347_v34 = vsel %vm343_vm1, %v262_v17, %v318_v25 }
  0xed   :  { %361 = vst [vmem:[%s505_s3] sm:$0xff] %v353_v28  ;;  %v354_v33 = vsel %vm352_vm2, %v345_v30, 0.0  ;;  %v265_v35 = vrot.slane %v264_v26, 2  ;;  %363 = vst [vmem:[%s505_s3 + $0x10] sm:$0xff] %v355_v32  ;;  %v356_v36 = vsel %vm352_vm2, %v347_v34, 0.0  ;;  %v320_v37 = vadd.f32 %v319_v31, %v291_v22 }
  0xee   :  { %362 = vst [vmem:[%s505_s3 + $0x8] sm:$0xff] %v354_v33  ;;  %v276_v38 = vadd.f32 %v275_v23, %v224_v61  ;;  %v331_v39 = vrot.slane %v293_v27, 4  ;;  %364 = vst [vmem:[%s505_s3 + $0x18] sm:$0xff] %v356_v36  ;;  %v269_v41 = vrot.slane %v185_v62, 4  ;;  %v292_v42 = vmul.f32 %v185_v62, %v185_v62 }
  0xef   :  { %v266_v40 = vadd.f32 %v265_v35, %v264_v26  ;;  %v281_v43 = vrot.slane %v226_v3, 4  ;;  %v321_v44 = vrot.slane %v320_v37, 2  ;;  %v294_v47 = vmul.f32 %v226_v3, %v226_v3 }
  0xf0   :  { %v277_v45 = vrot.slane %v276_v38, 2  ;;  %v332_v46 = vadd.f32 %v331_v39, %v293_v27  ;;  %v270_v49 = vadd.f32 %v269_v41, %v185_v62  ;;  %v325_v50 = vrot.slane %v292_v42, 4 }
  0xf1   :  { %v267_v48 = vrot.slane %v266_v40, 1  ;;  %v282_v51 = vadd.f32 %v281_v43, %v226_v3  ;;  %v322_v52 = vadd.f32 %v321_v44, %v320_v37  ;;  %v337_v55 = vrot.slane %v294_v47, 4 }
  0xf2   :  { %v278_v53 = vadd.f32 %v277_v45, %v276_v38  ;;  %v333_v54 = vrot.slane %v332_v46, 2  ;;  %v271_v56 = vrot.slane %v270_v49, 2  ;;  %v326_v57 = vadd.f32 %v325_v50, %v292_v42 }
  0xf3   :  { %v283_v58 = vrot.slane %v282_v51, 2  ;;  %v323_v59 = vrot.slane %v322_v52, 1  ;;  %v338_v63 = vadd.f32 %v337_v55, %v294_v47  ;;  %v268_v4 = vadd.f32 %v267_v48, %v266_v40 }
  0xf4   :  { %v279_v60 = vrot.slane %v278_v53, 1  ;;  %v334_v61 = vadd.f32 %v333_v54, %v332_v46  ;;  %v272_v0 = vadd.f32 %v271_v56, %v270_v49  ;;  %v327_v1 = vrot.slane %v326_v57, 2 }
  0xf5   :  { %v284_v2 = vadd.f32 %v283_v58, %v282_v51  ;;  %v324_v5 = vadd.f32 %v323_v59, %v322_v52  ;;  %v339_v62 = vrot.slane %v338_v63, 2 }
  0xf6   :  { %v335_v6 = vrot.slane %v334_v61, 1  ;;  %v280_v7 = vadd.f32 %v279_v60, %v278_v53  ;;  %v273_v3 = vrot.slane %v272_v0, 1  ;;  %v328_v8 = vadd.f32 %v327_v1, %v326_v57 }
  0xf7   :  { %v348_v9 = vsel %vm343_vm1, %v268_v4, %v324_v5  ;;  %v285_v11 = vrot.slane %v284_v2, 1  ;;  %v340_v12 = vadd.f32 %v339_v62, %v338_v63 }
  0xf8   :  { %v336_v10 = vadd.f32 %v335_v6, %v334_v61  ;;  %v357_v13 = vsel %vm352_vm2, %v348_v9, 0.0  ;;  %v329_v14 = vrot.slane %v328_v8, 1  ;;  %v274_v18 = vadd.f32 %v273_v3, %v272_v0 }
  0xf9   :  { %365 = vst [vmem:[%s505_s3 + $0x20] sm:$0xff] %v357_v13  ;;  %v341_v16 = vrot.slane %v340_v12, 1  ;;  %v286_v20 = vadd.f32 %v285_v11, %v284_v2 }
  0xfa   :  { %v350_v15 = vsel %vm343_vm1, %v280_v7, %v336_v10  ;;  %v330_v19 = vadd.f32 %v329_v14, %v328_v8 }
  0xfb   :  { %v359_v17 = vsel %vm352_vm2, %v350_v15, 0.0  ;;  %v342_v21 = vadd.f32 %v341_v16, %v340_v12 }
  0xfc   :  { %367 = vst [vmem:[%s505_s3 + $0x30] sm:$0xff] %v359_v17  ;;  %v349_v22 = vsel %vm343_vm1, %v274_v18, %v330_v19 }
  0xfd   :  { %v358_v23 = vsel %vm352_vm2, %v349_v22, 0.0  ;;  %v351_v24 = vsel %vm343_vm1, %v286_v20, %v342_v21 }
  0xfe   :  { %366 = vst [vmem:[%s505_s3 + $0x28] sm:$0xff] %v358_v23  ;;  %v360_v25 = vsel %vm352_vm2, %v351_v24, 0.0 }
  0xff   :  { %368 = vst [vmem:[%s505_s3 + $0x38] sm:$0xff] %v360_v25 }

// kernel: _lambda_.12
= control target key start
LH: loop header
LB: loop body
LE: loop exit
PB: predicated region body
PF: predicated region fallthrough
CT: control target
= control target key end

     0   :  { %v24_v0 = vlaneseq  ;;  %s252_s1 = inlined_call_operand.vmem [shape: f32[1,1024], index: 1, kind: input, shape index: {}]   ;;  %s253_s2 = inlined_call_operand.vmem [shape: f32[1,1024], index: 2, kind: input, shape index: {}]   ;;  %s254_s0 = inlined_call_operand.vmem [shape: f32[8,1024], index: 0, kind: input, shape index: {}]   ;;  %s255_s3 = inlined_call_operand.vmem [shape: f32[8,1024], index: 3, kind: output, shape index: {}]  }
   0x1   :  { %v22_v2 = vld [vmem:[%s252_s1] sm:$0xff]  ;;  %v15_v9 = vld [vmem:[%s254_s0 + $0x8] sm:$0xff]  ;;  %v16_v18 = vld [vmem:[%s254_s0 + $0x10] sm:$0xff] }
   0x2   :  { %v178_v1 = vshrl.u32 %v24_v0, 7  ;;  %v186_v3 = vld [vmem:[%s253_s2] sm:$0xff]  ;;  %v17_v19 = vld [vmem:[%s254_s0 + $0x18] sm:$0xff]  ;;  %v19_v29 = vld [vmem:[%s254_s0 + $0x28] sm:$0xff] }
   0x3   :  { %v14_v8 = vld [vmem:[%s254_s0] sm:$0xff]  ;;  %v20_v41 = vld [vmem:[%s254_s0 + $0x30] sm:$0xff]  ;;  %v21_v51 = vld [vmem:[%s254_s0 + $0x38] sm:$0xff] }
   0x4   :  { %v26_v4 = vsub.s32 0, %v178_v1  ;;  %v30_v5 = vsub.s32 1, %v178_v1  ;;  %v34_v6 = vsub.s32 2, %v178_v1  ;;  %v38_v7 = vsub.s32 3, %v178_v1  ;;  %v18_v24 = vld [vmem:[%s254_s0 + $0x20] sm:$0xff] }
   0x5   :  { %v42_v10 = vsub.s32 4, %v178_v1  ;;  %v46_v11 = vsub.s32 5, %v178_v1  ;;  %v50_v12 = vsub.s32 6, %v178_v1  ;;  %v54_v13 = vsub.s32 7, %v178_v1 }
   0x6   :  { %v27_v14 = vrot.slane %v22_v2, %v26_v4  ;;  %v77_v15 = vrot.slane %v186_v3, %v26_v4  ;;  %v31_v16 = vrot.slane %v22_v2, %v30_v5  ;;  %v81_v17 = vrot.slane %v186_v3, %v30_v5 }
   0x7   :  { %v35_v20 = vrot.slane %v22_v2, %v34_v6  ;;  %v85_v21 = vrot.slane %v186_v3, %v34_v6  ;;  %v39_v22 = vrot.slane %v22_v2, %v38_v7  ;;  %v89_v23 = vrot.slane %v186_v3, %v38_v7 }
   0x8   :  { %v64_v25 = vmul.f32 %v27_v14, %v14_v8  ;;  %v65_v26 = vmul.f32 %v31_v16, %v15_v9  ;;  %v43_v27 = vrot.slane %v22_v2, %v42_v10  ;;  %v93_v28 = vrot.slane %v186_v3, %v42_v10 }
   0x9   :  { %v66_v30 = vmul.f32 %v35_v20, %v16_v18  ;;  %v67_v31 = vmul.f32 %v39_v22, %v17_v19  ;;  %v47_v32 = vrot.slane %v22_v2, %v46_v11  ;;  %v97_v33 = vrot.slane %v186_v3, %v46_v11 }
   0xa   :  { %v114_v34 = vadd.f32 %v77_v15, %v64_v25  ;;  %v115_v35 = vadd.f32 %v81_v17, %v65_v26  ;;  %v68_v36 = vmul.f32 %v43_v27, %v18_v24  ;;  %v51_v37 = vrot.slane %v22_v2, %v50_v12 }
   0xb   :  { %v116_v38 = vadd.f32 %v85_v21, %v66_v30  ;;  %v117_v39 = vadd.f32 %v89_v23, %v67_v31  ;;  %v69_v40 = vmul.f32 %v47_v32, %v19_v29  ;;  %v101_v42 = vrot.slane %v186_v3, %v50_v12 }
   0xc   :  { %vm122_vm0 = vcmp.gt.f32.partialorder %v114_v34, 0.0  ;;  %v130_v43 = vmul.f32 0.2, %v114_v34  ;;  %vm123_vm1 = vcmp.gt.f32.partialorder %v115_v35, 0.0  ;;  %v131_v44 = vmul.f32 0.2, %v115_v35 }
   0xd   :  { %vm124_vm2 = vcmp.gt.f32.partialorder %v116_v38, 0.0  ;;  %v132_v45 = vmul.f32 0.2, %v116_v38  ;;  %vm125_vm3 = vcmp.gt.f32.partialorder %v117_v39, 0.0  ;;  %v133_v46 = vmul.f32 0.2, %v117_v39 }
   0xe   :  { %v138_v47 = vsel %vm122_vm0, %v114_v34, %v130_v43  ;;  %v139_v48 = vsel %vm123_vm1, %v115_v35, %v131_v44  ;;  %v118_v49 = vadd.f32 %v93_v28, %v68_v36  ;;  %v119_v50 = vadd.f32 %v97_v33, %v69_v40 }
   0xf   :  { %146 = vst [vmem:[%s255_s3] sm:$0xff] %v138_v47  ;;  %147 = vst [vmem:[%s255_s3 + $0x8] sm:$0xff] %v139_v48  ;;  %v140_v52 = vsel %vm124_vm2, %v116_v38, %v132_v45  ;;  %v141_v53 = vsel %vm125_vm3, %v117_v39, %v133_v46  ;;  %v70_v54 = vmul.f32 %v51_v37, %v20_v41 }
  0x10   :  { %v55_v55 = vrot.slane %v22_v2, %v54_v13  ;;  %148 = vst [vmem:[%s255_s3 + $0x10] sm:$0xff] %v140_v52  ;;  %149 = vst [vmem:[%s255_s3 + $0x18] sm:$0xff] %v141_v53  ;;  %vm126_vm4 = vcmp.gt.f32.partialorder %v118_v49, 0.0  ;;  %v134_v56 = vmul.f32 0.2, %v118_v49  ;;  %vm127_vm5 = vcmp.gt.f32.partialorder %v119_v50, 0.0 }
  0x11   :  { %v135_v57 = vmul.f32 0.2, %v119_v50  ;;  %v120_v58 = vadd.f32 %v101_v42, %v70_v54  ;;  %v105_v60 = vrot.slane %v186_v3, %v54_v13 }
  0x12   :  { %v71_v59 = vmul.f32 %v55_v55, %v21_v51  ;;  %v142_v61 = vsel %vm126_vm4, %v118_v49, %v134_v56 }
  0x13   :  { %v143_v62 = vsel %vm127_vm5, %v119_v50, %v135_v57  ;;  %150 = vst [vmem:[%s255_s3 + $0x20] sm:$0xff] %v142_v61  ;;  %vm128_vm6 = vcmp.gt.f32.partialorder %v120_v58, 0.0  ;;  %v136_v63 = vmul.f32 0.2, %v120_v58 }
  0x14   :  { %151 = vst [vmem:[%s255_s3 + $0x28] sm:$0xff] %v143_v62  ;;  %v121_v0 = vadd.f32 %v105_v60, %v71_v59 }
  0x15   :  { %v144_v1 = vsel %vm128_vm6, %v120_v58, %v136_v63 }
  0x16   :  { %vm129_vm7 = vcmp.gt.f32.partialorder %v121_v0, 0.0  ;;  %v137_v2 = vmul.f32 0.2, %v121_v0  ;;  %152 = vst [vmem:[%s255_s3 + $0x30] sm:$0xff] %v144_v1 }
  0x18   :  { %v145_v3 = vsel %vm129_vm7, %v121_v0, %v137_v2 }
  0x19   :  { %153 = vst [vmem:[%s255_s3 + $0x38] sm:$0xff] %v145_v3 }

// kernel: _lambda_.13
= control target key start
LH: loop header
LB: loop body
LE: loop exit
PB: predicated region body
PF: predicated region fallthrough
CT: control target
= control target key end

     0   :  { %9 = vsyncpa [#allocation3], 0  ;;  %s771_s12 = smov [#allocation2]   ;;  %s851_s0 = inlined_call_operand.vmem [shape: bf16[32,576], index: 0, kind: input, shape index: {}]   ;;  %s852_s1 = inlined_call_operand.hbm [shape: bf16[576,128], index: 1, kind: input, shape index: {}]   ;;  %s853_s2 = inlined_call_operand.vmem [shape: f32[32,128], index: 2, kind: output, shape index: {0}]   ;;  %s854_s3 = inlined_call_operand.vmem [shape: f32[8,128], index: 3, kind: output, shape index: {1}]  }
   0x1   :  { %s17_s13 = sshll.u32 %s771_s12, 4  ;;  %s747_s16 = scalar_lea.hbm %s852_s1, 4608  ;;  %s18_s13 = int_to_ptr.vmem [resolvable:$true] %s17_s13 }
   0x2   :  { %p748_p0 = scmp.ne.s32.totalorder %s852_s1, %s747_s16  ;;  %p751_p1 = scmp.lt.u32.totalorder %s747_s16, %s852_s1 }
   0x4   :  { %p753_p2 = pnand %p751_p1, %p748_p0 }
   0x6   :  { %756 = shalt.err (!%p753_p2)
}
   0x7   :  { %s757_s21 = scalar_lea.vmem %s18_s13, 4608  ;;  %p762_p4 = scmp.lt.s32.totalorder %s18_s13, %s18_s13 }
   0x8   :  { %p758_p3 = scmp.ne.s32.totalorder %s18_s13, %s757_s21  ;;  %p763_p5 = scmp.lt.s32.totalorder %s757_s21, %s757_s21 }
   0xa   :  { %p764_p6 = por %p763_p5, %p762_p4 }
   0xc   :  { %p765_p7 = pnand %p764_p6, %p758_p3 }
   0xe   :  { %768 = shalt.err (!%p765_p7)
}
   0xf   :  { %s772_s22 = smov 64   ;;  %s773_s23 = smov 4  }
  0x10   :  { %23 = dma.hbm_to_vmem [thread:$0]  %s852_s1, 4608, %s18_s13, [#allocation3], %s772_s22, %s772_s22, %s773_s23  }
  0x11   :  { %769 = dma.done.wait [#allocation3], 4608  }
  0x12   :  { %770 = vsyncadd [#allocation3], 4294962688  ;;  %v697_v0 = vld [vmem:[#allocation2 + $0x40] sm:$0xff]   ;;  %v701_v4 = vld [vmem:[#allocation2 + $0x48] sm:$0xff]   ;;  %vm378_vm0 = vcmask 523264   ;;  %vm558_vm1 = vcmask 1040384  }
  0x13   :  { %v698_v1 = vld [vmem:[#allocation2 + $0xc0] sm:$0xff]   ;;  %620 = vmatprep.subr.bf16.mxu0 %v697_v0  ;;  %v702_v5 = vld [vmem:[#allocation2 + $0xc8] sm:$0xff]   ;;  %v705_v8 = vld [vmem:[#allocation2 + $0x50] sm:$0xff]   ;;  %vm560_vm2 = vcmask 1041408  }
  0x14   :  { %v699_v2 = vld [vmem:[#allocation2] sm:$0xff]   ;;  %648 = vmatprep.subr.bf16.mxu1 %v698_v1  ;;  %v703_v6 = vld [vmem:[#allocation2 + $0x8] sm:$0xff]   ;;  %v706_v9 = vld [vmem:[#allocation2 + $0xd0] sm:$0xff]  }
  0x15   :  { %v700_v3 = vld [vmem:[#allocation2 + $0x80] sm:$0xff]   ;;  %621 = vmatpush3.bf16.msra.mxu0 %v699_v2  ;;  %v704_v7 = vld [vmem:[#allocation2 + $0x88] sm:$0xff]   ;;  %v707_v10 = vld [vmem:[#allocation2 + $0x10] sm:$0xff]  }
  0x16   :  { %649 = vmatpush3.bf16.msra.mxu1 %v700_v3  ;;  %622 = vmatprep.subr.bf16.mxu0 %v701_v4  ;;  %v708_v11 = vld [vmem:[#allocation2 + $0x90] sm:$0xff]   ;;  %v709_v12 = vld [vmem:[#allocation2 + $0x58] sm:$0xff]   ;;  %v713_v16 = vld [vmem:[#allocation2 + $0x60] sm:$0xff]  }
  0x17   :  { %650 = vmatprep.subr.bf16.mxu1 %v702_v5  ;;  %v710_v13 = vld [vmem:[#allocation2 + $0xd8] sm:$0xff]   ;;  %v714_v17 = vld [vmem:[#allocation2 + $0xe0] sm:$0xff]   ;;  %v717_v20 = vld [vmem:[#allocation2 + $0x68] sm:$0xff]  }
  0x18   :  { %v711_v14 = vld [vmem:[#allocation2 + $0x18] sm:$0xff]   ;;  %v715_v18 = vld [vmem:[#allocation2 + $0x20] sm:$0xff]   ;;  %v718_v21 = vld [vmem:[#allocation2 + $0xe8] sm:$0xff]  }
  0x19   :  { %623 = vmatpush3.bf16.msra.mxu0 %v703_v6  ;;  %v712_v15 = vld [vmem:[#allocation2 + $0x98] sm:$0xff]   ;;  %v716_v19 = vld [vmem:[#allocation2 + $0xa0] sm:$0xff]   ;;  %v719_v22 = vld [vmem:[#allocation2 + $0x28] sm:$0xff]  }
  0x1a   :  { %651 = vmatpush3.bf16.msra.mxu1 %v704_v7  ;;  %624 = vmatprep.subr.bf16.mxu0 %v705_v8  ;;  %v720_v23 = vld [vmem:[#allocation2 + $0xa8] sm:$0xff]   ;;  %v721_v24 = vld [vmem:[#allocation2 + $0x70] sm:$0xff]   ;;  %v725_v28 = vld [vmem:[#allocation2 + $0x78] sm:$0xff]  }
  0x1b   :  { %652 = vmatprep.subr.bf16.mxu1 %v706_v9  ;;  %v722_v25 = vld [vmem:[#allocation2 + $0xf0] sm:$0xff]   ;;  %v726_v29 = vld [vmem:[#allocation2 + $0xf8] sm:$0xff]   ;;  %v734_v35 = vld [vmem:[%s851_s0 + $0xc] ss:$20 sps:$4 sm:$0xff]  }
  0x1c   :  { %v723_v26 = vld [vmem:[#allocation2 + $0x30] sm:$0xff]   ;;  %v727_v30 = vld [vmem:[#allocation2 + $0x38] sm:$0xff]   ;;  %v735_v36 = vld [vmem:[#allocation2 + $0x100] sm:$0xff]   ;;  %466 = vmatprep.mubr.bf16.mxu1 %v734_v35 }
  0x1d   :  { %625 = vmatpush3.bf16.msra.mxu0 %v707_v10  ;;  %v724_v27 = vld [vmem:[#allocation2 + $0xb0] sm:$0xff]   ;;  %v728_v31 = vld [vmem:[#allocation2 + $0xb8] sm:$0xff]   ;;  %v736_v37 = vld [vmem:[#allocation2 + $0x108] sm:$0xff]  }
  0x1e   :  { %653 = vmatpush3.bf16.msra.mxu1 %v708_v11  ;;  %626 = vmatprep.subr.bf16.mxu0 %v709_v12  ;;  %v729_v32 = vld [vmem:[%s851_s0] ss:$20 sps:$4 sm:$0xff]   ;;  %v731_v33 = vld [vmem:[%s851_s0 + $0x4] ss:$20 sps:$4 sm:$0xff]   ;;  %v732_v34 = vld [vmem:[%s851_s0 + $0x8] ss:$20 sps:$4 sm:$0xff]  }
  0x1f   :  { %654 = vmatprep.subr.bf16.mxu1 %v710_v13  ;;  %417 = vmatprep.mubr.bf16.mxu0 %v731_v33  ;;  %v737_v38 = vld [vmem:[%s851_s0 + $0x2c] ss:$20 sps:$4 sm:$0xff]   ;;  %v739_v39 = vld [vmem:[%s851_s0 + $0x34] ss:$20 sps:$4 sm:$0xff]   ;;  %v742_v42 = vld [vmem:[%s851_s0 + $0x30] ss:$20 sps:$4 sm:$0xff]  }
  0x20   :  { %v741_v40 = vld [vmem:[%s851_s0 + $0x28] ss:$20 sps:$4 sm:$0xff]   ;;  %v743_v41 = vld [vmem:[#allocation2 + $0x110] sm:$0xff]   ;;  %v746_v45 = vld [vmem:[%s851_s0 + $0x38] ss:$20 sps:$4 sm:$0xff]  }
  0x21   :  { %627 = vmatpush3.bf16.msra.mxu0 %v711_v14  ;;  %v745_v43 = vld [vmem:[%s851_s0 + $0x10] ss:$20 sps:$4 sm:$0xff]   ;;  %v744_v44 = vld [vmem:[#allocation2 + $0x118] sm:$0xff]  }
  0x22   :  { %655 = vmatpush3.bf16.msra.mxu1 %v712_v15  ;;  %628 = vmatprep.subr.bf16.mxu0 %v713_v16 }
  0x23   :  { %656 = vmatprep.subr.bf16.mxu1 %v714_v17 }
  0x25   :  { %629 = vmatpush3.bf16.msra.mxu0 %v715_v18 }
  0x26   :  { %657 = vmatpush3.bf16.msra.mxu1 %v716_v19  ;;  %630 = vmatprep.subr.bf16.mxu0 %v717_v20 }
  0x27   :  { %658 = vmatprep.subr.bf16.mxu1 %v718_v21 }
  0x29   :  { %631 = vmatpush3.bf16.msra.mxu0 %v719_v22 }
  0x2a   :  { %659 = vmatpush3.bf16.msra.mxu1 %v720_v23  ;;  %632 = vmatprep.subr.bf16.mxu0 %v721_v24 }
  0x2b   :  { %660 = vmatprep.subr.bf16.mxu1 %v722_v25 }
  0x2d   :  { %633 = vmatpush3.bf16.msra.mxu0 %v723_v26 }
  0x2e   :  { %661 = vmatpush3.bf16.msra.mxu1 %v724_v27  ;;  %634 = vmatprep.subr.bf16.mxu0 %v725_v28 }
  0x2f   :  { %662 = vmatprep.subr.bf16.mxu1 %v726_v29 }
  0x31   :  { %635 = vmatpush3.bf16.msra.mxu0 %v727_v30 }
  0x32   :  { %663 = vmatpush3.bf16.msra.mxu1 %v728_v31  ;;  %682 = vmatprep.subr.bf16.mxu0 %v735_v36 }
  0x34   :  { %418 = vmatmul.mubr.bf16.vlgmr.msra.gmra.mrb[0].mxu0 %v729_v32 }
  0x35   :  { %467 = vmatmul.mubr.bf16.vlgmr.msra.gmra.mrb[0].mxu1 %v732_v34  ;;  %683 = vmatpush3.bf16.msra.mxu0 %v735_v36 }
  0x36   :  { %684 = vmatprep.subr.bf16.mxu0 %v736_v37  ;;  %425 = vmatprep.mubr.bf16.mxu0 %v737_v38 }
  0x37   :  { %474 = vmatprep.mubr.bf16.mxu1 %v739_v39 }
  0x39   :  { %685 = vmatpush3.bf16.msra.mxu0 %v736_v37 }
  0x3a   :  { %686 = vmatprep.subr.bf16.mxu0 %v743_v41 }
  0x3c   :  { %426 = vmatmul.mubr.bf16.gmra.mrb[4].mxu0 %v741_v40 }
  0x3d   :  { %475 = vmatmul.mubr.bf16.gmra.mrb[4].mxu1 %v742_v42  ;;  %690 = vmatprep.mubr.msk.bf16.mxu0 %vm378_vm0, %v745_v43 }
  0x3e   :  { %687 = vmatpush3.bf16.msra.mxu0 %v743_v41 }
  0x3f   :  { %688 = vmatprep.subr.bf16.mxu0 %v744_v44 }
  0x42   :  { %689 = vmatpush3.bf16.msra.mxu0 %v744_v44 }
  0x45   :  { %691 = vmatmul.mubr.msk.bf16.vlgmr.msra.gmra.mrb[8].mxu0 %vm378_vm0, %v746_v45 }
 0x107   :  { %v636_v46 = vpop.f32.mrb[0].mxu0 }
 0x108   :  { %v664_v47 = vpop.f32.mrb[0].mxu1  ;;  %v637_v48 = vpop.f32.mrb[1].mxu0 }
 0x109   :  { %v638_v49 = vadd.f32 %v637_v48, %v636_v46  ;;  %v665_v50 = vpop.f32.mrb[1].mxu1  ;;  %v639_v51 = vpop.f32.mrb[2].mxu0 }
 0x10a   :  { %v666_v52 = vadd.f32 %v665_v50, %v664_v47  ;;  %v667_v53 = vpop.f32.mrb[2].mxu1  ;;  %v640_v54 = vpop.f32.mrb[3].mxu0 }
 0x10b   :  { %v641_v55 = vadd.f32 %v640_v54, %v639_v51  ;;  %v668_v56 = vpop.f32.mrb[3].mxu1 }
 0x10c   :  { %v669_v57 = vadd.f32 %v668_v56, %v667_v53  ;;  %v469_v58 = vadd.f32 %v666_v52, %v638_v49 }
 0x10e   :  { %v472_v59 = vadd.f32 %v669_v57, %v641_v55 }
 0x10f   :  { %v642_v60 = vpop.f32.mrb[4].mxu0 }
 0x110   :  { %v670_v61 = vpop.f32.mrb[4].mxu1  ;;  %v643_v62 = vpop.f32.mrb[5].mxu0 }
 0x111   :  { %v644_v63 = vadd.f32 %v643_v62, %v642_v60  ;;  %v671_v0 = vpop.f32.mrb[5].mxu1  ;;  %v645_v1 = vpop.f32.mrb[6].mxu0 }
 0x112   :  { %v672_v2 = vadd.f32 %v671_v0, %v670_v61  ;;  %v673_v3 = vpop.f32.mrb[6].mxu1  ;;  %v646_v4 = vpop.f32.mrb[7].mxu0 }
 0x113   :  { %v647_v5 = vadd.f32 %v646_v4, %v645_v1  ;;  %v674_v6 = vpop.f32.mrb[7].mxu1 }
 0x114   :  { %v675_v7 = vadd.f32 %v674_v6, %v673_v3  ;;  %v477_v8 = vadd.f32 %v672_v2, %v644_v63 }
 0x116   :  { %v480_v9 = vadd.f32 %v675_v7, %v647_v5 }
 0x118   :  { %v692_v10 = vpop.f32.mrb[8].mxu0 }
 0x119   :  { %v526_v11 = vadd.f32 %v692_v10, %v477_v8  ;;  %v517_v12 = vpop.f32.mrb[9].mxu0 }
 0x11a   :  { %v518_v13 = vadd.f32 %v517_v12, %v469_v58  ;;  %v693_v14 = vpop.f32.mrb[10].mxu0 }
 0x11b   :  { %534 = vst [vmem:[%s853_s2 + $0x10] sm:$0xff] %v526_v11  ;;  %v529_v15 = vadd.f32 %v693_v14, %v480_v9  ;;  %v520_v16 = vpop.f32.mrb[11].mxu0  ;;  %v547_v21 = vmul.f32 %v526_v11, %v526_v11 }
 0x11c   :  { %532 = vst [vmem:[%s853_s2] sm:$0xff] %v518_v13  ;;  %v521_v17 = vadd.f32 %v520_v16, %v472_v59  ;;  %v545_v18 = vmul.f32 %v518_v13, %v518_v13 }
 0x11d   :  { %535 = vst [vmem:[%s853_s2 + $0x18] sm:$0xff] %v529_v15  ;;  %v548_v24 = vmul.f32 %v529_v15, %v529_v15 }
 0x11e   :  { %533 = vst [vmem:[%s853_s2 + $0x8] sm:$0xff] %v521_v17  ;;  %v536_v19 = vadd.f32 %v521_v17, %v518_v13  ;;  %v546_v20 = vmul.f32 %v521_v17, %v521_v17 }
 0x120   :  { %v537_v22 = vadd.f32 %v536_v19, %v526_v11  ;;  %v549_v23 = vadd.f32 %v546_v20, %v545_v18 }
 0x122   :  { %v538_v25 = vadd.f32 %v537_v22, %v529_v15  ;;  %v550_v26 = vadd.f32 %v549_v23, %v547_v21 }
 0x124   :  { %v539_v27 = vrot.slane %v538_v25, 4  ;;  %v551_v28 = vadd.f32 %v550_v26, %v548_v24 }
 0x126   :  { %v540_v29 = vadd.f32 %v539_v27, %v538_v25  ;;  %v552_v30 = vrot.slane %v551_v28, 4 }
 0x128   :  { %v541_v31 = vrot.slane %v540_v29, 2  ;;  %v553_v32 = vadd.f32 %v552_v30, %v551_v28 }
 0x12a   :  { %v542_v33 = vadd.f32 %v541_v31, %v540_v29  ;;  %v554_v34 = vrot.slane %v553_v32, 2 }
 0x12c   :  { %v543_v35 = vrot.slane %v542_v33, 1  ;;  %v555_v36 = vadd.f32 %v554_v34, %v553_v32 }
 0x12e   :  { %v556_v37 = vrot.slane %v555_v36, 1  ;;  %v544_v38 = vadd.f32 %v543_v35, %v542_v33 }
 0x130   :  { %v557_v39 = vadd.f32 %v556_v37, %v555_v36 }
 0x132   :  { %v559_v40 = vsel %vm558_vm1, %v544_v38, %v557_v39 }
 0x133   :  { %v561_v41 = vsel %vm560_vm2, %v559_v40, 0.0 }
 0x134   :  { %562 = vst [vmem:[%s854_s3] sm:$0xff] %v561_v41 }
 0x135   :  { %571 = vsyncpa [#allocation3], 1 }

// kernel: _lambda_.14
= control target key start
LH: loop header
LB: loop body
LE: loop exit
PB: predicated region body
PF: predicated region fallthrough
CT: control target
= control target key end

     0   :  { %s112_s0 = inlined_call_operand.vmem [shape: f32[32,128], index: 0, kind: input, shape index: {}]   ;;  %s113_s1 = inlined_call_operand.vmem [shape: f32[1,128], index: 1, kind: input, shape index: {}]   ;;  %s114_s2 = inlined_call_operand.vmem [shape: f32[1,128], index: 2, kind: input, shape index: {}]   ;;  %s115_s3 = inlined_call_operand.vmem [shape: f32[32,128], index: 3, kind: output, shape index: {}]  }
   0x1   :  { %v14_v0 = vld [vmem:[%s112_s0] sm:$0xff]  ;;  %v15_v4 = vld [vmem:[%s112_s0 + $0x8] sm:$0xff]  ;;  %v16_v5 = vld [vmem:[%s112_s0 + $0x10] sm:$0xff] }
   0x2   :  { %v60_v1 = vld [vmem:[%s113_s1] ss:$0 sm:$0xff]  ;;  %v17_v6 = vld [vmem:[%s112_s0 + $0x18] sm:$0xff] }
   0x3   :  { %v61_v2 = vld [vmem:[%s114_s2] ss:$0 sm:$0xff]  ;;  %v25_v3 = vmul.f32 %v60_v1, %v14_v0  ;;  %v26_v7 = vmul.f32 %v60_v1, %v15_v4  ;;  %v27_v8 = vmul.f32 %v60_v1, %v16_v5  ;;  %v28_v9 = vmul.f32 %v60_v1, %v17_v6 }
   0x5   :  { %v36_v10 = vadd.f32 %v61_v2, %v25_v3  ;;  %v37_v11 = vadd.f32 %v61_v2, %v26_v7  ;;  %v38_v12 = vadd.f32 %v61_v2, %v27_v8  ;;  %v39_v13 = vadd.f32 %v61_v2, %v28_v9 }
   0x7   :  { %vm40_vm0 = vcmp.gt.f32.partialorder %v36_v10, 0.0  ;;  %v44_v14 = vmul.f32 0.2, %v36_v10  ;;  %vm41_vm1 = vcmp.gt.f32.partialorder %v37_v11, 0.0  ;;  %v45_v15 = vmul.f32 0.2, %v37_v11 }
   0x8   :  { %vm42_vm2 = vcmp.gt.f32.partialorder %v38_v12, 0.0  ;;  %v46_v16 = vmul.f32 0.2, %v38_v12  ;;  %vm43_vm3 = vcmp.gt.f32.partialorder %v39_v13, 0.0  ;;  %v47_v18 = vmul.f32 0.2, %v39_v13 }
   0x9   :  { %v48_v17 = vsel %vm40_vm0, %v36_v10, %v44_v14  ;;  %v49_v19 = vsel %vm41_vm1, %v37_v11, %v45_v15 }
   0xa   :  { %52 = vst [vmem:[%s115_s3] sm:$0xff] %v48_v17  ;;  %v50_v20 = vsel %vm42_vm2, %v38_v12, %v46_v16  ;;  %53 = vst [vmem:[%s115_s3 + $0x8] sm:$0xff] %v49_v19  ;;  %v51_v21 = vsel %vm43_vm3, %v39_v13, %v47_v18 }
   0xb   :  { %54 = vst [vmem:[%s115_s3 + $0x10] sm:$0xff] %v50_v20  ;;  %55 = vst [vmem:[%s115_s3 + $0x18] sm:$0xff] %v51_v21 }

// kernel: _lambda_.16
= control target key start
LH: loop header
LB: loop body
LE: loop exit
PB: predicated region body
PF: predicated region fallthrough
CT: control target
= control target key end

     0   :  { %s305_s0 = inlined_call_operand.vmem [shape: f32[128,128], index: 0, kind: input, shape index: {}]   ;;  %s306_s1 = inlined_call_operand.vmem [shape: f32[1,128], index: 1, kind: input, shape index: {}]   ;;  %s307_s2 = inlined_call_operand.vmem [shape: f32[1,128], index: 2, kind: input, shape index: {}]   ;;  %s308_s3 = inlined_call_operand.vmem [shape: f32[128,128], index: 3, kind: output, shape index: {}]  }
   0x1   :  { %v14_v0 = vld [vmem:[%s305_s0] sm:$0xff]  ;;  %v15_v4 = vld [vmem:[%s305_s0 + $0x8] sm:$0xff]  ;;  %v16_v5 = vld [vmem:[%s305_s0 + $0x10] sm:$0xff] }
   0x2   :  { %v172_v1 = vld [vmem:[%s306_s1] ss:$0 sm:$0xff]  ;;  %v17_v6 = vld [vmem:[%s305_s0 + $0x18] sm:$0xff]  ;;  %v19_v11 = vld [vmem:[%s305_s0 + $0x28] sm:$0xff] }
   0x3   :  { %v177_v2 = vld [vmem:[%s307_s2] ss:$0 sm:$0xff]  ;;  %v37_v3 = vmul.f32 %v172_v1, %v14_v0  ;;  %v38_v7 = vmul.f32 %v172_v1, %v15_v4  ;;  %v39_v8 = vmul.f32 %v172_v1, %v16_v5  ;;  %v40_v9 = vmul.f32 %v172_v1, %v17_v6  ;;  %v20_v12 = vld [vmem:[%s305_s0 + $0x30] sm:$0xff]  ;;  %v21_v17 = vld [vmem:[%s305_s0 + $0x38] sm:$0xff] }
   0x4   :  { %v18_v10 = vld [vmem:[%s305_s0 + $0x20] sm:$0xff]  ;;  %v42_v15 = vmul.f32 %v172_v1, %v19_v11  ;;  %v43_v16 = vmul.f32 %v172_v1, %v20_v12  ;;  %v44_v21 = vmul.f32 %v172_v1, %v21_v17  ;;  %v23_v30 = vld [vmem:[%s305_s0 + $0x48] sm:$0xff]  ;;  %v24_v31 = vld [vmem:[%s305_s0 + $0x50] sm:$0xff] }
   0x5   :  { %v60_v13 = vadd.f32 %v177_v2, %v37_v3  ;;  %v41_v14 = vmul.f32 %v172_v1, %v18_v10  ;;  %v61_v18 = vadd.f32 %v177_v2, %v38_v7  ;;  %v62_v19 = vadd.f32 %v177_v2, %v39_v8  ;;  %v22_v25 = vld [vmem:[%s305_s0 + $0x40] sm:$0xff]  ;;  %v25_v43 = vld [vmem:[%s305_s0 + $0x58] sm:$0xff]  ;;  %v27_v45 = vld [vmem:[%s305_s0 + $0x68] sm:$0xff] }
   0x6   :  { %v63_v20 = vadd.f32 %v177_v2, %v40_v9  ;;  %v65_v24 = vadd.f32 %v177_v2, %v42_v15  ;;  %v66_v37 = vadd.f32 %v177_v2, %v43_v16  ;;  %v67_v38 = vadd.f32 %v177_v2, %v44_v21  ;;  %v26_v44 = vld [vmem:[%s305_s0 + $0x60] sm:$0xff]  ;;  %v28_v56 = vld [vmem:[%s305_s0 + $0x70] sm:$0xff]  ;;  %v29_v4 = vld [vmem:[%s305_s0 + $0x78] sm:$0xff] }
   0x7   :  { %vm76_vm0 = vcmp.gt.f32.partialorder %v60_v13, 0.0  ;;  %v92_v22 = vmul.f32 0.2, %v60_v13  ;;  %v64_v23 = vadd.f32 %v177_v2, %v41_v14  ;;  %vm77_vm1 = vcmp.gt.f32.partialorder %v61_v18, 0.0 }
   0x8   :  { %v93_v26 = vmul.f32 0.2, %v61_v18  ;;  %vm78_vm2 = vcmp.gt.f32.partialorder %v62_v19, 0.0  ;;  %v94_v27 = vmul.f32 0.2, %v62_v19  ;;  %vm79_vm3 = vcmp.gt.f32.partialorder %v63_v20, 0.0 }
   0x9   :  { %v108_v28 = vsel %vm76_vm0, %v60_v13, %v92_v22  ;;  %v95_v29 = vmul.f32 0.2, %v63_v20  ;;  %vm80_vm4 = vcmp.gt.f32.partialorder %v64_v23, 0.0  ;;  %v96_v34 = vmul.f32 0.2, %v64_v23 }
   0xa   :  { %124 = vst [vmem:[%s308_s3] sm:$0xff] %v108_v28  ;;  %v109_v32 = vsel %vm77_vm1, %v61_v18, %v93_v26  ;;  %v110_v33 = vsel %vm78_vm2, %v62_v19, %v94_v27  ;;  %vm81_vm5 = vcmp.gt.f32.partialorder %v65_v24, 0.0  ;;  %v97_v36 = vmul.f32 0.2, %v65_v24 }
   0xb   :  { %125 = vst [vmem:[%s308_s3 + $0x8] sm:$0xff] %v109_v32  ;;  %126 = vst [vmem:[%s308_s3 + $0x10] sm:$0xff] %v110_v33  ;;  %v111_v35 = vsel %vm79_vm3, %v63_v20, %v95_v29  ;;  %v112_v39 = vsel %vm80_vm4, %v64_v23, %v96_v34  ;;  %v45_v40 = vmul.f32 %v172_v1, %v22_v25  ;;  %vm82_vm6 = vcmp.gt.f32.partialorder %v66_v37, 0.0 }
   0xc   :  { %127 = vst [vmem:[%s308_s3 + $0x18] sm:$0xff] %v111_v35  ;;  %v46_v41 = vmul.f32 %v172_v1, %v23_v30  ;;  %v47_v42 = vmul.f32 %v172_v1, %v24_v31  ;;  %128 = vst [vmem:[%s308_s3 + $0x20] sm:$0xff] %v112_v39  ;;  %v113_v46 = vsel %vm81_vm5, %v65_v24, %v97_v36  ;;  %v98_v47 = vmul.f32 0.2, %v66_v37 }
   0xd   :  { %vm83_vm7 = vcmp.gt.f32.partialorder %v67_v38, 0.0  ;;  %129 = vst [vmem:[%s308_s3 + $0x28] sm:$0xff] %v113_v46  ;;  %v99_v48 = vmul.f32 0.2, %v67_v38  ;;  %v68_v49 = vadd.f32 %v177_v2, %v45_v40  ;;  %v48_v53 = vmul.f32 %v172_v1, %v25_v43 }
   0xe   :  { %v69_v50 = vadd.f32 %v177_v2, %v46_v41  ;;  %v70_v51 = vadd.f32 %v177_v2, %v47_v42  ;;  %v114_v52 = vsel %vm82_vm6, %v66_v37, %v98_v47  ;;  %v49_v54 = vmul.f32 %v172_v1, %v26_v44 }
   0xf   :  { %v50_v55 = vmul.f32 %v172_v1, %v27_v45  ;;  %130 = vst [vmem:[%s308_s3 + $0x30] sm:$0xff] %v114_v52  ;;  %v115_v57 = vsel %vm83_vm7, %v67_v38, %v99_v48  ;;  %vm84_vm8 = vcmp.gt.f32.partialorder %v68_v49, 0.0  ;;  %v100_v58 = vmul.f32 0.2, %v68_v49 }
  0x10   :  { %vm85_vm9 = vcmp.gt.f32.partialorder %v69_v50, 0.0  ;;  %131 = vst [vmem:[%s308_s3 + $0x38] sm:$0xff] %v115_v57  ;;  %v101_v59 = vmul.f32 0.2, %v69_v50  ;;  %vm86_vm10 = vcmp.gt.f32.partialorder %v70_v51, 0.0  ;;  %v71_v61 = vadd.f32 %v177_v2, %v48_v53 }
  0x11   :  { %v102_v60 = vmul.f32 0.2, %v70_v51  ;;  %v116_v62 = vsel %vm84_vm8, %v68_v49, %v100_v58  ;;  %v72_v63 = vadd.f32 %v177_v2, %v49_v54  ;;  %v73_v0 = vadd.f32 %v177_v2, %v50_v55 }
  0x12   :  { %v51_v3 = vmul.f32 %v172_v1, %v28_v56  ;;  %132 = vst [vmem:[%s308_s3 + $0x40] sm:$0xff] %v116_v62  ;;  %v117_v5 = vsel %vm85_vm9, %v69_v50, %v101_v59  ;;  %vm87_vm11 = vcmp.gt.f32.partialorder %v71_v61, 0.0  ;;  %v103_v7 = vmul.f32 0.2, %v71_v61 }
  0x13   :  { %v118_v6 = vsel %vm86_vm10, %v70_v51, %v102_v60  ;;  %133 = vst [vmem:[%s308_s3 + $0x48] sm:$0xff] %v117_v5  ;;  %vm88_vm12 = vcmp.gt.f32.partialorder %v72_v63, 0.0  ;;  %v104_v8 = vmul.f32 0.2, %v72_v63  ;;  %vm89_vm13 = vcmp.gt.f32.partialorder %v73_v0, 0.0 }
  0x14   :  { %134 = vst [vmem:[%s308_s3 + $0x50] sm:$0xff] %v118_v6  ;;  %v105_v9 = vmul.f32 0.2, %v73_v0  ;;  %v119_v10 = vsel %vm87_vm11, %v71_v61, %v103_v7  ;;  %v74_v11 = vadd.f32 %v177_v2, %v51_v3  ;;  %v52_v12 = vmul.f32 %v172_v1, %v29_v4 }
  0x15   :  { %135 = vst [vmem:[%s308_s3 + $0x58] sm:$0xff] %v119_v10  ;;  %v120_v13 = vsel %vm88_vm12, %v72_v63, %v104_v8 }
  0x16   :  { %v121_v14 = vsel %vm89_vm13, %v73_v0, %v105_v9  ;;  %136 = vst [vmem:[%s308_s3 + $0x60] sm:$0xff] %v120_v13  ;;  %vm90_vm14 = vcmp.gt.f32.partialorder %v74_v11, 0.0  ;;  %v106_v15 = vmul.f32 0.2, %v74_v11  ;;  %v75_v16 = vadd.f32 %v177_v2, %v52_v12 }
  0x17   :  { %137 = vst [vmem:[%s308_s3 + $0x68] sm:$0xff] %v121_v14 }
  0x18   :  { %v122_v17 = vsel %vm90_vm14, %v74_v11, %v106_v15  ;;  %vm91_vm15 = vcmp.gt.f32.partialorder %v75_v16, 0.0  ;;  %v107_v1 = vmul.f32 0.2, %v75_v16 }
  0x19   :  { %138 = vst [vmem:[%s308_s3 + $0x70] sm:$0xff] %v122_v17 }
  0x1a   :  { %v123_v18 = vsel %vm91_vm15, %v75_v16, %v107_v1 }
  0x1b   :  { %139 = vst [vmem:[%s308_s3 + $0x78] sm:$0xff] %v123_v18 }

// kernel: _lambda_.15
= control target key start
LH: loop header
LB: loop body
LE: loop exit
PB: predicated region body
PF: predicated region fallthrough
CT: control target
= control target key end

     0   :  { %vm310_vm0 = vcmask 261120   ;;  %vm603_vm1 = vcmask 1040384   ;;  %vm605_vm2 = vcmask 1041408   ;;  %s1043_s1 = inlined_call_operand.vmem [shape: bf16[288,128], index: 1, kind: input, shape index: {}]   ;;  %s1044_s0 = inlined_call_operand.vmem [shape: bf16[128,288], index: 0, kind: input, shape index: {}]   ;;  %s1045_s2 = inlined_call_operand.vmem [shape: f32[128,128], index: 2, kind: output, shape index: {0}]   ;;  %s1046_s3 = inlined_call_operand.vmem [shape: f32[8,128], index: 3, kind: output, shape index: {1}]  }
   0x1   :  { %v776_v0 = vld [vmem:[%s1043_s1 + $0x40] sm:$0xff]   ;;  %v778_v2 = vld [vmem:[%s1043_s1 + $0x48] sm:$0xff]   ;;  %v780_v4 = vld [vmem:[%s1043_s1 + $0x50] sm:$0xff]  }
   0x2   :  { %v777_v1 = vld [vmem:[%s1043_s1] sm:$0xff]   ;;  %666 = vmatprep.subr.bf16.mxu0 %v776_v0  ;;  %760 = vmatprep.subr.bf16.mxu1 %v776_v0  ;;  %v779_v3 = vld [vmem:[%s1043_s1 + $0x8] sm:$0xff]   ;;  %v781_v5 = vld [vmem:[%s1043_s1 + $0x10] sm:$0xff]  }
   0x3   :  { %667 = vmatpush3.bf16.msra.mxu0 %v777_v1  ;;  %768 = vmatpush3.bf16.msra.mxu1 %v777_v1  ;;  %v782_v6 = vld [vmem:[%s1043_s1 + $0x58] sm:$0xff]   ;;  %v784_v8 = vld [vmem:[%s1043_s1 + $0x60] sm:$0xff]   ;;  %v786_v10 = vld [vmem:[%s1043_s1 + $0x68] sm:$0xff]  }
   0x4   :  { %668 = vmatprep.subr.bf16.mxu0 %v778_v2  ;;  %761 = vmatprep.subr.bf16.mxu1 %v778_v2  ;;  %v783_v7 = vld [vmem:[%s1043_s1 + $0x18] sm:$0xff]   ;;  %v785_v9 = vld [vmem:[%s1043_s1 + $0x20] sm:$0xff]   ;;  %v787_v13 = vld [vmem:[%s1043_s1 + $0x28] sm:$0xff]  }
   0x5   :  { %v794_v11 = vld [vmem:[%s1044_s0 + $0x4] ss:$12 sps:$4 sm:$0xff]   ;;  %v797_v12 = vld [vmem:[%s1044_s0 + $0x94] ss:$12 sps:$4 sm:$0xff]   ;;  %v790_v16 = vld [vmem:[%s1043_s1 + $0x78] sm:$0xff]  }
   0x6   :  { %v788_v14 = vld [vmem:[%s1043_s1 + $0x70] sm:$0xff]   ;;  %367 = vmatprep.mubr.bf16.mxu0 %v794_v11  ;;  %415 = vmatprep.mubr.bf16.mxu1 %v797_v12  ;;  %v791_v17 = vld [vmem:[%s1043_s1 + $0x38] sm:$0xff]   ;;  %v792_v18 = vld [vmem:[%s1044_s0] ss:$12 sps:$4 sm:$0xff]  }
   0x7   :  { %669 = vmatpush3.bf16.msra.mxu0 %v779_v3  ;;  %769 = vmatpush3.bf16.msra.mxu1 %v779_v3  ;;  %v789_v15 = vld [vmem:[%s1043_s1 + $0x30] sm:$0xff]   ;;  %v798_v19 = vld [vmem:[%s1043_s1 + $0x80] sm:$0xff]   ;;  %v799_v21 = vld [vmem:[%s1044_s0 + $0x1c] ss:$12 sps:$4 sm:$0xff]  }
   0x8   :  { %670 = vmatprep.subr.bf16.mxu0 %v780_v4  ;;  %762 = vmatprep.subr.bf16.mxu1 %v780_v4  ;;  %v795_v20 = vld [vmem:[%s1044_s0 + $0x90] ss:$12 sps:$4 sm:$0xff]   ;;  %v801_v22 = vld [vmem:[%s1044_s0 + $0xac] ss:$12 sps:$4 sm:$0xff]   ;;  %v804_v25 = vld [vmem:[%s1044_s0 + $0xa8] ss:$12 sps:$4 sm:$0xff]  }
   0x9   :  { %v805_v23 = vld [vmem:[%s1043_s1 + $0x88] sm:$0xff]   ;;  %v803_v24 = vld [vmem:[%s1044_s0 + $0x18] ss:$12 sps:$4 sm:$0xff]   ;;  %v806_v26 = vld [vmem:[%s1044_s0 + $0x34] ss:$12 sps:$4 sm:$0xff]  }
   0xa   :  { %v808_v27 = vld [vmem:[%s1044_s0 + $0x8] ss:$12 sps:$4 sm:$0xff]   ;;  %v809_v28 = vld [vmem:[%s1044_s0 + $0x30] ss:$12 sps:$4 sm:$0xff]   ;;  %v810_v29 = vld [vmem:[%s1044_s0 + $0x20] ss:$12 sps:$4 sm:$0xff]  }
   0xb   :  { %671 = vmatpush3.bf16.msra.mxu0 %v781_v5  ;;  %770 = vmatpush3.bf16.msra.mxu1 %v781_v5  ;;  %v811_v30 = vld [vmem:[%s1044_s0 + $0x4c] ss:$12 sps:$4 sm:$0xff]   ;;  %v814_v32 = vld [vmem:[%s1044_s0 + $0x48] ss:$12 sps:$4 sm:$0xff]   ;;  %v815_v33 = vld [vmem:[%s1044_s0 + $0x50] ss:$12 sps:$4 sm:$0xff]  }
   0xc   :  { %672 = vmatprep.subr.bf16.mxu0 %v782_v6  ;;  %763 = vmatprep.subr.bf16.mxu1 %v782_v6  ;;  %v813_v31 = vld [vmem:[%s1044_s0 + $0x38] ss:$12 sps:$4 sm:$0xff]   ;;  %v818_v35 = vld [vmem:[%s1044_s0 + $0x68] ss:$12 sps:$4 sm:$0xff]   ;;  %v819_v36 = vld [vmem:[%s1044_s0 + $0x60] ss:$12 sps:$4 sm:$0xff]  }
   0xd   :  { %v816_v34 = vld [vmem:[%s1044_s0 + $0x64] ss:$12 sps:$4 sm:$0xff]   ;;  %v820_v37 = vld [vmem:[%s1044_s0 + $0x80] ss:$12 sps:$4 sm:$0xff]   ;;  %v821_v38 = vld [vmem:[%s1044_s0 + $0x7c] ss:$12 sps:$4 sm:$0xff]  }
   0xe   :  { %v823_v39 = vld [vmem:[%s1044_s0 + $0x98] ss:$12 sps:$4 sm:$0xff]   ;;  %v825_v41 = vld [vmem:[%s1044_s0 + $0xb0] ss:$12 sps:$4 sm:$0xff]  }
   0xf   :  { %673 = vmatpush3.bf16.msra.mxu0 %v783_v7  ;;  %771 = vmatpush3.bf16.msra.mxu1 %v783_v7  ;;  %v824_v40 = vld [vmem:[%s1044_s0 + $0x78] ss:$12 sps:$4 sm:$0xff]  }
  0x10   :  { %674 = vmatprep.subr.bf16.mxu0 %v784_v8  ;;  %764 = vmatprep.subr.bf16.mxu1 %v784_v8 }
  0x13   :  { %675 = vmatpush3.bf16.msra.mxu0 %v785_v9  ;;  %772 = vmatpush3.bf16.msra.mxu1 %v785_v9 }
  0x14   :  { %676 = vmatprep.subr.bf16.mxu0 %v786_v10  ;;  %765 = vmatprep.subr.bf16.mxu1 %v786_v10 }
  0x17   :  { %677 = vmatpush3.bf16.msra.mxu0 %v787_v13  ;;  %773 = vmatpush3.bf16.msra.mxu1 %v787_v13 }
  0x18   :  { %678 = vmatprep.subr.bf16.mxu0 %v788_v14  ;;  %766 = vmatprep.subr.bf16.mxu1 %v788_v14 }
  0x1b   :  { %679 = vmatpush3.bf16.msra.mxu0 %v789_v15  ;;  %774 = vmatpush3.bf16.msra.mxu1 %v789_v15 }
  0x1c   :  { %680 = vmatprep.subr.bf16.mxu0 %v790_v16  ;;  %767 = vmatprep.subr.bf16.mxu1 %v790_v16 }
  0x1f   :  { %681 = vmatpush3.bf16.msra.mxu0 %v791_v17  ;;  %775 = vmatpush3.bf16.msra.mxu1 %v791_v17 }
  0x20   :  { %740 = vmatprep.subr.bf16.mxu1 %v798_v19 }
  0x22   :  { %368 = vmatmul.mubr.bf16.vlgmr.msra.gmra.mrb[0].mxu0 %v792_v18  ;;  %416 = vmatmul.mubr.bf16.vlgmr.msra.gmra.mrb[0].mxu1 %v795_v20 }
  0x23   :  { %741 = vmatpush3.bf16.msra.mxu1 %v798_v19  ;;  %375 = vmatprep.mubr.bf16.mxu0 %v799_v21 }
  0x24   :  { %423 = vmatprep.mubr.bf16.mxu1 %v801_v22  ;;  %742 = vmatprep.subr.bf16.mxu1 %v805_v23 }
  0x27   :  { %743 = vmatpush3.bf16.msra.mxu1 %v805_v23 }
  0x2a   :  { %376 = vmatmul.mubr.bf16.gmra.mrb[4].mxu0 %v803_v24  ;;  %424 = vmatmul.mubr.bf16.gmra.mrb[4].mxu1 %v804_v25 }
  0x2b   :  { %383 = vmatprep.mubr.bf16.mxu0 %v806_v26  ;;  %744 = vmatprep.mubr.msk.bf16.mxu1 %vm310_vm0, %v808_v27 }
  0x32   :  { %384 = vmatmul.mubr.bf16.gmra.mrb[8].mxu0 %v809_v28  ;;  %745 = vmatmul.mubr.msk.bf16.vlgmr.msra.gmra.mrb[8].mxu1 %vm310_vm0, %v810_v29 }
  0x33   :  { %391 = vmatprep.mubr.bf16.mxu0 %v811_v30  ;;  %748 = vmatprep.mubr.msk.bf16.mxu1 %vm310_vm0, %v813_v31 }
  0x3a   :  { %392 = vmatmul.mubr.bf16.gmra.mrb[12].mxu0 %v814_v32  ;;  %749 = vmatmul.mubr.msk.bf16.gmra.mrb[12].mxu1 %vm310_vm0, %v815_v33 }
  0x3b   :  { %399 = vmatprep.mubr.bf16.mxu0 %v816_v34  ;;  %752 = vmatprep.mubr.msk.bf16.mxu1 %vm310_vm0, %v818_v35 }
  0x42   :  { %400 = vmatmul.mubr.bf16.gmra.mrb[16].mxu0 %v819_v36  ;;  %753 = vmatmul.mubr.msk.bf16.gmra.mrb[16].mxu1 %vm310_vm0, %v820_v37 }
  0x43   :  { %407 = vmatprep.mubr.bf16.mxu0 %v821_v38  ;;  %756 = vmatprep.mubr.msk.bf16.mxu1 %vm310_vm0, %v823_v39 }
  0x4a   :  { %408 = vmatmul.mubr.bf16.gmra.mrb[20].mxu0 %v824_v40  ;;  %757 = vmatmul.mubr.msk.bf16.gmra.mrb[20].mxu1 %vm310_vm0, %v825_v41 }
  0xf5   :  { %v682_v42 = vpop.f32.mrb[0].mxu0  ;;  %v718_v43 = vpop.f32.mrb[0].mxu1 }
  0xf6   :  { %v683_v44 = vpop.f32.mrb[1].mxu0  ;;  %v719_v45 = vpop.f32.mrb[1].mxu1 }
  0xf7   :  { %v684_v46 = vadd.f32 %v683_v44, %v682_v42  ;;  %v685_v47 = vpop.f32.mrb[2].mxu0  ;;  %v980_v48 = vadd.f32 %v719_v45, %v718_v43  ;;  %v721_v49 = vpop.f32.mrb[2].mxu1 }
  0xf8   :  { %v686_v50 = vpop.f32.mrb[3].mxu0  ;;  %v722_v51 = vpop.f32.mrb[3].mxu1 }
  0xf9   :  { %v687_v52 = vadd.f32 %v686_v50, %v685_v47  ;;  %v982_v53 = vadd.f32 %v722_v51, %v721_v49 }
  0xfd   :  { %v688_v54 = vpop.f32.mrb[4].mxu0  ;;  %v724_v55 = vpop.f32.mrb[4].mxu1 }
  0xfe   :  { %v689_v56 = vpop.f32.mrb[5].mxu0  ;;  %v725_v57 = vpop.f32.mrb[5].mxu1 }
  0xff   :  { %v690_v58 = vadd.f32 %v689_v56, %v688_v54  ;;  %v691_v59 = vpop.f32.mrb[6].mxu0  ;;  %v984_v60 = vadd.f32 %v725_v57, %v724_v55  ;;  %v727_v61 = vpop.f32.mrb[6].mxu1 }
 0x100   :  { %v692_v62 = vpop.f32.mrb[7].mxu0  ;;  %v728_v63 = vpop.f32.mrb[7].mxu1 }
 0x101   :  { %v693_v0 = vadd.f32 %v692_v62, %v691_v59  ;;  %v986_v1 = vadd.f32 %v728_v63, %v727_v61 }
 0x105   :  { %v694_v2 = vpop.f32.mrb[8].mxu0  ;;  %v746_v3 = vpop.f32.mrb[8].mxu1 }
 0x106   :  { %v475_v4 = vadd.f32 %v746_v3, %v690_v58  ;;  %v695_v5 = vpop.f32.mrb[9].mxu0  ;;  %v466_v6 = vpop.f32.mrb[9].mxu1 }
 0x107   :  { %v696_v7 = vadd.f32 %v695_v5, %v694_v2  ;;  %v467_v8 = vadd.f32 %v684_v46, %v466_v6  ;;  %v697_v9 = vpop.f32.mrb[10].mxu0  ;;  %v747_v10 = vpop.f32.mrb[10].mxu1 }
 0x108   :  { %531 = vst [vmem:[%s1045_s2 + $0x10] sm:$0xff] %v475_v4  ;;  %v478_v11 = vadd.f32 %v747_v10, %v693_v0  ;;  %v698_v12 = vpop.f32.mrb[11].mxu0  ;;  %v469_v13 = vpop.f32.mrb[11].mxu1  ;;  %v568_v19 = vmul.f32 %v475_v4, %v475_v4 }
 0x109   :  { %529 = vst [vmem:[%s1045_s2] sm:$0xff] %v467_v8  ;;  %v699_v14 = vadd.f32 %v698_v12, %v697_v9  ;;  %v470_v15 = vadd.f32 %v687_v52, %v469_v13  ;;  %v566_v16 = vmul.f32 %v467_v8, %v467_v8 }
 0x10a   :  { %532 = vst [vmem:[%s1045_s2 + $0x18] sm:$0xff] %v478_v11  ;;  %v569_v24 = vmul.f32 %v478_v11, %v478_v11 }
 0x10b   :  { %530 = vst [vmem:[%s1045_s2 + $0x8] sm:$0xff] %v470_v15  ;;  %v545_v17 = vadd.f32 %v470_v15, %v467_v8  ;;  %v567_v18 = vmul.f32 %v470_v15, %v470_v15 }
 0x10d   :  { %v546_v20 = vadd.f32 %v545_v17, %v475_v4  ;;  %v582_v21 = vadd.f32 %v567_v18, %v566_v16  ;;  %v700_v22 = vpop.f32.mrb[12].mxu0  ;;  %v750_v23 = vpop.f32.mrb[12].mxu1 }
 0x10e   :  { %v701_v25 = vpop.f32.mrb[13].mxu0  ;;  %v482_v26 = vpop.f32.mrb[13].mxu1 }
 0x10f   :  { %v583_v27 = vadd.f32 %v582_v21, %v568_v19  ;;  %v702_v28 = vadd.f32 %v701_v25, %v700_v22  ;;  %v483_v29 = vadd.f32 %v696_v7, %v482_v26  ;;  %v547_v30 = vadd.f32 %v546_v20, %v478_v11  ;;  %v703_v31 = vpop.f32.mrb[14].mxu0  ;;  %v751_v32 = vpop.f32.mrb[14].mxu1 }
 0x110   :  { %v704_v33 = vpop.f32.mrb[15].mxu0  ;;  %v485_v34 = vpop.f32.mrb[15].mxu1 }
 0x111   :  { %v491_v35 = vadd.f32 %v750_v23, %v702_v28  ;;  %533 = vst [vmem:[%s1045_s2 + $0x20] sm:$0xff] %v483_v29  ;;  %v548_v36 = vadd.f32 %v547_v30, %v483_v29  ;;  %v570_v37 = vmul.f32 %v483_v29, %v483_v29  ;;  %v584_v38 = vadd.f32 %v583_v27, %v569_v24 }
 0x112   :  { %v705_v39 = vadd.f32 %v704_v33, %v703_v31  ;;  %v486_v40 = vadd.f32 %v699_v14, %v485_v34 }
 0x113   :  { %535 = vst [vmem:[%s1045_s2 + $0x30] sm:$0xff] %v491_v35  ;;  %v585_v41 = vadd.f32 %v584_v38, %v570_v37  ;;  %v572_v47 = vmul.f32 %v491_v35, %v491_v35 }
 0x114   :  { %v494_v42 = vadd.f32 %v751_v32, %v705_v39  ;;  %534 = vst [vmem:[%s1045_s2 + $0x28] sm:$0xff] %v486_v40  ;;  %v549_v43 = vadd.f32 %v548_v36, %v486_v40  ;;  %v571_v44 = vmul.f32 %v486_v40, %v486_v40 }
 0x115   :  { %v706_v45 = vpop.f32.mrb[16].mxu0  ;;  %v754_v46 = vpop.f32.mrb[16].mxu1 }
 0x116   :  { %536 = vst [vmem:[%s1045_s2 + $0x38] sm:$0xff] %v494_v42  ;;  %v550_v49 = vadd.f32 %v549_v43, %v491_v35  ;;  %v586_v50 = vadd.f32 %v585_v41, %v571_v44  ;;  %v707_v51 = vpop.f32.mrb[17].mxu0  ;;  %v498_v52 = vpop.f32.mrb[17].mxu1  ;;  %v573_v57 = vmul.f32 %v494_v42, %v494_v42 }
 0x117   :  { %v708_v54 = vadd.f32 %v707_v51, %v706_v45  ;;  %v709_v55 = vpop.f32.mrb[18].mxu0  ;;  %v755_v56 = vpop.f32.mrb[18].mxu1 }
 0x118   :  { %v587_v58 = vadd.f32 %v586_v50, %v572_v47  ;;  %v710_v59 = vpop.f32.mrb[19].mxu0  ;;  %v551_v61 = vadd.f32 %v550_v49, %v494_v42  ;;  %v501_v62 = vpop.f32.mrb[19].mxu1 }
 0x119   :  { %v711_v63 = vadd.f32 %v710_v59, %v709_v55  ;;  %v499_v0 = vadd.f32 %v708_v54, %v498_v52 }
 0x11a   :  { %v588_v2 = vadd.f32 %v587_v58, %v573_v57 }
 0x11b   :  { %537 = vst [vmem:[%s1045_s2 + $0x40] sm:$0xff] %v499_v0  ;;  %v552_v3 = vadd.f32 %v551_v61, %v499_v0  ;;  %v574_v4 = vmul.f32 %v499_v0, %v499_v0  ;;  %v502_v5 = vadd.f32 %v711_v63, %v501_v62 }
 0x11d   :  { %v589_v6 = vadd.f32 %v588_v2, %v574_v4  ;;  %538 = vst [vmem:[%s1045_s2 + $0x48] sm:$0xff] %v502_v5  ;;  %v553_v7 = vadd.f32 %v552_v3, %v502_v5  ;;  %v575_v8 = vmul.f32 %v502_v5, %v502_v5  ;;  %v712_v9 = vpop.f32.mrb[20].mxu0  ;;  %v758_v10 = vpop.f32.mrb[20].mxu1 }
 0x11e   :  { %v523_v11 = vadd.f32 %v758_v10, %v984_v60  ;;  %v713_v12 = vpop.f32.mrb[21].mxu0  ;;  %v514_v13 = vpop.f32.mrb[21].mxu1 }
 0x11f   :  { %v590_v14 = vadd.f32 %v589_v6, %v575_v8  ;;  %v714_v15 = vadd.f32 %v713_v12, %v712_v9  ;;  %v515_v16 = vadd.f32 %v980_v48, %v514_v13  ;;  %v715_v17 = vpop.f32.mrb[22].mxu0  ;;  %v759_v18 = vpop.f32.mrb[22].mxu1 }
 0x120   :  { %543 = vst [vmem:[%s1045_s2 + $0x70] sm:$0xff] %v523_v11  ;;  %v526_v19 = vadd.f32 %v759_v18, %v986_v1  ;;  %v716_v20 = vpop.f32.mrb[23].mxu0  ;;  %v517_v21 = vpop.f32.mrb[23].mxu1  ;;  %v580_v33 = vmul.f32 %v523_v11, %v523_v11 }
 0x121   :  { %v507_v22 = vadd.f32 %v754_v46, %v714_v15  ;;  %541 = vst [vmem:[%s1045_s2 + $0x60] sm:$0xff] %v515_v16  ;;  %v717_v60 = vadd.f32 %v716_v20, %v715_v17  ;;  %v518_v23 = vadd.f32 %v982_v53, %v517_v21  ;;  %v578_v27 = vmul.f32 %v515_v16, %v515_v16 }
 0x122   :  { %544 = vst [vmem:[%s1045_s2 + $0x78] sm:$0xff] %v526_v19  ;;  %v581_v36 = vmul.f32 %v526_v19, %v526_v19 }
 0x123   :  { %539 = vst [vmem:[%s1045_s2 + $0x50] sm:$0xff] %v507_v22  ;;  %v554_v48 = vadd.f32 %v553_v7, %v507_v22  ;;  %v576_v1 = vmul.f32 %v507_v22, %v507_v22  ;;  %v510_v24 = vadd.f32 %v755_v56, %v717_v60  ;;  %542 = vst [vmem:[%s1045_s2 + $0x68] sm:$0xff] %v518_v23 }
 0x124   :  { %v579_v31 = vmul.f32 %v518_v23, %v518_v23 }
 0x125   :  { %v591_v25 = vadd.f32 %v590_v14, %v576_v1  ;;  %540 = vst [vmem:[%s1045_s2 + $0x58] sm:$0xff] %v510_v24  ;;  %v555_v53 = vadd.f32 %v554_v48, %v510_v24  ;;  %v577_v26 = vmul.f32 %v510_v24, %v510_v24 }
 0x127   :  { %v592_v28 = vadd.f32 %v591_v25, %v577_v26  ;;  %v556_v29 = vadd.f32 %v555_v53, %v515_v16 }
 0x129   :  { %v557_v30 = vadd.f32 %v556_v29, %v518_v23  ;;  %v593_v32 = vadd.f32 %v592_v28, %v578_v27 }
 0x12b   :  { %v558_v34 = vadd.f32 %v557_v30, %v523_v11  ;;  %v594_v35 = vadd.f32 %v593_v32, %v579_v31 }
 0x12d   :  { %v559_v37 = vadd.f32 %v558_v34, %v526_v19  ;;  %v595_v38 = vadd.f32 %v594_v35, %v580_v33 }
 0x12f   :  { %v560_v39 = vrot.slane %v559_v37, 4  ;;  %v596_v40 = vadd.f32 %v595_v38, %v581_v36 }
 0x131   :  { %v561_v41 = vadd.f32 %v560_v39, %v559_v37  ;;  %v597_v42 = vrot.slane %v596_v40, 4 }
 0x133   :  { %v562_v43 = vrot.slane %v561_v41, 2  ;;  %v598_v44 = vadd.f32 %v597_v42, %v596_v40 }
 0x135   :  { %v563_v45 = vadd.f32 %v562_v43, %v561_v41  ;;  %v599_v46 = vrot.slane %v598_v44, 2 }
 0x137   :  { %v564_v47 = vrot.slane %v563_v45, 1  ;;  %v600_v49 = vadd.f32 %v599_v46, %v598_v44 }
 0x139   :  { %v601_v50 = vrot.slane %v600_v49, 1  ;;  %v565_v51 = vadd.f32 %v564_v47, %v563_v45 }
 0x13b   :  { %v602_v52 = vadd.f32 %v601_v50, %v600_v49 }
 0x13d   :  { %v604_v54 = vsel %vm603_vm1, %v565_v51, %v602_v52 }
 0x13e   :  { %v606_v55 = vsel %vm605_vm2, %v604_v54, 0.0 }
 0x13f   :  { %607 = vst [vmem:[%s1046_s3] sm:$0xff] %v606_v55 }

// kernel: _lambda_.17
= control target key start
LH: loop header
LB: loop body
LE: loop exit
PB: predicated region body
PF: predicated region fallthrough
CT: control target
= control target key end

     0   :  { %s1061_s12 = smov 0   ;;  %s1288_s0 = inlined_call_operand.vmem [shape: bf16[512,144], index: 0, kind: input, shape index: {}]   ;;  %s1289_s1 = inlined_call_operand.vmem [shape: bf16[144,128], index: 1, kind: input, shape index: {}]   ;;  %s1290_s2 = inlined_call_operand.vmem [shape: f32[512,128], index: 2, kind: output, shape index: {0}]   ;;  %s1291_s3 = inlined_call_operand.vmem [shape: f32[16,128], index: 3, kind: output, shape index: {1}]  }
   0x1 LB: > { %s1067_s13 = sadd.s32 4294967295, %s1038_s12   ;;  %p881_p0 = scmp.ge.s32.totalorder %s1038_s12, 1  ;;  %s1038_s12 = sphi %s1061_s12, %s14_s12  }
   0x2   : > { %p142_p1 = scmp.lt.s32.totalorder %s1038_s12, 3 }
   0x4   : > { %p143_p2 = pnand %p881_p0, %p142_p1 }
   0x5   : > { %v975_v0 = vld [vmem:[%s1289_s1] sm:$0xff] (!%p143_p2)   ;;  %v1040_v1 = vmov (!%p143_p2), 0   ;;  %s882_s16 = sshll.u32 (!%p143_p2), %s1067_s13, 5  ;;  %v976_v2 = vld [vmem:[%s1289_s1 + $0x8] sm:$0xff] (!%p143_p2)   ;;  %v977_v3 = vld [vmem:[%s1289_s1 + $0x10] sm:$0xff] (!%p143_p2)   ;;  %vm437_vm0 = vcmask (!%p143_p2), 130048  }
   0x6   : > { %146 = sbr.rel (%p143_p2) target bundleno = 363 (0x16b), region = 28  ;;  %486 = vmatprep.subr.bf16.mxu0 (!%p143_p2), %v1040_v1  ;;  %948 = vmatprep.subr.bf16.mxu1 (!%p143_p2), %v1040_v1  ;;  %p172_p3 = scmp.lt.s32.totalorder (!%p143_p2), %s882_s16, 63  ;;  %v978_v4 = vld [vmem:[%s1289_s1 + $0x18] sm:$0xff] (!%p143_p2)   ;;  %v979_v6 = vld [vmem:[%s1289_s1 + $0x20] sm:$0xff] (!%p143_p2)   ;;  %v980_v8 = vld [vmem:[%s1289_s1 + $0x28] sm:$0xff] (!%p143_p2)   ;;  %vm785_vm1 = vcmask (!%p143_p2), 1040384  }
   0x7   : > { %487 = vmatpush1.bf16.msra.mxu0 (!%p143_p2), %v975_v0  ;;  %957 = vmatpush1.bf16.msra.mxu1 (!%p143_p2), %v975_v0  ;;  %v981_v9 = vld [vmem:[%s1289_s1 + $0x30] sm:$0xff] (!%p143_p2)   ;;  %v982_v10 = vld [vmem:[%s1289_s1 + $0x38] sm:$0xff] (!%p143_p2)   ;;  %v983_v11 = vld [vmem:[%s1289_s1 + $0x40] sm:$0xff] (!%p143_p2)   ;;  %p184_p4 = scmp.lt.s32.totalorder (!%p143_p2), %s1067_s13, 1  ;;  %vm787_vm2 = vcmask (!%p143_p2), 1041408  }
   0x8   : > { %488 = vmatprep.subr.bf16.mxu0 (!%p143_p2), %v1040_v1  ;;  %949 = vmatprep.subr.bf16.mxu1 (!%p143_p2), %v1040_v1 }
   0xb   : > { %489 = vmatpush1.bf16.msra.mxu0 (!%p143_p2), %v976_v2  ;;  %958 = vmatpush1.bf16.msra.mxu1 (!%p143_p2), %v976_v2 }
   0xc   : > { %490 = vmatprep.subr.bf16.mxu0 (!%p143_p2), %v1040_v1  ;;  %950 = vmatprep.subr.bf16.mxu1 (!%p143_p2), %v1040_v1 }
   0xd   : > { %s1293_s16 = smov (!%p172_p3, %s882_s16), 63  ;;  %s1295_s13 = smov (!%p184_p4, %s1067_s13), 1 }
   0xe   : > { %s947_s21 = sshll.u32 %s1293_s16, 3  ;;  %s887_s15 = sshll.u32 %s1295_s13, 3 }
   0xf   : > { %s1089_s24 = scalar_lea.vmem %s1288_s0, %s947_s21  ;;  %491 = vmatpush1.bf16.msra.mxu0 %v977_v3  ;;  %959 = vmatpush1.bf16.msra.mxu1 %v977_v3  ;;  %s1162_s14 = scalar_lea.vmem %s1290_s2, %s947_s21 }
  0x10   : > { %v986_v5 = vld [vmem:[%s1089_s24 + $0x4] ss:$8 sps:$4 sm:$0xff]   ;;  %492 = vmatprep.subr.bf16.mxu0 %v1040_v1  ;;  %951 = vmatprep.subr.bf16.mxu1 %v1040_v1  ;;  %v984_v12 = vld [vmem:[%s1089_s24] ss:$8 sps:$4 sm:$0xff]   ;;  %v987_v14 = vld [vmem:[%s1089_s24 + $0x14] ss:$8 sps:$4 sm:$0xff]   ;;  %s187_s18 = scalar_lea.vmem %s1291_s3, %s887_s15 }
  0x11   : > { %929 = vmatprep.mubr.msk.bf16.mxu0 %vm437_vm0, %v986_v5  ;;  %v998_v7 = vld [vmem:[%s1089_s24 + $0x84] ss:$8 sps:$4 sm:$0xff]   ;;  %v996_v13 = vld [vmem:[%s1089_s24 + $0x80] ss:$8 sps:$4 sm:$0xff]   ;;  %v1002_v15 = vld [vmem:[%s1089_s24 + $0x94] ss:$8 sps:$4 sm:$0xff]  }
  0x12   : > { %937 = vmatprep.mubr.msk.bf16.mxu1 %vm437_vm0, %v998_v7  ;;  %v989_v16 = vld [vmem:[%s1089_s24 + $0x10] ss:$8 sps:$4 sm:$0xff]   ;;  %v990_v18 = vld [vmem:[%s1089_s24 + $0x24] ss:$8 sps:$4 sm:$0xff]   ;;  %v992_v20 = vld [vmem:[%s1089_s24 + $0x20] ss:$8 sps:$4 sm:$0xff]  }
  0x13   : > { %493 = vmatpush1.bf16.msra.mxu0 %v978_v4  ;;  %960 = vmatpush1.bf16.msra.mxu1 %v978_v4  ;;  %v1004_v17 = vld [vmem:[%s1089_s24 + $0x90] ss:$8 sps:$4 sm:$0xff]   ;;  %v1008_v19 = vld [vmem:[%s1089_s24 + $0xa4] ss:$8 sps:$4 sm:$0xff]   ;;  %v1010_v21 = vld [vmem:[%s1089_s24 + $0xa0] ss:$8 sps:$4 sm:$0xff]  }
  0x14   : > { %494 = vmatprep.subr.bf16.mxu0 %v1040_v1  ;;  %952 = vmatprep.subr.bf16.mxu1 %v1040_v1  ;;  %v993_v22 = vld [vmem:[%s1089_s24 + $0x34] ss:$8 sps:$4 sm:$0xff]   ;;  %v995_v24 = vld [vmem:[%s1089_s24 + $0x30] ss:$8 sps:$4 sm:$0xff]   ;;  %v999_v26 = vld [vmem:[%s1089_s24 + $0x44] ss:$8 sps:$4 sm:$0xff]  }
  0x15   : > { %v1014_v23 = vld [vmem:[%s1089_s24 + $0xb4] ss:$8 sps:$4 sm:$0xff]   ;;  %v1016_v25 = vld [vmem:[%s1089_s24 + $0xb0] ss:$8 sps:$4 sm:$0xff]   ;;  %v1020_v27 = vld [vmem:[%s1089_s24 + $0xc4] ss:$8 sps:$4 sm:$0xff]  }
  0x16   : > { %v1001_v28 = vld [vmem:[%s1089_s24 + $0x40] ss:$8 sps:$4 sm:$0xff]   ;;  %v1005_v30 = vld [vmem:[%s1089_s24 + $0x54] ss:$8 sps:$4 sm:$0xff]   ;;  %v1007_v32 = vld [vmem:[%s1089_s24 + $0x50] ss:$8 sps:$4 sm:$0xff]  }
  0x17   : > { %495 = vmatpush1.bf16.msra.mxu0 %v979_v6  ;;  %961 = vmatpush1.bf16.msra.mxu1 %v979_v6  ;;  %v1022_v29 = vld [vmem:[%s1089_s24 + $0xc0] ss:$8 sps:$4 sm:$0xff]   ;;  %v1023_v31 = vld [vmem:[%s1089_s24 + $0xd4] ss:$8 sps:$4 sm:$0xff]   ;;  %v1025_v33 = vld [vmem:[%s1089_s24 + $0xd0] ss:$8 sps:$4 sm:$0xff]  }
  0x18   : > { %496 = vmatprep.subr.bf16.mxu0 %v1040_v1  ;;  %953 = vmatprep.subr.bf16.mxu1 %v1040_v1  ;;  %v1011_v34 = vld [vmem:[%s1089_s24 + $0x64] ss:$8 sps:$4 sm:$0xff]   ;;  %v1013_v36 = vld [vmem:[%s1089_s24 + $0x60] ss:$8 sps:$4 sm:$0xff]   ;;  %v1017_v38 = vld [vmem:[%s1089_s24 + $0x74] ss:$8 sps:$4 sm:$0xff]  }
  0x19   : > { %v1026_v35 = vld [vmem:[%s1089_s24 + $0xe4] ss:$8 sps:$4 sm:$0xff]   ;;  %v1028_v37 = vld [vmem:[%s1089_s24 + $0xe0] ss:$8 sps:$4 sm:$0xff]   ;;  %v1029_v39 = vld [vmem:[%s1089_s24 + $0xf4] ss:$8 sps:$4 sm:$0xff]  }
  0x1a   : > { %v1019_v40 = vld [vmem:[%s1089_s24 + $0x70] ss:$8 sps:$4 sm:$0xff]  }
  0x1b   : > { %497 = vmatpush1.bf16.msra.mxu0 %v980_v8  ;;  %962 = vmatpush1.bf16.msra.mxu1 %v980_v8  ;;  %v1031_v41 = vld [vmem:[%s1089_s24 + $0xf0] ss:$8 sps:$4 sm:$0xff]  }
  0x1c   : > { %498 = vmatprep.subr.bf16.mxu0 %v1040_v1  ;;  %954 = vmatprep.subr.bf16.mxu1 %v1040_v1 }
  0x1f   : > { %499 = vmatpush1.bf16.msra.mxu0 %v981_v9  ;;  %963 = vmatpush1.bf16.msra.mxu1 %v981_v9 }
  0x20   : > { %500 = vmatprep.subr.bf16.mxu0 %v1040_v1  ;;  %955 = vmatprep.subr.bf16.mxu1 %v1040_v1 }
  0x23   : > { %501 = vmatpush1.bf16.msra.mxu0 %v982_v10  ;;  %964 = vmatpush1.bf16.msra.mxu1 %v982_v10 }
  0x24   : > { %502 = vmatprep.subr.bf16.mxu0 %v1040_v1  ;;  %956 = vmatprep.subr.bf16.mxu1 %v1040_v1 }
  0x27   : > { %503 = vmatpush1.bf16.msra.mxu0 %v983_v11  ;;  %965 = vmatpush1.bf16.msra.mxu1 %v983_v11 }
  0x2a   : > { %519 = vmatmul.mubr.bf16.vlgmr.msra.gmra.mrb[0].mxu0 %v984_v12  ;;  %583 = vmatmul.mubr.bf16.vlgmr.msra.gmra.mrb[0].mxu1 %v996_v13 }
  0x2b   : > { %930 = vmatprep.mubr.msk.bf16.mxu0 %vm437_vm0, %v987_v14  ;;  %938 = vmatprep.mubr.msk.bf16.mxu1 %vm437_vm0, %v1002_v15 }
  0x32   : > { %527 = vmatmul.mubr.bf16.gmra.mrb[4].mxu0 %v989_v16  ;;  %591 = vmatmul.mubr.bf16.gmra.mrb[4].mxu1 %v1004_v17 }
  0x33   : > { %931 = vmatprep.mubr.msk.bf16.mxu0 %vm437_vm0, %v990_v18  ;;  %939 = vmatprep.mubr.msk.bf16.mxu1 %vm437_vm0, %v1008_v19 }
  0x3a   : > { %535 = vmatmul.mubr.bf16.gmra.mrb[8].mxu0 %v992_v20  ;;  %599 = vmatmul.mubr.bf16.gmra.mrb[8].mxu1 %v1010_v21 }
  0x3b   : > { %932 = vmatprep.mubr.msk.bf16.mxu0 %vm437_vm0, %v993_v22  ;;  %940 = vmatprep.mubr.msk.bf16.mxu1 %vm437_vm0, %v1014_v23 }
  0x42   : > { %543 = vmatmul.mubr.bf16.gmra.mrb[12].mxu0 %v995_v24  ;;  %607 = vmatmul.mubr.bf16.gmra.mrb[12].mxu1 %v1016_v25 }
  0x43   : > { %933 = vmatprep.mubr.msk.bf16.mxu0 %vm437_vm0, %v999_v26  ;;  %941 = vmatprep.mubr.msk.bf16.mxu1 %vm437_vm0, %v1020_v27 }
  0x4a   : > { %551 = vmatmul.mubr.bf16.gmra.mrb[16].mxu0 %v1001_v28  ;;  %615 = vmatmul.mubr.bf16.gmra.mrb[16].mxu1 %v1022_v29 }
  0x4b   : > { %934 = vmatprep.mubr.msk.bf16.mxu0 %vm437_vm0, %v1005_v30  ;;  %942 = vmatprep.mubr.msk.bf16.mxu1 %vm437_vm0, %v1023_v31 }
  0x52   : > { %559 = vmatmul.mubr.bf16.gmra.mrb[20].mxu0 %v1007_v32  ;;  %623 = vmatmul.mubr.bf16.gmra.mrb[20].mxu1 %v1025_v33 }
  0x53   : > { %935 = vmatprep.mubr.msk.bf16.mxu0 %vm437_vm0, %v1011_v34  ;;  %943 = vmatprep.mubr.msk.bf16.mxu1 %vm437_vm0, %v1026_v35 }
  0x5a   : > { %567 = vmatmul.mubr.bf16.gmra.mrb[24].mxu0 %v1013_v36  ;;  %631 = vmatmul.mubr.bf16.gmra.mrb[24].mxu1 %v1028_v37 }
  0x5b   : > { %936 = vmatprep.mubr.msk.bf16.mxu0 %vm437_vm0, %v1017_v38  ;;  %944 = vmatprep.mubr.msk.bf16.mxu1 %vm437_vm0, %v1029_v39 }
  0x62   : > { %575 = vmatmul.mubr.bf16.gmra.mrb[28].mxu0 %v1019_v40  ;;  %639 = vmatmul.mubr.bf16.gmra.mrb[28].mxu1 %v1031_v41 }
  0xfd   : > { %v520_v42 = vpop.f32.mrb[0].mxu0  ;;  %v1164_v43 = vpop.f32.mrb[0].mxu1 }
  0xfe   : > { %647 = vst [vmem:[%s1162_s14] sm:$0xff] %v520_v42  ;;  %v522_v44 = vpop.f32.mrb[1].mxu0  ;;  %663 = vst [vmem:[%s1162_s14 + $0x80] sm:$0xff] %v1164_v43  ;;  %v586_v45 = vpop.f32.mrb[1].mxu1  ;;  %v716_v48 = vmul.f32 %v520_v42, %v520_v42 }
  0xff   : > { %v523_v46 = vpop.f32.mrb[2].mxu0  ;;  %v1169_v47 = vpop.f32.mrb[2].mxu1 }
 0x100   : > { %648 = vst [vmem:[%s1162_s14 + $0x8] sm:$0xff] %v523_v46  ;;  %v679_v49 = vadd.f32 %v523_v46, %v520_v42  ;;  %v717_v50 = vmul.f32 %v523_v46, %v523_v46  ;;  %v525_v51 = vpop.f32.mrb[3].mxu0  ;;  %664 = vst [vmem:[%s1162_s14 + $0x88] sm:$0xff] %v1169_v47  ;;  %v589_v52 = vpop.f32.mrb[3].mxu1 }
 0x102   : > { %v748_v53 = vadd.f32 %v717_v50, %v716_v48 }
 0x105   : > { %v528_v54 = vpop.f32.mrb[4].mxu0  ;;  %v1174_v55 = vpop.f32.mrb[4].mxu1 }
 0x106   : > { %649 = vst [vmem:[%s1162_s14 + $0x10] sm:$0xff] %v528_v54  ;;  %v680_v56 = vadd.f32 %v679_v49, %v528_v54  ;;  %v718_v57 = vmul.f32 %v528_v54, %v528_v54  ;;  %v530_v58 = vpop.f32.mrb[5].mxu0  ;;  %665 = vst [vmem:[%s1162_s14 + $0x90] sm:$0xff] %v1174_v55  ;;  %v594_v59 = vpop.f32.mrb[5].mxu1 }
 0x107   : > { %v531_v60 = vpop.f32.mrb[6].mxu0  ;;  %v1179_v61 = vpop.f32.mrb[6].mxu1 }
 0x108   : > { %v749_v62 = vadd.f32 %v748_v53, %v718_v57  ;;  %650 = vst [vmem:[%s1162_s14 + $0x18] sm:$0xff] %v531_v60  ;;  %v681_v63 = vadd.f32 %v680_v56, %v531_v60  ;;  %v719_v0 = vmul.f32 %v531_v60, %v531_v60  ;;  %v533_v1 = vpop.f32.mrb[7].mxu0  ;;  %666 = vst [vmem:[%s1162_s14 + $0x98] sm:$0xff] %v1179_v61  ;;  %v597_v2 = vpop.f32.mrb[7].mxu1 }
 0x10a   : > { %v750_v3 = vadd.f32 %v749_v62, %v719_v0 }
 0x10d   : > { %v536_v4 = vpop.f32.mrb[8].mxu0  ;;  %v1184_v5 = vpop.f32.mrb[8].mxu1 }
 0x10e   : > { %651 = vst [vmem:[%s1162_s14 + $0x20] sm:$0xff] %v536_v4  ;;  %v682_v6 = vadd.f32 %v681_v63, %v536_v4  ;;  %v720_v7 = vmul.f32 %v536_v4, %v536_v4  ;;  %v538_v8 = vpop.f32.mrb[9].mxu0  ;;  %667 = vst [vmem:[%s1162_s14 + $0xa0] sm:$0xff] %v1184_v5  ;;  %v602_v9 = vpop.f32.mrb[9].mxu1 }
 0x10f   : > { %v539_v10 = vpop.f32.mrb[10].mxu0  ;;  %v1189_v11 = vpop.f32.mrb[10].mxu1 }
 0x110   : > { %v751_v12 = vadd.f32 %v750_v3, %v720_v7  ;;  %652 = vst [vmem:[%s1162_s14 + $0x28] sm:$0xff] %v539_v10  ;;  %v683_v13 = vadd.f32 %v682_v6, %v539_v10  ;;  %v721_v14 = vmul.f32 %v539_v10, %v539_v10  ;;  %v541_v15 = vpop.f32.mrb[11].mxu0  ;;  %668 = vst [vmem:[%s1162_s14 + $0xa8] sm:$0xff] %v1189_v11  ;;  %v605_v16 = vpop.f32.mrb[11].mxu1 }
 0x112   : > { %v752_v17 = vadd.f32 %v751_v12, %v721_v14 }
 0x115   : > { %v544_v18 = vpop.f32.mrb[12].mxu0  ;;  %v1194_v19 = vpop.f32.mrb[12].mxu1 }
 0x116   : > { %653 = vst [vmem:[%s1162_s14 + $0x30] sm:$0xff] %v544_v18  ;;  %v684_v20 = vadd.f32 %v683_v13, %v544_v18  ;;  %v722_v21 = vmul.f32 %v544_v18, %v544_v18  ;;  %v546_v22 = vpop.f32.mrb[13].mxu0  ;;  %669 = vst [vmem:[%s1162_s14 + $0xb0] sm:$0xff] %v1194_v19  ;;  %v610_v23 = vpop.f32.mrb[13].mxu1 }
 0x117   : > { %v547_v24 = vpop.f32.mrb[14].mxu0  ;;  %v1199_v25 = vpop.f32.mrb[14].mxu1 }
 0x118   : > { %v753_v26 = vadd.f32 %v752_v17, %v722_v21  ;;  %654 = vst [vmem:[%s1162_s14 + $0x38] sm:$0xff] %v547_v24  ;;  %v685_v27 = vadd.f32 %v684_v20, %v547_v24  ;;  %v723_v28 = vmul.f32 %v547_v24, %v547_v24  ;;  %v549_v29 = vpop.f32.mrb[15].mxu0  ;;  %670 = vst [vmem:[%s1162_s14 + $0xb8] sm:$0xff] %v1199_v25  ;;  %v613_v30 = vpop.f32.mrb[15].mxu1 }
 0x11a   : > { %v754_v31 = vadd.f32 %v753_v26, %v723_v28 }
 0x11d   : > { %v552_v32 = vpop.f32.mrb[16].mxu0  ;;  %v1204_v33 = vpop.f32.mrb[16].mxu1 }
 0x11e   : > { %655 = vst [vmem:[%s1162_s14 + $0x40] sm:$0xff] %v552_v32  ;;  %v686_v34 = vadd.f32 %v685_v27, %v552_v32  ;;  %v724_v35 = vmul.f32 %v552_v32, %v552_v32  ;;  %v554_v36 = vpop.f32.mrb[17].mxu0  ;;  %671 = vst [vmem:[%s1162_s14 + $0xc0] sm:$0xff] %v1204_v33  ;;  %v618_v37 = vpop.f32.mrb[17].mxu1 }
 0x11f   : > { %v555_v38 = vpop.f32.mrb[18].mxu0  ;;  %v1209_v39 = vpop.f32.mrb[18].mxu1 }
 0x120   : > { %v755_v40 = vadd.f32 %v754_v31, %v724_v35  ;;  %656 = vst [vmem:[%s1162_s14 + $0x48] sm:$0xff] %v555_v38  ;;  %v687_v41 = vadd.f32 %v686_v34, %v555_v38  ;;  %v725_v42 = vmul.f32 %v555_v38, %v555_v38  ;;  %v557_v44 = vpop.f32.mrb[19].mxu0  ;;  %672 = vst [vmem:[%s1162_s14 + $0xc8] sm:$0xff] %v1209_v39  ;;  %v621_v45 = vpop.f32.mrb[19].mxu1 }
 0x121   : > { %v732_v31 = vmul.f32 %v1164_v43, %v1164_v43  ;;  %v733_v35 = vmul.f32 %v1169_v47, %v1169_v47  ;;  %v734_v38 = vmul.f32 %v1174_v55, %v1174_v55 }
 0x122   : > { %v756_v46 = vadd.f32 %v755_v40, %v725_v42  ;;  %v735_v42 = vmul.f32 %v1179_v61, %v1179_v61 }
 0x125   : > { %v560_v48 = vpop.f32.mrb[20].mxu0  ;;  %v1214_v49 = vpop.f32.mrb[20].mxu1 }
 0x126   : > { %657 = vst [vmem:[%s1162_s14 + $0x50] sm:$0xff] %v560_v48  ;;  %v688_v50 = vadd.f32 %v687_v41, %v560_v48  ;;  %v726_v51 = vmul.f32 %v560_v48, %v560_v48  ;;  %v562_v52 = vpop.f32.mrb[21].mxu0  ;;  %673 = vst [vmem:[%s1162_s14 + $0xd0] sm:$0xff] %v1214_v49  ;;  %v626_v53 = vpop.f32.mrb[21].mxu1 }
 0x127   : > { %v563_v54 = vpop.f32.mrb[22].mxu0  ;;  %v1219_v56 = vpop.f32.mrb[22].mxu1 }
 0x128   : > { %v757_v57 = vadd.f32 %v756_v46, %v726_v51  ;;  %658 = vst [vmem:[%s1162_s14 + $0x58] sm:$0xff] %v563_v54  ;;  %v689_v58 = vadd.f32 %v688_v50, %v563_v54  ;;  %v727_v59 = vmul.f32 %v563_v54, %v563_v54  ;;  %v565_v60 = vpop.f32.mrb[23].mxu0  ;;  %674 = vst [vmem:[%s1162_s14 + $0xd8] sm:$0xff] %v1219_v56  ;;  %v629_v62 = vpop.f32.mrb[23].mxu1 }
 0x129   : > { %v741_v62 = vmul.f32 %v1209_v39, %v1209_v39 }
 0x12a   : > { %v758_v63 = vadd.f32 %v757_v57, %v727_v59 }
 0x12d   : > { %v568_v0 = vpop.f32.mrb[24].mxu0  ;;  %v1224_v1 = vpop.f32.mrb[24].mxu1 }
 0x12e   : > { %659 = vst [vmem:[%s1162_s14 + $0x60] sm:$0xff] %v568_v0  ;;  %v690_v2 = vadd.f32 %v689_v58, %v568_v0  ;;  %v728_v3 = vmul.f32 %v568_v0, %v568_v0  ;;  %v570_v4 = vpop.f32.mrb[25].mxu0  ;;  %675 = vst [vmem:[%s1162_s14 + $0xe0] sm:$0xff] %v1224_v1  ;;  %v634_v6 = vpop.f32.mrb[25].mxu1  ;;  %v740_v58 = vmul.f32 %v1204_v33, %v1204_v33 }
 0x12f   : > { %v571_v7 = vpop.f32.mrb[26].mxu0  ;;  %v1229_v8 = vpop.f32.mrb[26].mxu1  ;;  %v742_v0 = vmul.f32 %v1214_v49, %v1214_v49  ;;  %v744_v6 = vmul.f32 %v1224_v1, %v1224_v1 }
 0x130   : > { %v759_v9 = vadd.f32 %v758_v63, %v728_v3  ;;  %660 = vst [vmem:[%s1162_s14 + $0x68] sm:$0xff] %v571_v7  ;;  %v691_v10 = vadd.f32 %v690_v2, %v571_v7  ;;  %v729_v12 = vmul.f32 %v571_v7, %v571_v7  ;;  %v573_v13 = vpop.f32.mrb[27].mxu0  ;;  %676 = vst [vmem:[%s1162_s14 + $0xe8] sm:$0xff] %v1229_v8  ;;  %v637_v14 = vpop.f32.mrb[27].mxu1 }
 0x132   : > { %v760_v15 = vadd.f32 %v759_v9, %v729_v12 }
 0x135   : > { %v576_v16 = vpop.f32.mrb[28].mxu0  ;;  %v640_v17 = vpop.f32.mrb[28].mxu1 }
 0x136   : > { %661 = vst [vmem:[%s1162_s14 + $0x70] sm:$0xff] %v576_v16  ;;  %v692_v18 = vadd.f32 %v691_v10, %v576_v16  ;;  %v730_v20 = vmul.f32 %v576_v16, %v576_v16  ;;  %v578_v21 = vpop.f32.mrb[29].mxu0  ;;  %677 = vst [vmem:[%s1162_s14 + $0xf0] sm:$0xff] %v640_v17  ;;  %v642_v22 = vpop.f32.mrb[29].mxu1  ;;  %v746_v9 = vmul.f32 %v640_v17, %v640_v17 }
 0x137   : > { %v579_v23 = vpop.f32.mrb[30].mxu0  ;;  %v643_v24 = vpop.f32.mrb[30].mxu1 }
 0x138   : > { %v761_v26 = vadd.f32 %v760_v15, %v730_v20  ;;  %662 = vst [vmem:[%s1162_s14 + $0x78] sm:$0xff] %v579_v23  ;;  %v693_v27 = vadd.f32 %v692_v18, %v579_v23  ;;  %v731_v28 = vmul.f32 %v579_v23, %v579_v23  ;;  %v581_v29 = vpop.f32.mrb[31].mxu0  ;;  %678 = vst [vmem:[%s1162_s14 + $0xf8] sm:$0xff] %v643_v24  ;;  %v645_v30 = vpop.f32.mrb[31].mxu1 }
 0x139   : > { %v747_v15 = vmul.f32 %v643_v24, %v643_v24 }
 0x13a   : > { %v694_v32 = vadd.f32 %v693_v27, %v1164_v43  ;;  %v762_v34 = vadd.f32 %v761_v26, %v731_v28  ;;  %v736_v43 = vmul.f32 %v1184_v5, %v1184_v5 }
 0x13c   : > { %v695_v36 = vadd.f32 %v694_v32, %v1169_v47  ;;  %v763_v37 = vadd.f32 %v762_v34, %v732_v31  ;;  %v737_v47 = vmul.f32 %v1189_v11, %v1189_v11 }
 0x13e   : > { %v696_v40 = vadd.f32 %v695_v36, %v1174_v55  ;;  %v764_v41 = vadd.f32 %v763_v37, %v733_v35  ;;  %v738_v55 = vmul.f32 %v1194_v19, %v1194_v19 }
 0x140   : > { %v697_v44 = vadd.f32 %v696_v40, %v1179_v61  ;;  %v765_v45 = vadd.f32 %v764_v41, %v734_v38  ;;  %v739_v61 = vmul.f32 %v1199_v25, %v1199_v25 }
 0x142   : > { %v766_v46 = vadd.f32 %v765_v45, %v735_v42  ;;  %v698_v48 = vadd.f32 %v697_v44, %v1184_v5 }
 0x144   : > { %v699_v50 = vadd.f32 %v698_v48, %v1189_v11  ;;  %v767_v51 = vadd.f32 %v766_v46, %v736_v43 }
 0x146   : > { %v700_v52 = vadd.f32 %v699_v50, %v1194_v19  ;;  %v768_v53 = vadd.f32 %v767_v51, %v737_v47 }
 0x148   : > { %v701_v54 = vadd.f32 %v700_v52, %v1199_v25  ;;  %v769_v57 = vadd.f32 %v768_v53, %v738_v55 }
 0x14a   : > { %v702_v5 = vadd.f32 %v701_v54, %v1204_v33  ;;  %v770_v59 = vadd.f32 %v769_v57, %v739_v61  ;;  %v743_v33 = vmul.f32 %v1219_v56, %v1219_v56 }
 0x14c   : > { %v771_v11 = vadd.f32 %v770_v59, %v740_v58  ;;  %v703_v60 = vadd.f32 %v702_v5, %v1209_v39 }
 0x14e   : > { %v772_v19 = vadd.f32 %v771_v11, %v741_v62  ;;  %v704_v63 = vadd.f32 %v703_v60, %v1214_v49  ;;  %v745_v49 = vmul.f32 %v1229_v8, %v1229_v8 }
 0x150   : > { %v773_v25 = vadd.f32 %v772_v19, %v742_v0  ;;  %v705_v2 = vadd.f32 %v704_v63, %v1219_v56 }
 0x152   : > { %v774_v3 = vadd.f32 %v773_v25, %v743_v33  ;;  %v706_v4 = vadd.f32 %v705_v2, %v1224_v1 }
 0x154   : > { %v775_v39 = vadd.f32 %v774_v3, %v744_v6  ;;  %v707_v7 = vadd.f32 %v706_v4, %v1229_v8 }
 0x156   : > { %v776_v10 = vadd.f32 %v775_v39, %v745_v49  ;;  %v708_v12 = vadd.f32 %v707_v7, %v640_v17 }
 0x158   : > { %v777_v13 = vadd.f32 %v776_v10, %v746_v9  ;;  %v709_v14 = vadd.f32 %v708_v12, %v643_v24 }
 0x15a   : > { %v710_v56 = vrot.slane %v709_v14, 4  ;;  %v778_v16 = vadd.f32 %v777_v13, %v747_v15 }
 0x15c   : > { %v711_v18 = vadd.f32 %v710_v56, %v709_v14  ;;  %v779_v20 = vrot.slane %v778_v16, 4 }
 0x15e   : > { %v712_v21 = vrot.slane %v711_v18, 2  ;;  %v780_v1 = vadd.f32 %v779_v20, %v778_v16 }
 0x160   : > { %v713_v22 = vadd.f32 %v712_v21, %v711_v18  ;;  %v781_v23 = vrot.slane %v780_v1, 2 }
 0x162   : > { %v714_v26 = vrot.slane %v713_v22, 1  ;;  %v782_v27 = vadd.f32 %v781_v23, %v780_v1 }
 0x164   : > { %v783_v8 = vrot.slane %v782_v27, 1  ;;  %v715_v28 = vadd.f32 %v714_v26, %v713_v22 }
 0x166   : > { %v784_v17 = vadd.f32 %v783_v8, %v782_v27 }
 0x168   : > { %v786_v24 = vsel %vm785_vm1, %v715_v28, %v784_v17 }
 0x169   : > { %v788_v29 = vsel %vm787_vm2, %v786_v24, 0.0 }
 0x16a   : > { %789 = vst [vmem:[%s187_s18] sm:$0xff] %v788_v29 }
 0x16b PF: > { %s14_s12 = sadd.s32 1, %s1038_s12  }
 0x16c   : > { %p11_p5 = scmp.ge.s32.totalorder %s14_s12, 4  }
 0x16e   :  { %13 = sbr.rel (!%p11_p5) target bundleno = 1 (0x1), region = 70 }

// kernel: _lambda_.18
= control target key start
LH: loop header
LB: loop body
LE: loop exit
PB: predicated region body
PF: predicated region fallthrough
CT: control target
= control target key end

     0   :  { %s517_s12 = smov 0   ;;  %s679_s0 = inlined_call_operand.vmem [shape: f32[512,128], index: 0, kind: input, shape index: {}]   ;;  %s680_s1 = inlined_call_operand.vmem [shape: f32[1,128], index: 1, kind: input, shape index: {}]   ;;  %s681_s2 = inlined_call_operand.vmem [shape: f32[1,128], index: 2, kind: input, shape index: {}]   ;;  %s682_s3 = inlined_call_operand.vmem [shape: f32[512,128], index: 3, kind: output, shape index: {}]  }
   0x1 LB: > { %s468_s13 = sadd.s32 4294967295, %s495_s12   ;;  %p472_p0 = scmp.ge.s32.totalorder %s495_s12, 1  ;;  %s495_s12 = sphi %s517_s12, %s13_s12  }
   0x2   : > { %p138_p1 = scmp.lt.s32.totalorder %s495_s12, 3 }
   0x4   : > { %p139_p2 = pnand %p472_p0, %p138_p1 }
   0x5   : > { %s473_s14 = sshll.u32 (!%p139_p2), %s468_s13, 5  ;;  %v531_v0 = vld [vmem:[%s680_s1] ss:$0 sm:$0xff] (!%p139_p2) }
   0x6   : > { %142 = sbr.rel (%p139_p2) target bundleno = 62 (0x3e), region = 32  ;;  %p163_p3 = scmp.lt.s32.totalorder (!%p139_p2), %s473_s14, 63  ;;  %v541_v1 = vld [vmem:[%s681_s2] ss:$0 sm:$0xff] (!%p139_p2) }
   0xd   : > { %s684_s14 = smov (!%p163_p3, %s473_s14), 63 }
   0xe   : > { %s474_s15 = sshll.u32 %s684_s14, 3 }
   0xf   : > { %s536_s20 = scalar_lea.vmem %s679_s0, %s474_s15  ;;  %s569_s25 = scalar_lea.vmem %s682_s3, %s474_s15 }
  0x10   : > { %v174_v2 = vld [vmem:[%s536_s20] sm:$0xff]  ;;  %v175_v3 = vld [vmem:[%s536_s20 + $0x8] sm:$0xff]  ;;  %v176_v4 = vld [vmem:[%s536_s20 + $0x10] sm:$0xff] }
  0x11   : > { %v213_v5 = vmul.f32 %v531_v0, %v174_v2  ;;  %v214_v6 = vmul.f32 %v531_v0, %v175_v3  ;;  %v215_v7 = vmul.f32 %v531_v0, %v176_v4  ;;  %v177_v8 = vld [vmem:[%s536_s20 + $0x18] sm:$0xff]  ;;  %v178_v9 = vld [vmem:[%s536_s20 + $0x20] sm:$0xff]  ;;  %v179_v10 = vld [vmem:[%s536_s20 + $0x28] sm:$0xff] }
  0x12   : > { %v216_v11 = vmul.f32 %v531_v0, %v177_v8  ;;  %v217_v12 = vmul.f32 %v531_v0, %v178_v9  ;;  %v218_v13 = vmul.f32 %v531_v0, %v179_v10  ;;  %v180_v14 = vld [vmem:[%s536_s20 + $0x30] sm:$0xff]  ;;  %v181_v15 = vld [vmem:[%s536_s20 + $0x38] sm:$0xff]  ;;  %v182_v24 = vld [vmem:[%s536_s20 + $0x40] sm:$0xff] }
  0x13   : > { %v252_v16 = vadd.f32 %v541_v1, %v213_v5  ;;  %v253_v17 = vadd.f32 %v541_v1, %v214_v6  ;;  %v254_v18 = vadd.f32 %v541_v1, %v215_v7  ;;  %v219_v19 = vmul.f32 %v531_v0, %v180_v14  ;;  %v183_v32 = vld [vmem:[%s536_s20 + $0x48] sm:$0xff]  ;;  %v184_v33 = vld [vmem:[%s536_s20 + $0x50] sm:$0xff]  ;;  %v185_v34 = vld [vmem:[%s536_s20 + $0x58] sm:$0xff] }
  0x14   : > { %v255_v20 = vadd.f32 %v541_v1, %v216_v11  ;;  %v256_v21 = vadd.f32 %v541_v1, %v217_v12  ;;  %v257_v22 = vadd.f32 %v541_v1, %v218_v13  ;;  %v220_v23 = vmul.f32 %v531_v0, %v181_v15  ;;  %v186_v46 = vld [vmem:[%s536_s20 + $0x60] sm:$0xff]  ;;  %v187_v47 = vld [vmem:[%s536_s20 + $0x68] sm:$0xff]  ;;  %v188_v58 = vld [vmem:[%s536_s20 + $0x70] sm:$0xff] }
  0x15   : > { %vm284_vm0 = vcmp.gt.f32.partialorder %v252_v16, 0.0  ;;  %v316_v25 = vmul.f32 0.2, %v252_v16  ;;  %vm285_vm1 = vcmp.gt.f32.partialorder %v253_v17, 0.0  ;;  %v317_v26 = vmul.f32 0.2, %v253_v17 }
  0x16   : > { %vm286_vm2 = vcmp.gt.f32.partialorder %v254_v18, 0.0  ;;  %v318_v27 = vmul.f32 0.2, %v254_v18  ;;  %vm287_vm3 = vcmp.gt.f32.partialorder %v255_v20, 0.0  ;;  %v319_v28 = vmul.f32 0.2, %v255_v20 }
  0x17   : > { %v348_v29 = vsel %vm284_vm0, %v252_v16, %v316_v25  ;;  %v349_v30 = vsel %vm285_vm1, %v253_v17, %v317_v26  ;;  %vm288_vm4 = vcmp.gt.f32.partialorder %v256_v21, 0.0  ;;  %v320_v31 = vmul.f32 0.2, %v256_v21  ;;  %v189_v59 = vld [vmem:[%s536_s20 + $0x78] sm:$0xff]  ;;  %v190_v6 = vld [vmem:[%s536_s20 + $0x80] sm:$0xff]  ;;  %v191_v7 = vld [vmem:[%s536_s20 + $0x88] sm:$0xff] }
  0x18   : > { %380 = vst [vmem:[%s569_s25] sm:$0xff] %v348_v29  ;;  %381 = vst [vmem:[%s569_s25 + $0x8] sm:$0xff] %v349_v30  ;;  %v350_v35 = vsel %vm286_vm2, %v254_v18, %v318_v27  ;;  %v351_v36 = vsel %vm287_vm3, %v255_v20, %v319_v28  ;;  %vm289_vm5 = vcmp.gt.f32.partialorder %v257_v22, 0.0  ;;  %v321_v37 = vmul.f32 0.2, %v257_v22  ;;  %v192_v12 = vld [vmem:[%s536_s20 + $0x90] sm:$0xff]  ;;  %v193_v13 = vld [vmem:[%s536_s20 + $0x98] sm:$0xff] }
  0x19   : > { %382 = vst [vmem:[%s569_s25 + $0x10] sm:$0xff] %v350_v35  ;;  %383 = vst [vmem:[%s569_s25 + $0x18] sm:$0xff] %v351_v36  ;;  %v352_v38 = vsel %vm288_vm4, %v256_v21, %v320_v31  ;;  %v258_v39 = vadd.f32 %v541_v1, %v219_v19  ;;  %v259_v40 = vadd.f32 %v541_v1, %v220_v23  ;;  %v195_v25 = vld [vmem:[%s536_s20 + $0xa8] sm:$0xff]  ;;  %v196_v36 = vld [vmem:[%s536_s20 + $0xb0] sm:$0xff] }
  0x1a   : > { %v221_v41 = vmul.f32 %v531_v0, %v182_v24  ;;  %384 = vst [vmem:[%s569_s25 + $0x20] sm:$0xff] %v352_v38  ;;  %v353_v42 = vsel %vm289_vm5, %v257_v22, %v321_v37  ;;  %v222_v43 = vmul.f32 %v531_v0, %v183_v32  ;;  %v223_v44 = vmul.f32 %v531_v0, %v184_v33  ;;  %v194_v24 = vld [vmem:[%s536_s20 + $0xa0] sm:$0xff]  ;;  %v197_v37 = vld [vmem:[%s536_s20 + $0xb8] sm:$0xff] }
  0x1b   : > { %v224_v45 = vmul.f32 %v531_v0, %v185_v34  ;;  %385 = vst [vmem:[%s569_s25 + $0x28] sm:$0xff] %v353_v42  ;;  %vm290_vm6 = vcmp.gt.f32.partialorder %v258_v39, 0.0  ;;  %v322_v48 = vmul.f32 0.2, %v258_v39  ;;  %vm291_vm7 = vcmp.gt.f32.partialorder %v259_v40, 0.0 }
  0x1c   : > { %v323_v49 = vmul.f32 0.2, %v259_v40  ;;  %v260_v50 = vadd.f32 %v541_v1, %v221_v41  ;;  %v261_v51 = vadd.f32 %v541_v1, %v222_v43  ;;  %v262_v52 = vadd.f32 %v541_v1, %v223_v44 }
  0x1d   : > { %v263_v53 = vadd.f32 %v541_v1, %v224_v45  ;;  %v354_v54 = vsel %vm290_vm6, %v258_v39, %v322_v48  ;;  %v225_v56 = vmul.f32 %v531_v0, %v186_v46  ;;  %v226_v57 = vmul.f32 %v531_v0, %v187_v47  ;;  %v198_v46 = vld [vmem:[%s536_s20 + $0xc0] sm:$0xff]  ;;  %v199_v47 = vld [vmem:[%s536_s20 + $0xc8] sm:$0xff] }
  0x1e   : > { %v355_v55 = vsel %vm291_vm7, %v259_v40, %v323_v49  ;;  %386 = vst [vmem:[%s569_s25 + $0x30] sm:$0xff] %v354_v54  ;;  %vm292_vm8 = vcmp.gt.f32.partialorder %v260_v50, 0.0  ;;  %v324_v60 = vmul.f32 0.2, %v260_v50  ;;  %vm293_vm9 = vcmp.gt.f32.partialorder %v261_v51, 0.0 }
  0x1f   : > { %387 = vst [vmem:[%s569_s25 + $0x38] sm:$0xff] %v355_v55  ;;  %v325_v61 = vmul.f32 0.2, %v261_v51  ;;  %vm294_vm10 = vcmp.gt.f32.partialorder %v262_v52, 0.0  ;;  %v326_v62 = vmul.f32 0.2, %v262_v52  ;;  %v264_v4 = vadd.f32 %v541_v1, %v225_v56 }
  0x20   : > { %vm295_vm11 = vcmp.gt.f32.partialorder %v263_v53, 0.0  ;;  %v327_v63 = vmul.f32 0.2, %v263_v53  ;;  %v356_v2 = vsel %vm292_vm8, %v260_v50, %v324_v60  ;;  %v265_v5 = vadd.f32 %v541_v1, %v226_v57 }
  0x21   : > { %v357_v3 = vsel %vm293_vm9, %v261_v51, %v325_v61  ;;  %388 = vst [vmem:[%s569_s25 + $0x40] sm:$0xff] %v356_v2  ;;  %v358_v8 = vsel %vm294_vm10, %v262_v52, %v326_v62  ;;  %v227_v10 = vmul.f32 %v531_v0, %v188_v58  ;;  %v228_v11 = vmul.f32 %v531_v0, %v189_v59  ;;  %v200_v52 = vld [vmem:[%s536_s20 + $0xd0] sm:$0xff]  ;;  %v202_v2 = vld [vmem:[%s536_s20 + $0xe0] sm:$0xff] }
  0x22   : > { %389 = vst [vmem:[%s569_s25 + $0x48] sm:$0xff] %v357_v3  ;;  %v359_v9 = vsel %vm295_vm11, %v263_v53, %v327_v63  ;;  %390 = vst [vmem:[%s569_s25 + $0x50] sm:$0xff] %v358_v8  ;;  %vm296_vm12 = vcmp.gt.f32.partialorder %v264_v4, 0.0  ;;  %v328_v14 = vmul.f32 0.2, %v264_v4  ;;  %vm297_vm13 = vcmp.gt.f32.partialorder %v265_v5, 0.0 }
  0x23   : > { %391 = vst [vmem:[%s569_s25 + $0x58] sm:$0xff] %v359_v9  ;;  %v329_v15 = vmul.f32 0.2, %v265_v5  ;;  %v266_v16 = vadd.f32 %v541_v1, %v227_v10  ;;  %v267_v17 = vadd.f32 %v541_v1, %v228_v11  ;;  %v229_v18 = vmul.f32 %v531_v0, %v190_v6  ;;  %v201_v53 = vld [vmem:[%s536_s20 + $0xd8] sm:$0xff]  ;;  %v203_v3 = vld [vmem:[%s536_s20 + $0xe8] sm:$0xff] }
  0x24   : > { %v230_v19 = vmul.f32 %v531_v0, %v191_v7  ;;  %v360_v20 = vsel %vm296_vm12, %v264_v4, %v328_v14  ;;  %v231_v22 = vmul.f32 %v531_v0, %v192_v12  ;;  %v232_v23 = vmul.f32 %v531_v0, %v193_v13  ;;  %v204_v14 = vld [vmem:[%s536_s20 + $0xf0] sm:$0xff] }
  0x25   : > { %v361_v21 = vsel %vm297_vm13, %v265_v5, %v329_v15  ;;  %392 = vst [vmem:[%s569_s25 + $0x60] sm:$0xff] %v360_v20  ;;  %vm298_vm14 = vcmp.gt.f32.partialorder %v266_v16, 0.0  ;;  %v330_v26 = vmul.f32 0.2, %v266_v16  ;;  %vm299_vm15 = vcmp.gt.f32.partialorder %v267_v17, 0.0  ;;  %v205_v15 = vld [vmem:[%s536_s20 + $0xf8] sm:$0xff] }
  0x26   : > { %393 = vst [vmem:[%s569_s25 + $0x68] sm:$0xff] %v361_v21  ;;  %v331_v27 = vmul.f32 0.2, %v267_v17  ;;  %v268_v28 = vadd.f32 %v541_v1, %v229_v18  ;;  %v269_v29 = vadd.f32 %v541_v1, %v230_v19  ;;  %v270_v30 = vadd.f32 %v541_v1, %v231_v22 }
  0x27   : > { %v271_v31 = vadd.f32 %v541_v1, %v232_v23  ;;  %v362_v32 = vsel %vm298_vm14, %v266_v16, %v330_v26  ;;  %v233_v34 = vmul.f32 %v531_v0, %v194_v24  ;;  %v234_v35 = vmul.f32 %v531_v0, %v195_v25 }
  0x28   : > { %v363_v33 = vsel %vm299_vm15, %v267_v17, %v331_v27  ;;  %394 = vst [vmem:[%s569_s25 + $0x70] sm:$0xff] %v362_v32  ;;  %vm300_vm0 = vcmp.gt.f32.partialorder %v268_v28, 0.0  ;;  %v332_v38 = vmul.f32 0.2, %v268_v28  ;;  %vm301_vm1 = vcmp.gt.f32.partialorder %v269_v29, 0.0 }
  0x29   : > { %395 = vst [vmem:[%s569_s25 + $0x78] sm:$0xff] %v363_v33  ;;  %v333_v39 = vmul.f32 0.2, %v269_v29  ;;  %vm302_vm2 = vcmp.gt.f32.partialorder %v270_v30, 0.0  ;;  %v334_v40 = vmul.f32 0.2, %v270_v30  ;;  %v272_v44 = vadd.f32 %v541_v1, %v233_v34 }
  0x2a   : > { %vm303_vm3 = vcmp.gt.f32.partialorder %v271_v31, 0.0  ;;  %v335_v41 = vmul.f32 0.2, %v271_v31  ;;  %v364_v42 = vsel %vm300_vm0, %v268_v28, %v332_v38  ;;  %v273_v45 = vadd.f32 %v541_v1, %v234_v35 }
  0x2b   : > { %v365_v43 = vsel %vm301_vm1, %v269_v29, %v333_v39  ;;  %396 = vst [vmem:[%s569_s25 + $0x80] sm:$0xff] %v364_v42  ;;  %v366_v48 = vsel %vm302_vm2, %v270_v30, %v334_v40  ;;  %v235_v50 = vmul.f32 %v531_v0, %v196_v36  ;;  %v236_v51 = vmul.f32 %v531_v0, %v197_v37 }
  0x2c   : > { %397 = vst [vmem:[%s569_s25 + $0x88] sm:$0xff] %v365_v43  ;;  %v367_v49 = vsel %vm303_vm3, %v271_v31, %v335_v41  ;;  %398 = vst [vmem:[%s569_s25 + $0x90] sm:$0xff] %v366_v48  ;;  %vm304_vm4 = vcmp.gt.f32.partialorder %v272_v44, 0.0  ;;  %v336_v54 = vmul.f32 0.2, %v272_v44  ;;  %vm305_vm5 = vcmp.gt.f32.partialorder %v273_v45, 0.0 }
  0x2d   : > { %399 = vst [vmem:[%s569_s25 + $0x98] sm:$0xff] %v367_v49  ;;  %v337_v55 = vmul.f32 0.2, %v273_v45  ;;  %v274_v56 = vadd.f32 %v541_v1, %v235_v50  ;;  %v275_v57 = vadd.f32 %v541_v1, %v236_v51  ;;  %v237_v58 = vmul.f32 %v531_v0, %v198_v46 }
  0x2e   : > { %v238_v59 = vmul.f32 %v531_v0, %v199_v47  ;;  %v368_v60 = vsel %vm304_vm4, %v272_v44, %v336_v54  ;;  %v239_v62 = vmul.f32 %v531_v0, %v200_v52  ;;  %v240_v63 = vmul.f32 %v531_v0, %v201_v53 }
  0x2f   : > { %v369_v61 = vsel %vm305_vm5, %v273_v45, %v337_v55  ;;  %400 = vst [vmem:[%s569_s25 + $0xa0] sm:$0xff] %v368_v60  ;;  %vm306_vm6 = vcmp.gt.f32.partialorder %v274_v56, 0.0  ;;  %v338_v4 = vmul.f32 0.2, %v274_v56  ;;  %vm307_vm7 = vcmp.gt.f32.partialorder %v275_v57, 0.0 }
  0x30   : > { %401 = vst [vmem:[%s569_s25 + $0xa8] sm:$0xff] %v369_v61  ;;  %v339_v5 = vmul.f32 0.2, %v275_v57  ;;  %v276_v6 = vadd.f32 %v541_v1, %v237_v58  ;;  %v277_v7 = vadd.f32 %v541_v1, %v238_v59  ;;  %v278_v8 = vadd.f32 %v541_v1, %v239_v62 }
  0x31   : > { %v279_v9 = vadd.f32 %v541_v1, %v240_v63  ;;  %v370_v10 = vsel %vm306_vm6, %v274_v56, %v338_v4  ;;  %v241_v12 = vmul.f32 %v531_v0, %v202_v2  ;;  %v242_v13 = vmul.f32 %v531_v0, %v203_v3 }
  0x32   : > { %v371_v11 = vsel %vm307_vm7, %v275_v57, %v339_v5  ;;  %402 = vst [vmem:[%s569_s25 + $0xb0] sm:$0xff] %v370_v10  ;;  %vm308_vm8 = vcmp.gt.f32.partialorder %v276_v6, 0.0  ;;  %v340_v16 = vmul.f32 0.2, %v276_v6  ;;  %vm309_vm9 = vcmp.gt.f32.partialorder %v277_v7, 0.0 }
  0x33   : > { %403 = vst [vmem:[%s569_s25 + $0xb8] sm:$0xff] %v371_v11  ;;  %v341_v17 = vmul.f32 0.2, %v277_v7  ;;  %vm310_vm10 = vcmp.gt.f32.partialorder %v278_v8, 0.0  ;;  %v342_v18 = vmul.f32 0.2, %v278_v8  ;;  %v280_v22 = vadd.f32 %v541_v1, %v241_v12 }
  0x34   : > { %vm311_vm11 = vcmp.gt.f32.partialorder %v279_v9, 0.0  ;;  %v343_v19 = vmul.f32 0.2, %v279_v9  ;;  %v372_v20 = vsel %vm308_vm8, %v276_v6, %v340_v16  ;;  %v281_v23 = vadd.f32 %v541_v1, %v242_v13 }
  0x35   : > { %v373_v21 = vsel %vm309_vm9, %v277_v7, %v341_v17  ;;  %404 = vst [vmem:[%s569_s25 + $0xc0] sm:$0xff] %v372_v20  ;;  %v374_v24 = vsel %vm310_vm10, %v278_v8, %v342_v18  ;;  %v243_v26 = vmul.f32 %v531_v0, %v204_v14  ;;  %v244_v27 = vmul.f32 %v531_v0, %v205_v15 }
  0x36   : > { %405 = vst [vmem:[%s569_s25 + $0xc8] sm:$0xff] %v373_v21  ;;  %v375_v25 = vsel %vm311_vm11, %v279_v9, %v343_v19  ;;  %406 = vst [vmem:[%s569_s25 + $0xd0] sm:$0xff] %v374_v24  ;;  %vm312_vm12 = vcmp.gt.f32.partialorder %v280_v22, 0.0  ;;  %v344_v28 = vmul.f32 0.2, %v280_v22  ;;  %vm313_vm13 = vcmp.gt.f32.partialorder %v281_v23, 0.0 }
  0x37   : > { %407 = vst [vmem:[%s569_s25 + $0xd8] sm:$0xff] %v375_v25  ;;  %v345_v29 = vmul.f32 0.2, %v281_v23  ;;  %v282_v30 = vadd.f32 %v541_v1, %v243_v26  ;;  %v283_v31 = vadd.f32 %v541_v1, %v244_v27 }
  0x38   : > { %v376_v32 = vsel %vm312_vm12, %v280_v22, %v344_v28 }
  0x39   : > { %v377_v33 = vsel %vm313_vm13, %v281_v23, %v345_v29  ;;  %408 = vst [vmem:[%s569_s25 + $0xe0] sm:$0xff] %v376_v32  ;;  %vm314_vm14 = vcmp.gt.f32.partialorder %v282_v30, 0.0  ;;  %v346_v34 = vmul.f32 0.2, %v282_v30  ;;  %vm315_vm15 = vcmp.gt.f32.partialorder %v283_v31, 0.0 }
  0x3a   : > { %409 = vst [vmem:[%s569_s25 + $0xe8] sm:$0xff] %v377_v33  ;;  %v347_v0 = vmul.f32 0.2, %v283_v31 }
  0x3b   : > { %v378_v35 = vsel %vm314_vm14, %v282_v30, %v346_v34 }
  0x3c   : > { %v379_v36 = vsel %vm315_vm15, %v283_v31, %v347_v0  ;;  %410 = vst [vmem:[%s569_s25 + $0xf0] sm:$0xff] %v378_v35 }
  0x3d   : > { %411 = vst [vmem:[%s569_s25 + $0xf8] sm:$0xff] %v379_v36 }
  0x3e PF: > { %s13_s12 = sadd.s32 1, %s495_s12  }
  0x3f   : > { %p10_p4 = scmp.ge.s32.totalorder %s13_s12, 4  }
  0x41   :  { %12 = sbr.rel (!%p10_p4) target bundleno = 1 (0x1), region = 62 }

// kernel: _lambda_.19
= control target key start
LH: loop header
LB: loop body
LE: loop exit
PB: predicated region body
PF: predicated region fallthrough
CT: control target
= control target key end

     0   :  { %s1471_s12 = smov 0   ;;  %s1839_s0 = inlined_call_operand.vmem [shape: bf16[2048,72], index: 0, kind: input, shape index: {}]   ;;  %s1840_s1 = inlined_call_operand.vmem [shape: bf16[72,128], index: 1, kind: input, shape index: {}]   ;;  %s1841_s2 = inlined_call_operand.vmem [shape: f32[2048,128], index: 2, kind: output, shape index: {0}]   ;;  %s1842_s3 = inlined_call_operand.vmem [shape: f32[32,128], index: 3, kind: output, shape index: {1}]  }
   0x1 LB: > { %s1477_s13 = sadd.s32 4294967295, %s1449_s12   ;;  %p1198_p0 = scmp.ge.s32.totalorder %s1449_s12, 1  ;;  %s1449_s12 = sphi %s1471_s12, %s14_s12  }
   0x2   : > { %p141_p1 = scmp.lt.s32.totalorder %s1449_s12, 5 }
   0x4   : > { %p142_p2 = pnand %p1198_p0, %p141_p1 }
   0x5   : > { %v1406_v0 = vld [vmem:[%s1840_s1] sm:$0xff] (!%p142_p2)   ;;  %v1407_v1 = vld [vmem:[%s1840_s1 + $0x8] sm:$0xff] (!%p142_p2)   ;;  %s1199_s18 = sshll.u32 (!%p142_p2), %s1477_s13, 6  ;;  %v1408_v2 = vld [vmem:[%s1840_s1 + $0x10] sm:$0xff] (!%p142_p2)   ;;  %vm446_vm0 = vcmask (!%p142_p2), 588800   ;;  %vm543_vm1 = vcmask (!%p142_p2), 1043456  }
   0x6   : > { %145 = sbr.rel (%p142_p2) target bundleno = 384 (0x180), region = 28  ;;  %1312 = vmatprep.subr.bf16.mxu0 (!%p142_p2), %v1406_v0  ;;  %p170_p3 = scmp.lt.s32.totalorder (!%p142_p2), %s1199_s18, 255  ;;  %1386 = vmatprep.subr.bf16.mxu1 (!%p142_p2), %v1406_v0  ;;  %v1409_v3 = vld [vmem:[%s1840_s1 + $0x18] sm:$0xff] (!%p142_p2)   ;;  %v1410_v5 = vld [vmem:[%s1840_s1 + $0x20] ss:$0 sps:$4 sm:$0xff] (!%p142_p2)   ;;  %vm1102_vm2 = vcmask (!%p142_p2), 1040384  }
   0x7   : > { %1313 = vmatpush3.bf16.msra.mxu0 (!%p142_p2), %v1406_v0  ;;  %1391 = vmatpush3.bf16.msra.mxu1 (!%p142_p2), %v1406_v0  ;;  %v545_v6 = vsel (!%p142_p2), %vm543_vm1, %v1410_v5, 0  ;;  %p181_p4 = scmp.lt.s32.totalorder (!%p142_p2), %s1477_s13, 3  ;;  %vm1104_vm3 = vcmask (!%p142_p2), 1041408  }
   0x8   : > { %1314 = vmatprep.subr.bf16.mxu0 (!%p142_p2), %v1407_v1  ;;  %1387 = vmatprep.subr.bf16.mxu1 (!%p142_p2), %v1407_v1 }
   0xb   : > { %1315 = vmatpush3.bf16.msra.mxu0 (!%p142_p2), %v1407_v1  ;;  %1392 = vmatpush3.bf16.msra.mxu1 (!%p142_p2), %v1407_v1 }
   0xc   : > { %1316 = vmatprep.subr.bf16.mxu0 (!%p142_p2), %v1408_v2  ;;  %1388 = vmatprep.subr.bf16.mxu1 (!%p142_p2), %v1408_v2 }
   0xd   : > { %s1844_s18 = smov (!%p170_p3, %s1199_s18), 255  ;;  %s1846_s13 = smov (!%p181_p4, %s1477_s13), 3 }
   0xe   : > { %s1200_s21 = sshll.u32 %s1844_s18, 2  ;;  %s1202_s29 = sshll.u32 %s1844_s18, 3 }
   0xf   : > { %s1500_s26 = scalar_lea.vmem %s1839_s0, %s1200_s21  ;;  %1317 = vmatpush3.bf16.msra.mxu0 %v1408_v2  ;;  %1393 = vmatpush3.bf16.msra.mxu1 %v1408_v2  ;;  %s1573_s5 = scalar_lea.vmem %s1841_s2, %s1202_s29 }
  0x10   : > { %v1411_v4 = vld [vmem:[%s1500_s26] sm:$0xff]   ;;  %1318 = vmatprep.subr.bf16.mxu0 %v1409_v3  ;;  %1389 = vmatprep.subr.bf16.mxu1 %v1409_v3  ;;  %v1412_v7 = vld [vmem:[%s1500_s26 + $0x8] sm:$0xff]   ;;  %v1413_v8 = vld [vmem:[%s1500_s26 + $0x10] sm:$0xff]   ;;  %s1203_s6 = sshll.u32 %s1846_s13, 3 }
  0x11   : > { %1322 = vmatprep.mubr.msk.bf16.mxu0 %vm446_vm0, %v1411_v4  ;;  %v1414_v9 = vld [vmem:[%s1500_s26 + $0x18] sm:$0xff]   ;;  %v1427_v10 = vld [vmem:[%s1500_s26 + $0x80] sm:$0xff]   ;;  %v1428_v11 = vld [vmem:[%s1500_s26 + $0x88] sm:$0xff]   ;;  %s184_s9 = scalar_lea.vmem %s1842_s3, %s1203_s6 }
  0x12   : > { %1354 = vmatprep.mubr.msk.bf16.mxu1 %vm446_vm0, %v1427_v10  ;;  %v1429_v12 = vld [vmem:[%s1500_s26 + $0x90] sm:$0xff]   ;;  %v1415_v13 = vld [vmem:[%s1500_s26 + $0x20] sm:$0xff]   ;;  %v1430_v14 = vld [vmem:[%s1500_s26 + $0x98] sm:$0xff]  }
  0x13   : > { %1319 = vmatpush3.bf16.msra.mxu0 %v1409_v3  ;;  %1394 = vmatpush3.bf16.msra.mxu1 %v1409_v3  ;;  %v1431_v15 = vld [vmem:[%s1500_s26 + $0xa0] sm:$0xff]   ;;  %v1416_v16 = vld [vmem:[%s1500_s26 + $0x28] sm:$0xff]   ;;  %v1417_v17 = vld [vmem:[%s1500_s26 + $0x30] sm:$0xff]  }
  0x14   : > { %1396 = vmatprep.subr.msk.bf16.mxu0 %vm543_vm1, %v1410_v5  ;;  %1397 = vmatprep.subr.msk.bf16.mxu1 %vm543_vm1, %v1410_v5  ;;  %v1432_v18 = vld [vmem:[%s1500_s26 + $0xa8] sm:$0xff]   ;;  %v1433_v19 = vld [vmem:[%s1500_s26 + $0xb0] sm:$0xff]   ;;  %v1418_v20 = vld [vmem:[%s1500_s26 + $0x38] sm:$0xff]  }
  0x15   : > { %v1419_v21 = vld [vmem:[%s1500_s26 + $0x40] sm:$0xff]   ;;  %v1434_v22 = vld [vmem:[%s1500_s26 + $0xb8] sm:$0xff]   ;;  %v1420_v24 = vld [vmem:[%s1500_s26 + $0x48] sm:$0xff]  }
  0x16   : > { %v1435_v23 = vld [vmem:[%s1500_s26 + $0xc0] sm:$0xff]   ;;  %v1421_v25 = vld [vmem:[%s1500_s26 + $0x50] sm:$0xff]   ;;  %v1436_v26 = vld [vmem:[%s1500_s26 + $0xc8] sm:$0xff]  }
  0x17   : > { %1321 = vmatpush3.bf16.msra.mxu0 %v545_v6  ;;  %1395 = vmatpush3.bf16.msra.mxu1 %v545_v6  ;;  %v1437_v27 = vld [vmem:[%s1500_s26 + $0xd0] sm:$0xff]   ;;  %v1422_v28 = vld [vmem:[%s1500_s26 + $0x58] sm:$0xff]   ;;  %v1423_v29 = vld [vmem:[%s1500_s26 + $0x60] sm:$0xff]  }
  0x18   : > { %v1438_v30 = vld [vmem:[%s1500_s26 + $0xd8] sm:$0xff]   ;;  %v1439_v31 = vld [vmem:[%s1500_s26 + $0xe0] sm:$0xff]   ;;  %v1424_v32 = vld [vmem:[%s1500_s26 + $0x68] sm:$0xff]  }
  0x19   : > { %v1425_v33 = vld [vmem:[%s1500_s26 + $0x70] sm:$0xff]   ;;  %v1440_v34 = vld [vmem:[%s1500_s26 + $0xe8] sm:$0xff]   ;;  %v1426_v36 = vld [vmem:[%s1500_s26 + $0x78] sm:$0xff]  }
  0x1a   : > { %1323 = vmatmul.mubr.msk.bf16.vlgmr.msra.gmra.mrb[0].mxu0 %vm446_vm0, %v1412_v7  ;;  %1355 = vmatmul.mubr.msk.bf16.vlgmr.msra.gmra.mrb[0].mxu1 %vm446_vm0, %v1428_v11  ;;  %v1441_v35 = vld [vmem:[%s1500_s26 + $0xf0] sm:$0xff]   ;;  %v1442_v37 = vld [vmem:[%s1500_s26 + $0xf8] sm:$0xff]  }
  0x1b   : > { %1326 = vmatprep.mubr.msk.bf16.mxu0 %vm446_vm0, %v1413_v8  ;;  %1358 = vmatprep.mubr.msk.bf16.mxu1 %vm446_vm0, %v1429_v12 }
  0x22   : > { %1327 = vmatmul.mubr.msk.bf16.gmra.mrb[4].mxu0 %vm446_vm0, %v1414_v9  ;;  %1359 = vmatmul.mubr.msk.bf16.gmra.mrb[4].mxu1 %vm446_vm0, %v1430_v14 }
  0x23   : > { %1330 = vmatprep.mubr.msk.bf16.mxu0 %vm446_vm0, %v1415_v13  ;;  %1362 = vmatprep.mubr.msk.bf16.mxu1 %vm446_vm0, %v1431_v15 }
  0x2a   : > { %1331 = vmatmul.mubr.msk.bf16.gmra.mrb[8].mxu0 %vm446_vm0, %v1416_v16  ;;  %1363 = vmatmul.mubr.msk.bf16.gmra.mrb[8].mxu1 %vm446_vm0, %v1432_v18 }
  0x2b   : > { %1334 = vmatprep.mubr.msk.bf16.mxu0 %vm446_vm0, %v1417_v17  ;;  %1366 = vmatprep.mubr.msk.bf16.mxu1 %vm446_vm0, %v1433_v19 }
  0x32   : > { %1335 = vmatmul.mubr.msk.bf16.gmra.mrb[12].mxu0 %vm446_vm0, %v1418_v20  ;;  %1367 = vmatmul.mubr.msk.bf16.gmra.mrb[12].mxu1 %vm446_vm0, %v1434_v22 }
  0x33   : > { %1338 = vmatprep.mubr.msk.bf16.mxu0 %vm446_vm0, %v1419_v21  ;;  %1370 = vmatprep.mubr.msk.bf16.mxu1 %vm446_vm0, %v1435_v23 }
  0x3a   : > { %1339 = vmatmul.mubr.msk.bf16.gmra.mrb[16].mxu0 %vm446_vm0, %v1420_v24  ;;  %1371 = vmatmul.mubr.msk.bf16.gmra.mrb[16].mxu1 %vm446_vm0, %v1436_v26 }
  0x3b   : > { %1342 = vmatprep.mubr.msk.bf16.mxu0 %vm446_vm0, %v1421_v25  ;;  %1374 = vmatprep.mubr.msk.bf16.mxu1 %vm446_vm0, %v1437_v27 }
  0x42   : > { %1343 = vmatmul.mubr.msk.bf16.gmra.mrb[20].mxu0 %vm446_vm0, %v1422_v28  ;;  %1375 = vmatmul.mubr.msk.bf16.gmra.mrb[20].mxu1 %vm446_vm0, %v1438_v30 }
  0x43   : > { %1346 = vmatprep.mubr.msk.bf16.mxu0 %vm446_vm0, %v1423_v29  ;;  %1378 = vmatprep.mubr.msk.bf16.mxu1 %vm446_vm0, %v1439_v31 }
  0x4a   : > { %1347 = vmatmul.mubr.msk.bf16.gmra.mrb[24].mxu0 %vm446_vm0, %v1424_v32  ;;  %1379 = vmatmul.mubr.msk.bf16.gmra.mrb[24].mxu1 %vm446_vm0, %v1440_v34 }
  0x4b   : > { %1350 = vmatprep.mubr.msk.bf16.mxu0 %vm446_vm0, %v1425_v33  ;;  %1382 = vmatprep.mubr.msk.bf16.mxu1 %vm446_vm0, %v1441_v35 }
  0x52   : > { %1351 = vmatmul.mubr.msk.bf16.gmra.mrb[28].mxu0 %vm446_vm0, %v1426_v36  ;;  %1383 = vmatmul.mubr.msk.bf16.gmra.mrb[28].mxu1 %vm446_vm0, %v1442_v37 }
  0xed   : > { %v1324_v38 = vpop.f32.mrb[0].mxu0  ;;  %v1579_v45 = vpop.f32.mrb[0].mxu1 }
  0xee   : > { %838 = vst [vmem:[%s1573_s5 + $0x10] sm:$0xff] %v1324_v38  ;;  %v581_v39 = vpop.f32.mrb[1].mxu0  ;;  %v971_v46 = vmul.f32 %v1324_v38, %v1324_v38  ;;  %870 = vst [vmem:[%s1573_s5 + $0x110] sm:$0xff] %v1579_v45  ;;  %v1583_v49 = vpop.f32.mrb[1].mxu1 }
  0xef   : > { %836 = vst [vmem:[%s1573_s5] sm:$0xff] %v581_v39  ;;  %v1325_v40 = vpop.f32.mrb[2].mxu0  ;;  %v969_v42 = vmul.f32 %v581_v39, %v581_v39  ;;  %868 = vst [vmem:[%s1573_s5 + $0x100] sm:$0xff] %v1583_v49  ;;  %v1587_v50 = vpop.f32.mrb[2].mxu1 }
  0xf0   : > { %839 = vst [vmem:[%s1573_s5 + $0x18] sm:$0xff] %v1325_v40  ;;  %v584_v41 = vpop.f32.mrb[3].mxu0  ;;  %v972_v51 = vmul.f32 %v1325_v40, %v1325_v40  ;;  %871 = vst [vmem:[%s1573_s5 + $0x118] sm:$0xff] %v1587_v50  ;;  %v1591_v55 = vpop.f32.mrb[3].mxu1 }
  0xf1   : > { %837 = vst [vmem:[%s1573_s5 + $0x8] sm:$0xff] %v584_v41  ;;  %v900_v43 = vadd.f32 %v584_v41, %v581_v39  ;;  %v970_v44 = vmul.f32 %v584_v41, %v584_v41  ;;  %869 = vst [vmem:[%s1573_s5 + $0x108] sm:$0xff] %v1591_v55 }
  0xf3   : > { %v901_v47 = vadd.f32 %v1324_v38, %v900_v43  ;;  %v1033_v48 = vadd.f32 %v970_v44, %v969_v42 }
  0xf5   : > { %v1034_v52 = vadd.f32 %v1033_v48, %v971_v46  ;;  %v1328_v53 = vpop.f32.mrb[4].mxu0  ;;  %v902_v54 = vadd.f32 %v1325_v40, %v901_v47  ;;  %v1599_v1 = vpop.f32.mrb[4].mxu1 }
  0xf6   : > { %842 = vst [vmem:[%s1573_s5 + $0x30] sm:$0xff] %v1328_v53  ;;  %v597_v56 = vpop.f32.mrb[5].mxu0  ;;  %v975_v2 = vmul.f32 %v1328_v53, %v1328_v53  ;;  %874 = vst [vmem:[%s1573_s5 + $0x130] sm:$0xff] %v1599_v1  ;;  %v1603_v5 = vpop.f32.mrb[5].mxu1 }
  0xf7   : > { %840 = vst [vmem:[%s1573_s5 + $0x20] sm:$0xff] %v597_v56  ;;  %v903_v57 = vadd.f32 %v902_v54, %v597_v56  ;;  %v973_v58 = vmul.f32 %v597_v56, %v597_v56  ;;  %v1035_v59 = vadd.f32 %v1034_v52, %v972_v51  ;;  %v1329_v60 = vpop.f32.mrb[6].mxu0  ;;  %872 = vst [vmem:[%s1573_s5 + $0x120] sm:$0xff] %v1603_v5  ;;  %v1607_v6 = vpop.f32.mrb[6].mxu1 }
  0xf8   : > { %843 = vst [vmem:[%s1573_s5 + $0x38] sm:$0xff] %v1329_v60  ;;  %v600_v61 = vpop.f32.mrb[7].mxu0  ;;  %v976_v7 = vmul.f32 %v1329_v60, %v1329_v60  ;;  %875 = vst [vmem:[%s1573_s5 + $0x138] sm:$0xff] %v1607_v6  ;;  %v1611_v11 = vpop.f32.mrb[7].mxu1 }
  0xf9   : > { %v1036_v62 = vadd.f32 %v1035_v59, %v973_v58  ;;  %841 = vst [vmem:[%s1573_s5 + $0x28] sm:$0xff] %v600_v61  ;;  %v904_v63 = vadd.f32 %v903_v57, %v600_v61  ;;  %v974_v0 = vmul.f32 %v600_v61, %v600_v61  ;;  %873 = vst [vmem:[%s1573_s5 + $0x128] sm:$0xff] %v1611_v11 }
  0xfb   : > { %v905_v3 = vadd.f32 %v1328_v53, %v904_v63  ;;  %v1037_v4 = vadd.f32 %v1036_v62, %v974_v0 }
  0xfd   : > { %v1038_v8 = vadd.f32 %v1037_v4, %v975_v2  ;;  %v1332_v9 = vpop.f32.mrb[8].mxu0  ;;  %v906_v10 = vadd.f32 %v1329_v60, %v905_v3  ;;  %v1619_v21 = vpop.f32.mrb[8].mxu1 }
  0xfe   : > { %846 = vst [vmem:[%s1573_s5 + $0x50] sm:$0xff] %v1332_v9  ;;  %v613_v12 = vpop.f32.mrb[9].mxu0  ;;  %v979_v22 = vmul.f32 %v1332_v9, %v1332_v9  ;;  %878 = vst [vmem:[%s1573_s5 + $0x150] sm:$0xff] %v1619_v21  ;;  %v1623_v25 = vpop.f32.mrb[9].mxu1 }
  0xff   : > { %844 = vst [vmem:[%s1573_s5 + $0x40] sm:$0xff] %v613_v12  ;;  %v907_v13 = vadd.f32 %v906_v10, %v613_v12  ;;  %v977_v14 = vmul.f32 %v613_v12, %v613_v12  ;;  %v1039_v15 = vadd.f32 %v1038_v8, %v976_v7  ;;  %v1333_v16 = vpop.f32.mrb[10].mxu0  ;;  %876 = vst [vmem:[%s1573_s5 + $0x140] sm:$0xff] %v1623_v25  ;;  %v1627_v26 = vpop.f32.mrb[10].mxu1 }
 0x100   : > { %847 = vst [vmem:[%s1573_s5 + $0x58] sm:$0xff] %v1333_v16  ;;  %v616_v17 = vpop.f32.mrb[11].mxu0  ;;  %v980_v27 = vmul.f32 %v1333_v16, %v1333_v16  ;;  %879 = vst [vmem:[%s1573_s5 + $0x158] sm:$0xff] %v1627_v26  ;;  %v1631_v31 = vpop.f32.mrb[11].mxu1 }
 0x101   : > { %v1040_v18 = vadd.f32 %v1039_v15, %v977_v14  ;;  %845 = vst [vmem:[%s1573_s5 + $0x48] sm:$0xff] %v616_v17  ;;  %v908_v19 = vadd.f32 %v907_v13, %v616_v17  ;;  %v978_v20 = vmul.f32 %v616_v17, %v616_v17  ;;  %877 = vst [vmem:[%s1573_s5 + $0x148] sm:$0xff] %v1631_v31 }
 0x103   : > { %v909_v23 = vadd.f32 %v1332_v9, %v908_v19  ;;  %v1041_v24 = vadd.f32 %v1040_v18, %v978_v20 }
 0x105   : > { %v1042_v28 = vadd.f32 %v1041_v24, %v979_v22  ;;  %v1336_v29 = vpop.f32.mrb[12].mxu0  ;;  %v910_v30 = vadd.f32 %v1333_v16, %v909_v23  ;;  %v1639_v41 = vpop.f32.mrb[12].mxu1 }
 0x106   : > { %850 = vst [vmem:[%s1573_s5 + $0x70] sm:$0xff] %v1336_v29  ;;  %v629_v32 = vpop.f32.mrb[13].mxu0  ;;  %v983_v42 = vmul.f32 %v1336_v29, %v1336_v29  ;;  %882 = vst [vmem:[%s1573_s5 + $0x170] sm:$0xff] %v1639_v41  ;;  %v1643_v46 = vpop.f32.mrb[13].mxu1 }
 0x107   : > { %848 = vst [vmem:[%s1573_s5 + $0x60] sm:$0xff] %v629_v32  ;;  %v911_v33 = vadd.f32 %v910_v30, %v629_v32  ;;  %v981_v34 = vmul.f32 %v629_v32, %v629_v32  ;;  %v1043_v35 = vadd.f32 %v1042_v28, %v980_v27  ;;  %v1337_v36 = vpop.f32.mrb[14].mxu0  ;;  %880 = vst [vmem:[%s1573_s5 + $0x160] sm:$0xff] %v1643_v46  ;;  %v1647_v47 = vpop.f32.mrb[14].mxu1 }
 0x108   : > { %851 = vst [vmem:[%s1573_s5 + $0x78] sm:$0xff] %v1337_v36  ;;  %v632_v37 = vpop.f32.mrb[15].mxu0  ;;  %v984_v48 = vmul.f32 %v1337_v36, %v1337_v36  ;;  %883 = vst [vmem:[%s1573_s5 + $0x178] sm:$0xff] %v1647_v47  ;;  %v1651_v54 = vpop.f32.mrb[15].mxu1 }
 0x109   : > { %v1044_v38 = vadd.f32 %v1043_v35, %v981_v34  ;;  %849 = vst [vmem:[%s1573_s5 + $0x68] sm:$0xff] %v632_v37  ;;  %v912_v39 = vadd.f32 %v911_v33, %v632_v37  ;;  %v982_v40 = vmul.f32 %v632_v37, %v632_v37  ;;  %881 = vst [vmem:[%s1573_s5 + $0x168] sm:$0xff] %v1651_v54 }
 0x10b   : > { %v913_v43 = vadd.f32 %v1336_v29, %v912_v39  ;;  %v1045_v44 = vadd.f32 %v1044_v38, %v982_v40 }
 0x10d   : > { %v1046_v51 = vadd.f32 %v1045_v44, %v983_v42  ;;  %v1340_v52 = vpop.f32.mrb[16].mxu0  ;;  %v914_v53 = vadd.f32 %v1337_v36, %v913_v43  ;;  %v1659_v2 = vpop.f32.mrb[16].mxu1 }
 0x10e   : > { %854 = vst [vmem:[%s1573_s5 + $0x90] sm:$0xff] %v1340_v52  ;;  %v645_v56 = vpop.f32.mrb[17].mxu0  ;;  %v987_v3 = vmul.f32 %v1340_v52, %v1340_v52  ;;  %886 = vst [vmem:[%s1573_s5 + $0x190] sm:$0xff] %v1659_v2  ;;  %v1663_v8 = vpop.f32.mrb[17].mxu1 }
 0x10f   : > { %852 = vst [vmem:[%s1573_s5 + $0x80] sm:$0xff] %v645_v56  ;;  %v915_v57 = vadd.f32 %v914_v53, %v645_v56  ;;  %v985_v58 = vmul.f32 %v645_v56, %v645_v56  ;;  %v1047_v59 = vadd.f32 %v1046_v51, %v984_v48  ;;  %v1341_v60 = vpop.f32.mrb[18].mxu0  ;;  %884 = vst [vmem:[%s1573_s5 + $0x180] sm:$0xff] %v1663_v8  ;;  %v1667_v9 = vpop.f32.mrb[18].mxu1 }
 0x110   : > { %855 = vst [vmem:[%s1573_s5 + $0x98] sm:$0xff] %v1341_v60  ;;  %v648_v61 = vpop.f32.mrb[19].mxu0  ;;  %v988_v10 = vmul.f32 %v1341_v60, %v1341_v60  ;;  %887 = vst [vmem:[%s1573_s5 + $0x198] sm:$0xff] %v1667_v9  ;;  %v1671_v15 = vpop.f32.mrb[19].mxu1 }
 0x111   : > { %v1048_v62 = vadd.f32 %v1047_v59, %v985_v58  ;;  %853 = vst [vmem:[%s1573_s5 + $0x88] sm:$0xff] %v648_v61  ;;  %v916_v63 = vadd.f32 %v915_v57, %v648_v61  ;;  %v986_v0 = vmul.f32 %v648_v61, %v648_v61  ;;  %885 = vst [vmem:[%s1573_s5 + $0x188] sm:$0xff] %v1671_v15 }
 0x113   : > { %v917_v4 = vadd.f32 %v1340_v52, %v916_v63  ;;  %v1049_v7 = vadd.f32 %v1048_v62, %v986_v0 }
 0x115   : > { %v1050_v12 = vadd.f32 %v1049_v7, %v987_v3  ;;  %v1344_v13 = vpop.f32.mrb[20].mxu0  ;;  %v918_v14 = vadd.f32 %v1341_v60, %v917_v4  ;;  %v1679_v28 = vpop.f32.mrb[20].mxu1 }
 0x116   : > { %858 = vst [vmem:[%s1573_s5 + $0xb0] sm:$0xff] %v1344_v13  ;;  %v661_v16 = vpop.f32.mrb[21].mxu0  ;;  %v991_v29 = vmul.f32 %v1344_v13, %v1344_v13  ;;  %890 = vst [vmem:[%s1573_s5 + $0x1b0] sm:$0xff] %v1679_v28  ;;  %v1683_v33 = vpop.f32.mrb[21].mxu1 }
 0x117   : > { %856 = vst [vmem:[%s1573_s5 + $0xa0] sm:$0xff] %v661_v16  ;;  %v919_v17 = vadd.f32 %v918_v14, %v661_v16  ;;  %v989_v18 = vmul.f32 %v661_v16, %v661_v16  ;;  %v1051_v19 = vadd.f32 %v1050_v12, %v988_v10  ;;  %v1345_v20 = vpop.f32.mrb[22].mxu0  ;;  %888 = vst [vmem:[%s1573_s5 + $0x1a0] sm:$0xff] %v1683_v33  ;;  %v1687_v34 = vpop.f32.mrb[22].mxu1 }
 0x118   : > { %859 = vst [vmem:[%s1573_s5 + $0xb8] sm:$0xff] %v1345_v20  ;;  %v664_v22 = vpop.f32.mrb[23].mxu0  ;;  %v992_v35 = vmul.f32 %v1345_v20, %v1345_v20  ;;  %891 = vst [vmem:[%s1573_s5 + $0x1b8] sm:$0xff] %v1687_v34  ;;  %v1691_v39 = vpop.f32.mrb[23].mxu1 }
 0x119   : > { %v1052_v23 = vadd.f32 %v1051_v19, %v989_v18  ;;  %857 = vst [vmem:[%s1573_s5 + $0xa8] sm:$0xff] %v664_v22  ;;  %v920_v24 = vadd.f32 %v919_v17, %v664_v22  ;;  %v990_v27 = vmul.f32 %v664_v22, %v664_v22  ;;  %889 = vst [vmem:[%s1573_s5 + $0x1a8] sm:$0xff] %v1691_v39 }
 0x11b   : > { %v921_v30 = vadd.f32 %v1344_v13, %v920_v24  ;;  %v1053_v32 = vadd.f32 %v1052_v23, %v990_v27 }
 0x11d   : > { %v1054_v36 = vadd.f32 %v1053_v32, %v991_v29  ;;  %v1348_v37 = vpop.f32.mrb[24].mxu0  ;;  %v922_v38 = vadd.f32 %v1345_v20, %v921_v30  ;;  %v1699_v57 = vpop.f32.mrb[24].mxu1 }
 0x11e   : > { %862 = vst [vmem:[%s1573_s5 + $0xd0] sm:$0xff] %v1348_v37  ;;  %v677_v40 = vpop.f32.mrb[25].mxu0  ;;  %v995_v58 = vmul.f32 %v1348_v37, %v1348_v37  ;;  %894 = vst [vmem:[%s1573_s5 + $0x1d0] sm:$0xff] %v1699_v57  ;;  %v1703_v61 = vpop.f32.mrb[25].mxu1 }
 0x11f   : > { %860 = vst [vmem:[%s1573_s5 + $0xc0] sm:$0xff] %v677_v40  ;;  %v923_v42 = vadd.f32 %v922_v38, %v677_v40  ;;  %v993_v43 = vmul.f32 %v677_v40, %v677_v40  ;;  %v1055_v44 = vadd.f32 %v1054_v36, %v992_v35  ;;  %v1349_v48 = vpop.f32.mrb[26].mxu0  ;;  %892 = vst [vmem:[%s1573_s5 + $0x1c0] sm:$0xff] %v1703_v61  ;;  %v1707_v62 = vpop.f32.mrb[26].mxu1 }
 0x120   : > { %863 = vst [vmem:[%s1573_s5 + $0xd8] sm:$0xff] %v1349_v48  ;;  %v680_v51 = vpop.f32.mrb[27].mxu0  ;;  %v996_v63 = vmul.f32 %v1349_v48, %v1349_v48  ;;  %895 = vst [vmem:[%s1573_s5 + $0x1d8] sm:$0xff] %v1707_v62  ;;  %v1711_v7 = vpop.f32.mrb[27].mxu1 }
 0x121   : > { %v1056_v52 = vadd.f32 %v1055_v44, %v993_v43  ;;  %861 = vst [vmem:[%s1573_s5 + $0xc8] sm:$0xff] %v680_v51  ;;  %v924_v53 = vadd.f32 %v923_v42, %v680_v51  ;;  %v994_v56 = vmul.f32 %v680_v51, %v680_v51  ;;  %893 = vst [vmem:[%s1573_s5 + $0x1c8] sm:$0xff] %v1711_v7 }
 0x122   : > { %v1003_v51 = vmul.f32 %v1579_v45, %v1579_v45 }
 0x123   : > { %v925_v59 = vadd.f32 %v1348_v37, %v924_v53  ;;  %v1057_v60 = vadd.f32 %v1056_v52, %v994_v56  ;;  %v1001_v37 = vmul.f32 %v1583_v49, %v1583_v49  ;;  %v1004_v56 = vmul.f32 %v1587_v50, %v1587_v50 }
 0x125   : > { %v1058_v0 = vadd.f32 %v1057_v60, %v995_v58  ;;  %v1352_v3 = vpop.f32.mrb[28].mxu0  ;;  %v926_v4 = vadd.f32 %v1349_v48, %v925_v59  ;;  %v1719_v22 = vpop.f32.mrb[28].mxu1  ;;  %v1002_v48 = vmul.f32 %v1591_v55, %v1591_v55 }
 0x126   : > { %866 = vst [vmem:[%s1573_s5 + $0xf0] sm:$0xff] %v1352_v3  ;;  %v693_v10 = vpop.f32.mrb[29].mxu0  ;;  %v999_v23 = vmul.f32 %v1352_v3, %v1352_v3  ;;  %898 = vst [vmem:[%s1573_s5 + $0x1f0] sm:$0xff] %v1719_v22  ;;  %v1723_v29 = vpop.f32.mrb[29].mxu1 }
 0x127   : > { %864 = vst [vmem:[%s1573_s5 + $0xe0] sm:$0xff] %v693_v10  ;;  %v927_v12 = vadd.f32 %v926_v4, %v693_v10  ;;  %v997_v13 = vmul.f32 %v693_v10, %v693_v10  ;;  %v1059_v14 = vadd.f32 %v1058_v0, %v996_v63  ;;  %v1353_v16 = vpop.f32.mrb[30].mxu0  ;;  %896 = vst [vmem:[%s1573_s5 + $0x1e0] sm:$0xff] %v1723_v29  ;;  %v1727_v30 = vpop.f32.mrb[30].mxu1 }
 0x128   : > { %867 = vst [vmem:[%s1573_s5 + $0xf8] sm:$0xff] %v1353_v16  ;;  %v696_v17 = vpop.f32.mrb[31].mxu0  ;;  %v1000_v32 = vmul.f32 %v1353_v16, %v1353_v16  ;;  %899 = vst [vmem:[%s1573_s5 + $0x1f8] sm:$0xff] %v1727_v30  ;;  %v1733_v38 = vpop.f32.mrb[31].mxu1 }
 0x129   : > { %v1060_v18 = vadd.f32 %v1059_v14, %v997_v13  ;;  %865 = vst [vmem:[%s1573_s5 + $0xe8] sm:$0xff] %v696_v17  ;;  %v928_v19 = vadd.f32 %v927_v12, %v696_v17  ;;  %v998_v20 = vmul.f32 %v696_v17, %v696_v17  ;;  %897 = vst [vmem:[%s1573_s5 + $0x1e8] sm:$0xff] %v1733_v38 }
 0x12b   : > { %v929_v24 = vadd.f32 %v1352_v3, %v928_v19  ;;  %v1061_v27 = vadd.f32 %v1060_v18, %v998_v20  ;;  %v1006_v3 = vmul.f32 %v1611_v11, %v1611_v11  ;;  %v1010_v18 = vmul.f32 %v1631_v31, %v1631_v31 }
 0x12d   : > { %v1062_v35 = vadd.f32 %v1061_v27, %v999_v23  ;;  %v930_v36 = vadd.f32 %v1353_v16, %v929_v24 }
 0x12f   : > { %v931_v40 = vadd.f32 %v930_v36, %v1583_v49  ;;  %v1063_v42 = vadd.f32 %v1062_v35, %v1000_v32  ;;  %v1005_v49 = vmul.f32 %v1603_v5, %v1603_v5  ;;  %v1014_v36 = vmul.f32 %v1651_v54, %v1651_v54 }
 0x131   : > { %v1064_v43 = vadd.f32 %v1063_v42, %v1001_v37  ;;  %v932_v44 = vadd.f32 %v931_v40, %v1591_v55 }
 0x133   : > { %v933_v52 = vadd.f32 %v1579_v45, %v932_v44  ;;  %v1065_v53 = vadd.f32 %v1064_v43, %v1002_v48  ;;  %v1007_v45 = vmul.f32 %v1599_v1, %v1599_v1 }
 0x135   : > { %v1066_v58 = vadd.f32 %v1065_v53, %v1003_v51  ;;  %v934_v59 = vadd.f32 %v1587_v50, %v933_v52  ;;  %v1008_v50 = vmul.f32 %v1607_v6, %v1607_v6  ;;  %v1018_v52 = vmul.f32 %v1671_v15, %v1671_v15 }
 0x137   : > { %v935_v60 = vadd.f32 %v934_v59, %v1603_v5  ;;  %v1067_v63 = vadd.f32 %v1066_v58, %v1004_v56  ;;  %v1009_v5 = vmul.f32 %v1623_v25, %v1623_v25 }
 0x139   : > { %v1068_v0 = vadd.f32 %v1067_v63, %v1005_v49  ;;  %v936_v55 = vadd.f32 %v935_v60, %v1611_v11 }
 0x13b   : > { %v937_v4 = vadd.f32 %v1599_v1, %v936_v55  ;;  %v1069_v10 = vadd.f32 %v1068_v0, %v1006_v3  ;;  %v1011_v1 = vmul.f32 %v1619_v21, %v1619_v21  ;;  %v1022_v0 = vmul.f32 %v1691_v39, %v1691_v39 }
 0x13d   : > { %v1070_v12 = vadd.f32 %v1069_v10, %v1007_v45  ;;  %v938_v13 = vadd.f32 %v1607_v6, %v937_v4  ;;  %v1012_v6 = vmul.f32 %v1627_v26, %v1627_v26 }
 0x13f   : > { %v939_v14 = vadd.f32 %v938_v13, %v1623_v25  ;;  %v1071_v16 = vadd.f32 %v1070_v12, %v1008_v50  ;;  %v1013_v25 = vmul.f32 %v1643_v46, %v1643_v46  ;;  %v1026_v13 = vmul.f32 %v1711_v7, %v1711_v7 }
 0x141   : > { %v1072_v17 = vadd.f32 %v1071_v16, %v1009_v5  ;;  %v940_v11 = vadd.f32 %v939_v14, %v1631_v31 }
 0x143   : > { %v941_v19 = vadd.f32 %v1619_v21, %v940_v11  ;;  %v1073_v20 = vadd.f32 %v1072_v17, %v1010_v18  ;;  %v1015_v21 = vmul.f32 %v1639_v41, %v1639_v41  ;;  %v1029_v17 = vmul.f32 %v1723_v29, %v1723_v29 }
 0x145   : > { %v1074_v23 = vadd.f32 %v1073_v20, %v1011_v1  ;;  %v942_v24 = vadd.f32 %v1627_v26, %v941_v19  ;;  %v1016_v26 = vmul.f32 %v1647_v47, %v1647_v47  ;;  %v1031_v19 = vmul.f32 %v1719_v22, %v1719_v22 }
 0x147   : > { %v943_v27 = vadd.f32 %v942_v24, %v1643_v46  ;;  %v1075_v32 = vadd.f32 %v1074_v23, %v1012_v6  ;;  %v1017_v46 = vmul.f32 %v1663_v8, %v1663_v8 }
 0x149   : > { %v1076_v35 = vadd.f32 %v1075_v32, %v1013_v25  ;;  %v944_v31 = vadd.f32 %v943_v27, %v1651_v54 }
 0x14b   : > { %v945_v37 = vadd.f32 %v1639_v41, %v944_v31  ;;  %v1077_v40 = vadd.f32 %v1076_v35, %v1014_v36  ;;  %v1019_v41 = vmul.f32 %v1659_v2, %v1659_v2 }
 0x14d   : > { %v1078_v42 = vadd.f32 %v1077_v40, %v1015_v21  ;;  %v946_v43 = vadd.f32 %v1647_v47, %v945_v37  ;;  %v1020_v47 = vmul.f32 %v1667_v9, %v1667_v9 }
 0x14f   : > { %v947_v44 = vadd.f32 %v946_v43, %v1663_v8  ;;  %v1079_v48 = vadd.f32 %v1078_v42, %v1016_v26  ;;  %v1021_v8 = vmul.f32 %v1683_v33, %v1683_v33 }
 0x151   : > { %v1080_v51 = vadd.f32 %v1079_v48, %v1017_v46  ;;  %v948_v54 = vadd.f32 %v947_v44, %v1671_v15 }
 0x153   : > { %v949_v53 = vadd.f32 %v1659_v2, %v948_v54  ;;  %v1081_v56 = vadd.f32 %v1080_v51, %v1018_v52  ;;  %v1023_v2 = vmul.f32 %v1679_v28, %v1679_v28 }
 0x155   : > { %v1082_v58 = vadd.f32 %v1081_v56, %v1019_v41  ;;  %v950_v59 = vadd.f32 %v1667_v9, %v949_v53  ;;  %v1024_v9 = vmul.f32 %v1687_v34, %v1687_v34 }
 0x157   : > { %v951_v49 = vadd.f32 %v950_v59, %v1683_v33  ;;  %v1083_v60 = vadd.f32 %v1082_v58, %v1020_v47  ;;  %v1025_v33 = vmul.f32 %v1703_v61, %v1703_v61 }
 0x159   : > { %v1084_v63 = vadd.f32 %v1083_v60, %v1021_v8  ;;  %v952_v15 = vadd.f32 %v951_v49, %v1691_v39 }
 0x15b   : > { %v953_v55 = vadd.f32 %v1679_v28, %v952_v15  ;;  %v1085_v3 = vadd.f32 %v1084_v63, %v1022_v0  ;;  %v1027_v28 = vmul.f32 %v1699_v57, %v1699_v57 }
 0x15d   : > { %v1086_v45 = vadd.f32 %v1085_v3, %v1023_v2  ;;  %v954_v4 = vadd.f32 %v1687_v34, %v953_v55  ;;  %v1028_v34 = vmul.f32 %v1707_v62, %v1707_v62 }
 0x15f   : > { %v955_v10 = vadd.f32 %v954_v4, %v1703_v61  ;;  %v1087_v50 = vadd.f32 %v1086_v45, %v1024_v9 }
 0x161   : > { %v1088_v12 = vadd.f32 %v1087_v50, %v1025_v33  ;;  %v956_v39 = vadd.f32 %v955_v10, %v1711_v7 }
 0x163   : > { %v957_v5 = vadd.f32 %v1699_v57, %v956_v39  ;;  %v1089_v14 = vadd.f32 %v1088_v12, %v1026_v13  ;;  %v1030_v57 = vmul.f32 %v1733_v38, %v1733_v38 }
 0x165   : > { %v1090_v16 = vadd.f32 %v1089_v14, %v1027_v28  ;;  %v958_v61 = vadd.f32 %v1707_v62, %v957_v5  ;;  %v1032_v62 = vmul.f32 %v1727_v30, %v1727_v30 }
 0x167   : > { %v959_v11 = vadd.f32 %v958_v61, %v1723_v29  ;;  %v1091_v18 = vadd.f32 %v1090_v16, %v1028_v34 }
 0x169   : > { %v1092_v7 = vadd.f32 %v1091_v18, %v1029_v17  ;;  %v960_v1 = vadd.f32 %v959_v11, %v1733_v38 }
 0x16b   : > { %v961_v20 = vadd.f32 %v1719_v22, %v960_v1  ;;  %v1093_v6 = vadd.f32 %v1092_v7, %v1030_v57 }
 0x16d   : > { %v962_v23 = vadd.f32 %v1727_v30, %v961_v20  ;;  %v1094_v29 = vadd.f32 %v1093_v6, %v1031_v19 }
 0x16f   : > { %v963_v24 = vrot.slane %v962_v23, 4  ;;  %v1095_v25 = vadd.f32 %v1094_v29, %v1032_v62 }
 0x171   : > { %v964_v27 = vadd.f32 %v963_v24, %v962_v23  ;;  %v1096_v32 = vrot.slane %v1095_v25, 4 }
 0x173   : > { %v965_v35 = vrot.slane %v964_v27, 2  ;;  %v1097_v31 = vadd.f32 %v1096_v32, %v1095_v25 }
 0x175   : > { %v966_v38 = vadd.f32 %v965_v35, %v964_v27  ;;  %v1098_v36 = vrot.slane %v1097_v31, 2 }
 0x177   : > { %v967_v21 = vrot.slane %v966_v38, 1  ;;  %v1099_v37 = vadd.f32 %v1098_v36, %v1097_v31 }
 0x179   : > { %v1100_v22 = vrot.slane %v1099_v37, 1  ;;  %v968_v40 = vadd.f32 %v967_v21, %v966_v38 }
 0x17b   : > { %v1101_v26 = vadd.f32 %v1100_v22, %v1099_v37 }
 0x17d   : > { %v1103_v30 = vsel %vm1102_vm2, %v968_v40, %v1101_v26 }
 0x17e   : > { %v1105_v42 = vsel %vm1104_vm3, %v1103_v30, 0.0 }
 0x17f   : > { %1106 = vst [vmem:[%s184_s9] sm:$0xff] %v1105_v42 }
 0x180 PF: > { %s14_s12 = sadd.s32 1, %s1449_s12  }
 0x181   : > { %p11_p5 = scmp.ge.s32.totalorder %s14_s12, 6  }
 0x183   :  { %13 = sbr.rel (!%p11_p5) target bundleno = 1 (0x1), region = 70 }

// kernel: _lambda_.20
= control target key start
LH: loop header
LB: loop body
LE: loop exit
PB: predicated region body
PF: predicated region fallthrough
CT: control target
= control target key end

     0   :  { %s741_s12 = smov 0   ;;  %s1031_s0 = inlined_call_operand.vmem [shape: f32[2048,128], index: 0, kind: input, shape index: {}]   ;;  %s1032_s1 = inlined_call_operand.vmem [shape: f32[1,128], index: 1, kind: input, shape index: {}]   ;;  %s1033_s2 = inlined_call_operand.vmem [shape: f32[1,128], index: 2, kind: input, shape index: {}]   ;;  %s1034_s3 = inlined_call_operand.vmem [shape: f32[2048,128], index: 3, kind: output, shape index: {}]  }
   0x1 LB: > { %s692_s13 = sadd.s32 4294967295, %s719_s12   ;;  %p696_p0 = scmp.ge.s32.totalorder %s719_s12, 1  ;;  %s719_s12 = sphi %s741_s12, %s13_s12  }
   0x2   : > { %p138_p1 = scmp.lt.s32.totalorder %s719_s12, 5 }
   0x4   : > { %p139_p2 = pnand %p696_p0, %p138_p1 }
   0x5   : > { %s697_s14 = sshll.u32 (!%p139_p2), %s692_s13, 6  ;;  %v755_v0 = vld [vmem:[%s1032_s1] ss:$0 sm:$0xff] (!%p139_p2) }
   0x6   : > { %142 = sbr.rel (%p139_p2) target bundleno = 102 (0x66), region = 32  ;;  %p163_p3 = scmp.lt.s32.totalorder (!%p139_p2), %s697_s14, 255  ;;  %v765_v1 = vld [vmem:[%s1033_s2] ss:$0 sm:$0xff] (!%p139_p2) }
   0xd   : > { %s1036_s14 = smov (!%p163_p3, %s697_s14), 255 }
   0xe   : > { %s698_s15 = sshll.u32 %s1036_s14, 3 }
   0xf   : > { %s760_s20 = scalar_lea.vmem %s1031_s0, %s698_s15  ;;  %s793_s25 = scalar_lea.vmem %s1034_s3, %s698_s15 }
  0x10   : > { %v174_v2 = vld [vmem:[%s760_s20] sm:$0xff]  ;;  %v175_v3 = vld [vmem:[%s760_s20 + $0x8] sm:$0xff]  ;;  %v176_v4 = vld [vmem:[%s760_s20 + $0x10] sm:$0xff] }
  0x11   : > { %v245_v5 = vmul.f32 %v755_v0, %v174_v2  ;;  %v246_v6 = vmul.f32 %v755_v0, %v175_v3  ;;  %v247_v7 = vmul.f32 %v755_v0, %v176_v4  ;;  %v177_v8 = vld [vmem:[%s760_s20 + $0x18] sm:$0xff]  ;;  %v178_v9 = vld [vmem:[%s760_s20 + $0x20] sm:$0xff]  ;;  %v179_v10 = vld [vmem:[%s760_s20 + $0x28] sm:$0xff] }
  0x12   : > { %v248_v11 = vmul.f32 %v755_v0, %v177_v8  ;;  %v249_v12 = vmul.f32 %v755_v0, %v178_v9  ;;  %v250_v13 = vmul.f32 %v755_v0, %v179_v10  ;;  %v180_v14 = vld [vmem:[%s760_s20 + $0x30] sm:$0xff]  ;;  %v181_v15 = vld [vmem:[%s760_s20 + $0x38] sm:$0xff]  ;;  %v182_v24 = vld [vmem:[%s760_s20 + $0x40] sm:$0xff] }
  0x13   : > { %v316_v16 = vadd.f32 %v765_v1, %v245_v5  ;;  %v317_v17 = vadd.f32 %v765_v1, %v246_v6  ;;  %v318_v18 = vadd.f32 %v765_v1, %v247_v7  ;;  %v251_v19 = vmul.f32 %v755_v0, %v180_v14  ;;  %v183_v32 = vld [vmem:[%s760_s20 + $0x48] sm:$0xff]  ;;  %v184_v33 = vld [vmem:[%s760_s20 + $0x50] sm:$0xff]  ;;  %v185_v34 = vld [vmem:[%s760_s20 + $0x58] sm:$0xff] }
  0x14   : > { %v319_v20 = vadd.f32 %v765_v1, %v248_v11  ;;  %v320_v21 = vadd.f32 %v765_v1, %v249_v12  ;;  %v321_v22 = vadd.f32 %v765_v1, %v250_v13  ;;  %v252_v23 = vmul.f32 %v755_v0, %v181_v15  ;;  %v186_v46 = vld [vmem:[%s760_s20 + $0x60] sm:$0xff]  ;;  %v187_v47 = vld [vmem:[%s760_s20 + $0x68] sm:$0xff]  ;;  %v188_v58 = vld [vmem:[%s760_s20 + $0x70] sm:$0xff] }
  0x15   : > { %vm380_vm0 = vcmp.gt.f32.partialorder %v316_v16, 0.0  ;;  %v444_v25 = vmul.f32 0.2, %v316_v16  ;;  %vm381_vm1 = vcmp.gt.f32.partialorder %v317_v17, 0.0  ;;  %v445_v26 = vmul.f32 0.2, %v317_v17 }
  0x16   : > { %vm382_vm2 = vcmp.gt.f32.partialorder %v318_v18, 0.0  ;;  %v446_v27 = vmul.f32 0.2, %v318_v18  ;;  %vm383_vm3 = vcmp.gt.f32.partialorder %v319_v20, 0.0  ;;  %v447_v28 = vmul.f32 0.2, %v319_v20 }
  0x17   : > { %v508_v29 = vsel %vm380_vm0, %v316_v16, %v444_v25  ;;  %v509_v30 = vsel %vm381_vm1, %v317_v17, %v445_v26  ;;  %vm384_vm4 = vcmp.gt.f32.partialorder %v320_v21, 0.0  ;;  %v448_v31 = vmul.f32 0.2, %v320_v21  ;;  %v189_v59 = vld [vmem:[%s760_s20 + $0x78] sm:$0xff]  ;;  %v190_v6 = vld [vmem:[%s760_s20 + $0x80] sm:$0xff]  ;;  %v191_v7 = vld [vmem:[%s760_s20 + $0x88] sm:$0xff] }
  0x18   : > { %572 = vst [vmem:[%s793_s25] sm:$0xff] %v508_v29  ;;  %573 = vst [vmem:[%s793_s25 + $0x8] sm:$0xff] %v509_v30  ;;  %v510_v35 = vsel %vm382_vm2, %v318_v18, %v446_v27  ;;  %v511_v36 = vsel %vm383_vm3, %v319_v20, %v447_v28  ;;  %vm385_vm5 = vcmp.gt.f32.partialorder %v321_v22, 0.0  ;;  %v449_v37 = vmul.f32 0.2, %v321_v22  ;;  %v192_v12 = vld [vmem:[%s760_s20 + $0x90] sm:$0xff]  ;;  %v193_v13 = vld [vmem:[%s760_s20 + $0x98] sm:$0xff] }
  0x19   : > { %574 = vst [vmem:[%s793_s25 + $0x10] sm:$0xff] %v510_v35  ;;  %575 = vst [vmem:[%s793_s25 + $0x18] sm:$0xff] %v511_v36  ;;  %v512_v38 = vsel %vm384_vm4, %v320_v21, %v448_v31  ;;  %v322_v39 = vadd.f32 %v765_v1, %v251_v19  ;;  %v323_v40 = vadd.f32 %v765_v1, %v252_v23  ;;  %v195_v25 = vld [vmem:[%s760_s20 + $0xa8] sm:$0xff]  ;;  %v196_v36 = vld [vmem:[%s760_s20 + $0xb0] sm:$0xff] }
  0x1a   : > { %v253_v41 = vmul.f32 %v755_v0, %v182_v24  ;;  %576 = vst [vmem:[%s793_s25 + $0x20] sm:$0xff] %v512_v38  ;;  %v513_v42 = vsel %vm385_vm5, %v321_v22, %v449_v37  ;;  %v254_v43 = vmul.f32 %v755_v0, %v183_v32  ;;  %v255_v44 = vmul.f32 %v755_v0, %v184_v33  ;;  %v194_v24 = vld [vmem:[%s760_s20 + $0xa0] sm:$0xff]  ;;  %v197_v37 = vld [vmem:[%s760_s20 + $0xb8] sm:$0xff] }
  0x1b   : > { %v256_v45 = vmul.f32 %v755_v0, %v185_v34  ;;  %577 = vst [vmem:[%s793_s25 + $0x28] sm:$0xff] %v513_v42  ;;  %vm386_vm6 = vcmp.gt.f32.partialorder %v322_v39, 0.0  ;;  %v450_v48 = vmul.f32 0.2, %v322_v39  ;;  %vm387_vm7 = vcmp.gt.f32.partialorder %v323_v40, 0.0 }
  0x1c   : > { %v451_v49 = vmul.f32 0.2, %v323_v40  ;;  %v324_v50 = vadd.f32 %v765_v1, %v253_v41  ;;  %v325_v51 = vadd.f32 %v765_v1, %v254_v43  ;;  %v326_v52 = vadd.f32 %v765_v1, %v255_v44 }
  0x1d   : > { %v327_v53 = vadd.f32 %v765_v1, %v256_v45  ;;  %v514_v54 = vsel %vm386_vm6, %v322_v39, %v450_v48  ;;  %v257_v56 = vmul.f32 %v755_v0, %v186_v46  ;;  %v258_v57 = vmul.f32 %v755_v0, %v187_v47  ;;  %v198_v46 = vld [vmem:[%s760_s20 + $0xc0] sm:$0xff]  ;;  %v199_v47 = vld [vmem:[%s760_s20 + $0xc8] sm:$0xff] }
  0x1e   : > { %v515_v55 = vsel %vm387_vm7, %v323_v40, %v451_v49  ;;  %578 = vst [vmem:[%s793_s25 + $0x30] sm:$0xff] %v514_v54  ;;  %vm388_vm8 = vcmp.gt.f32.partialorder %v324_v50, 0.0  ;;  %v452_v60 = vmul.f32 0.2, %v324_v50  ;;  %vm389_vm9 = vcmp.gt.f32.partialorder %v325_v51, 0.0 }
  0x1f   : > { %579 = vst [vmem:[%s793_s25 + $0x38] sm:$0xff] %v515_v55  ;;  %v453_v61 = vmul.f32 0.2, %v325_v51  ;;  %vm390_vm10 = vcmp.gt.f32.partialorder %v326_v52, 0.0  ;;  %v454_v62 = vmul.f32 0.2, %v326_v52  ;;  %v328_v4 = vadd.f32 %v765_v1, %v257_v56 }
  0x20   : > { %vm391_vm11 = vcmp.gt.f32.partialorder %v327_v53, 0.0  ;;  %v455_v63 = vmul.f32 0.2, %v327_v53  ;;  %v516_v2 = vsel %vm388_vm8, %v324_v50, %v452_v60  ;;  %v329_v5 = vadd.f32 %v765_v1, %v258_v57 }
  0x21   : > { %v517_v3 = vsel %vm389_vm9, %v325_v51, %v453_v61  ;;  %580 = vst [vmem:[%s793_s25 + $0x40] sm:$0xff] %v516_v2  ;;  %v518_v8 = vsel %vm390_vm10, %v326_v52, %v454_v62  ;;  %v259_v10 = vmul.f32 %v755_v0, %v188_v58  ;;  %v260_v11 = vmul.f32 %v755_v0, %v189_v59  ;;  %v200_v52 = vld [vmem:[%s760_s20 + $0xd0] sm:$0xff]  ;;  %v202_v2 = vld [vmem:[%s760_s20 + $0xe0] sm:$0xff] }
  0x22   : > { %581 = vst [vmem:[%s793_s25 + $0x48] sm:$0xff] %v517_v3  ;;  %v519_v9 = vsel %vm391_vm11, %v327_v53, %v455_v63  ;;  %582 = vst [vmem:[%s793_s25 + $0x50] sm:$0xff] %v518_v8  ;;  %vm392_vm12 = vcmp.gt.f32.partialorder %v328_v4, 0.0  ;;  %v456_v14 = vmul.f32 0.2, %v328_v4  ;;  %vm393_vm13 = vcmp.gt.f32.partialorder %v329_v5, 0.0 }
  0x23   : > { %583 = vst [vmem:[%s793_s25 + $0x58] sm:$0xff] %v519_v9  ;;  %v457_v15 = vmul.f32 0.2, %v329_v5  ;;  %v330_v16 = vadd.f32 %v765_v1, %v259_v10  ;;  %v331_v17 = vadd.f32 %v765_v1, %v260_v11  ;;  %v261_v18 = vmul.f32 %v755_v0, %v190_v6  ;;  %v201_v53 = vld [vmem:[%s760_s20 + $0xd8] sm:$0xff]  ;;  %v203_v3 = vld [vmem:[%s760_s20 + $0xe8] sm:$0xff] }
  0x24   : > { %v262_v19 = vmul.f32 %v755_v0, %v191_v7  ;;  %v520_v20 = vsel %vm392_vm12, %v328_v4, %v456_v14  ;;  %v263_v22 = vmul.f32 %v755_v0, %v192_v12  ;;  %v264_v23 = vmul.f32 %v755_v0, %v193_v13  ;;  %v204_v14 = vld [vmem:[%s760_s20 + $0xf0] sm:$0xff] }
  0x25   : > { %v521_v21 = vsel %vm393_vm13, %v329_v5, %v457_v15  ;;  %584 = vst [vmem:[%s793_s25 + $0x60] sm:$0xff] %v520_v20  ;;  %vm394_vm14 = vcmp.gt.f32.partialorder %v330_v16, 0.0  ;;  %v458_v26 = vmul.f32 0.2, %v330_v16  ;;  %vm395_vm15 = vcmp.gt.f32.partialorder %v331_v17, 0.0  ;;  %v205_v15 = vld [vmem:[%s760_s20 + $0xf8] sm:$0xff] }
  0x26   : > { %585 = vst [vmem:[%s793_s25 + $0x68] sm:$0xff] %v521_v21  ;;  %v459_v27 = vmul.f32 0.2, %v331_v17  ;;  %v332_v28 = vadd.f32 %v765_v1, %v261_v18  ;;  %v333_v29 = vadd.f32 %v765_v1, %v262_v19  ;;  %v334_v30 = vadd.f32 %v765_v1, %v263_v22 }
  0x27   : > { %v335_v31 = vadd.f32 %v765_v1, %v264_v23  ;;  %v522_v32 = vsel %vm394_vm14, %v330_v16, %v458_v26  ;;  %v265_v34 = vmul.f32 %v755_v0, %v194_v24  ;;  %v266_v35 = vmul.f32 %v755_v0, %v195_v25  ;;  %v206_v24 = vld [vmem:[%s760_s20 + $0x100] sm:$0xff]  ;;  %v207_v25 = vld [vmem:[%s760_s20 + $0x108] sm:$0xff] }
  0x28   : > { %v523_v33 = vsel %vm395_vm15, %v331_v17, %v459_v27  ;;  %586 = vst [vmem:[%s793_s25 + $0x70] sm:$0xff] %v522_v32  ;;  %vm396_vm0 = vcmp.gt.f32.partialorder %v332_v28, 0.0  ;;  %v460_v38 = vmul.f32 0.2, %v332_v28  ;;  %vm397_vm1 = vcmp.gt.f32.partialorder %v333_v29, 0.0 }
  0x29   : > { %587 = vst [vmem:[%s793_s25 + $0x78] sm:$0xff] %v523_v33  ;;  %v461_v39 = vmul.f32 0.2, %v333_v29  ;;  %vm398_vm2 = vcmp.gt.f32.partialorder %v334_v30, 0.0  ;;  %v462_v40 = vmul.f32 0.2, %v334_v30  ;;  %v336_v44 = vadd.f32 %v765_v1, %v265_v34 }
  0x2a   : > { %vm399_vm3 = vcmp.gt.f32.partialorder %v335_v31, 0.0  ;;  %v463_v41 = vmul.f32 0.2, %v335_v31  ;;  %v524_v42 = vsel %vm396_vm0, %v332_v28, %v460_v38  ;;  %v337_v45 = vadd.f32 %v765_v1, %v266_v35 }
  0x2b   : > { %v525_v43 = vsel %vm397_vm1, %v333_v29, %v461_v39  ;;  %588 = vst [vmem:[%s793_s25 + $0x80] sm:$0xff] %v524_v42  ;;  %v526_v48 = vsel %vm398_vm2, %v334_v30, %v462_v40  ;;  %v267_v50 = vmul.f32 %v755_v0, %v196_v36  ;;  %v268_v51 = vmul.f32 %v755_v0, %v197_v37  ;;  %v208_v30 = vld [vmem:[%s760_s20 + $0x110] sm:$0xff]  ;;  %v210_v42 = vld [vmem:[%s760_s20 + $0x120] sm:$0xff] }
  0x2c   : > { %589 = vst [vmem:[%s793_s25 + $0x88] sm:$0xff] %v525_v43  ;;  %v527_v49 = vsel %vm399_vm3, %v335_v31, %v463_v41  ;;  %590 = vst [vmem:[%s793_s25 + $0x90] sm:$0xff] %v526_v48  ;;  %vm400_vm4 = vcmp.gt.f32.partialorder %v336_v44, 0.0  ;;  %v464_v54 = vmul.f32 0.2, %v336_v44  ;;  %vm401_vm5 = vcmp.gt.f32.partialorder %v337_v45, 0.0 }
  0x2d   : > { %591 = vst [vmem:[%s793_s25 + $0x98] sm:$0xff] %v527_v49  ;;  %v465_v55 = vmul.f32 0.2, %v337_v45  ;;  %v338_v56 = vadd.f32 %v765_v1, %v267_v50  ;;  %v339_v57 = vadd.f32 %v765_v1, %v268_v51  ;;  %v269_v58 = vmul.f32 %v755_v0, %v198_v46  ;;  %v209_v31 = vld [vmem:[%s760_s20 + $0x118] sm:$0xff]  ;;  %v211_v43 = vld [vmem:[%s760_s20 + $0x128] sm:$0xff] }
  0x2e   : > { %v270_v59 = vmul.f32 %v755_v0, %v199_v47  ;;  %v528_v60 = vsel %vm400_vm4, %v336_v44, %v464_v54  ;;  %v271_v62 = vmul.f32 %v755_v0, %v200_v52  ;;  %v272_v63 = vmul.f32 %v755_v0, %v201_v53  ;;  %v212_v54 = vld [vmem:[%s760_s20 + $0x130] sm:$0xff] }
  0x2f   : > { %v529_v61 = vsel %vm401_vm5, %v337_v45, %v465_v55  ;;  %592 = vst [vmem:[%s793_s25 + $0xa0] sm:$0xff] %v528_v60  ;;  %vm402_vm6 = vcmp.gt.f32.partialorder %v338_v56, 0.0  ;;  %v466_v4 = vmul.f32 0.2, %v338_v56  ;;  %vm403_vm7 = vcmp.gt.f32.partialorder %v339_v57, 0.0  ;;  %v213_v55 = vld [vmem:[%s760_s20 + $0x138] sm:$0xff] }
  0x30   : > { %593 = vst [vmem:[%s793_s25 + $0xa8] sm:$0xff] %v529_v61  ;;  %v467_v5 = vmul.f32 0.2, %v339_v57  ;;  %v340_v6 = vadd.f32 %v765_v1, %v269_v58  ;;  %v341_v7 = vadd.f32 %v765_v1, %v270_v59  ;;  %v342_v8 = vadd.f32 %v765_v1, %v271_v62 }
  0x31   : > { %v343_v9 = vadd.f32 %v765_v1, %v272_v63  ;;  %v530_v10 = vsel %vm402_vm6, %v338_v56, %v466_v4  ;;  %v273_v12 = vmul.f32 %v755_v0, %v202_v2  ;;  %v274_v13 = vmul.f32 %v755_v0, %v203_v3  ;;  %v214_v2 = vld [vmem:[%s760_s20 + $0x140] sm:$0xff]  ;;  %v215_v3 = vld [vmem:[%s760_s20 + $0x148] sm:$0xff] }
  0x32   : > { %v531_v11 = vsel %vm403_vm7, %v339_v57, %v467_v5  ;;  %594 = vst [vmem:[%s793_s25 + $0xb0] sm:$0xff] %v530_v10  ;;  %vm404_vm8 = vcmp.gt.f32.partialorder %v340_v6, 0.0  ;;  %v468_v16 = vmul.f32 0.2, %v340_v6  ;;  %vm405_vm9 = vcmp.gt.f32.partialorder %v341_v7, 0.0 }
  0x33   : > { %595 = vst [vmem:[%s793_s25 + $0xb8] sm:$0xff] %v531_v11  ;;  %v469_v17 = vmul.f32 0.2, %v341_v7  ;;  %vm406_vm10 = vcmp.gt.f32.partialorder %v342_v8, 0.0  ;;  %v470_v18 = vmul.f32 0.2, %v342_v8  ;;  %v344_v22 = vadd.f32 %v765_v1, %v273_v12 }
  0x34   : > { %vm407_vm11 = vcmp.gt.f32.partialorder %v343_v9, 0.0  ;;  %v471_v19 = vmul.f32 0.2, %v343_v9  ;;  %v532_v20 = vsel %vm404_vm8, %v340_v6, %v468_v16  ;;  %v345_v23 = vadd.f32 %v765_v1, %v274_v13 }
  0x35   : > { %v533_v21 = vsel %vm405_vm9, %v341_v7, %v469_v17  ;;  %596 = vst [vmem:[%s793_s25 + $0xc0] sm:$0xff] %v532_v20  ;;  %v534_v26 = vsel %vm406_vm10, %v342_v8, %v470_v18  ;;  %v275_v28 = vmul.f32 %v755_v0, %v204_v14  ;;  %v276_v29 = vmul.f32 %v755_v0, %v205_v15  ;;  %v216_v8 = vld [vmem:[%s760_s20 + $0x150] sm:$0xff]  ;;  %v218_v20 = vld [vmem:[%s760_s20 + $0x160] sm:$0xff] }
  0x36   : > { %597 = vst [vmem:[%s793_s25 + $0xc8] sm:$0xff] %v533_v21  ;;  %v535_v27 = vsel %vm407_vm11, %v343_v9, %v471_v19  ;;  %598 = vst [vmem:[%s793_s25 + $0xd0] sm:$0xff] %v534_v26  ;;  %vm408_vm12 = vcmp.gt.f32.partialorder %v344_v22, 0.0  ;;  %v472_v32 = vmul.f32 0.2, %v344_v22  ;;  %vm409_vm13 = vcmp.gt.f32.partialorder %v345_v23, 0.0 }
  0x37   : > { %599 = vst [vmem:[%s793_s25 + $0xd8] sm:$0xff] %v535_v27  ;;  %v473_v33 = vmul.f32 0.2, %v345_v23  ;;  %v346_v34 = vadd.f32 %v765_v1, %v275_v28  ;;  %v347_v35 = vadd.f32 %v765_v1, %v276_v29  ;;  %v277_v36 = vmul.f32 %v755_v0, %v206_v24  ;;  %v217_v9 = vld [vmem:[%s760_s20 + $0x158] sm:$0xff]  ;;  %v219_v21 = vld [vmem:[%s760_s20 + $0x168] sm:$0xff] }
  0x38   : > { %v278_v37 = vmul.f32 %v755_v0, %v207_v25  ;;  %v536_v38 = vsel %vm408_vm12, %v344_v22, %v472_v32  ;;  %v279_v40 = vmul.f32 %v755_v0, %v208_v30  ;;  %v280_v41 = vmul.f32 %v755_v0, %v209_v31  ;;  %v220_v32 = vld [vmem:[%s760_s20 + $0x170] sm:$0xff] }
  0x39   : > { %v537_v39 = vsel %vm409_vm13, %v345_v23, %v473_v33  ;;  %600 = vst [vmem:[%s793_s25 + $0xe0] sm:$0xff] %v536_v38  ;;  %vm410_vm14 = vcmp.gt.f32.partialorder %v346_v34, 0.0  ;;  %v474_v44 = vmul.f32 0.2, %v346_v34  ;;  %vm411_vm15 = vcmp.gt.f32.partialorder %v347_v35, 0.0  ;;  %v221_v33 = vld [vmem:[%s760_s20 + $0x178] sm:$0xff] }
  0x3a   : > { %601 = vst [vmem:[%s793_s25 + $0xe8] sm:$0xff] %v537_v39  ;;  %v475_v45 = vmul.f32 0.2, %v347_v35  ;;  %v348_v46 = vadd.f32 %v765_v1, %v277_v36  ;;  %v349_v47 = vadd.f32 %v765_v1, %v278_v37  ;;  %v350_v48 = vadd.f32 %v765_v1, %v279_v40 }
  0x3b   : > { %v351_v49 = vadd.f32 %v765_v1, %v280_v41  ;;  %v538_v50 = vsel %vm410_vm14, %v346_v34, %v474_v44  ;;  %v281_v52 = vmul.f32 %v755_v0, %v210_v42  ;;  %v282_v53 = vmul.f32 %v755_v0, %v211_v43  ;;  %v222_v42 = vld [vmem:[%s760_s20 + $0x180] sm:$0xff]  ;;  %v223_v43 = vld [vmem:[%s760_s20 + $0x188] sm:$0xff] }
  0x3c   : > { %v539_v51 = vsel %vm411_vm15, %v347_v35, %v475_v45  ;;  %602 = vst [vmem:[%s793_s25 + $0xf0] sm:$0xff] %v538_v50  ;;  %vm412_vm0 = vcmp.gt.f32.partialorder %v348_v46, 0.0  ;;  %v476_v56 = vmul.f32 0.2, %v348_v46  ;;  %vm413_vm1 = vcmp.gt.f32.partialorder %v349_v47, 0.0 }
  0x3d   : > { %603 = vst [vmem:[%s793_s25 + $0xf8] sm:$0xff] %v539_v51  ;;  %v477_v57 = vmul.f32 0.2, %v349_v47  ;;  %vm414_vm2 = vcmp.gt.f32.partialorder %v350_v48, 0.0  ;;  %v478_v58 = vmul.f32 0.2, %v350_v48  ;;  %v352_v62 = vadd.f32 %v765_v1, %v281_v52 }
  0x3e   : > { %vm415_vm3 = vcmp.gt.f32.partialorder %v351_v49, 0.0  ;;  %v479_v59 = vmul.f32 0.2, %v351_v49  ;;  %v540_v60 = vsel %vm412_vm0, %v348_v46, %v476_v56  ;;  %v353_v63 = vadd.f32 %v765_v1, %v282_v53 }
  0x3f   : > { %v541_v61 = vsel %vm413_vm1, %v349_v47, %v477_v57  ;;  %604 = vst [vmem:[%s793_s25 + $0x100] sm:$0xff] %v540_v60  ;;  %v542_v4 = vsel %vm414_vm2, %v350_v48, %v478_v58  ;;  %v283_v6 = vmul.f32 %v755_v0, %v212_v54  ;;  %v284_v7 = vmul.f32 %v755_v0, %v213_v55  ;;  %v224_v48 = vld [vmem:[%s760_s20 + $0x190] sm:$0xff]  ;;  %v226_v60 = vld [vmem:[%s760_s20 + $0x1a0] sm:$0xff] }
  0x40   : > { %605 = vst [vmem:[%s793_s25 + $0x108] sm:$0xff] %v541_v61  ;;  %v543_v5 = vsel %vm415_vm3, %v351_v49, %v479_v59  ;;  %606 = vst [vmem:[%s793_s25 + $0x110] sm:$0xff] %v542_v4  ;;  %vm416_vm4 = vcmp.gt.f32.partialorder %v352_v62, 0.0  ;;  %v480_v10 = vmul.f32 0.2, %v352_v62  ;;  %vm417_vm5 = vcmp.gt.f32.partialorder %v353_v63, 0.0 }
  0x41   : > { %607 = vst [vmem:[%s793_s25 + $0x118] sm:$0xff] %v543_v5  ;;  %v481_v11 = vmul.f32 0.2, %v353_v63  ;;  %v354_v12 = vadd.f32 %v765_v1, %v283_v6  ;;  %v355_v13 = vadd.f32 %v765_v1, %v284_v7  ;;  %v285_v14 = vmul.f32 %v755_v0, %v214_v2  ;;  %v225_v49 = vld [vmem:[%s760_s20 + $0x198] sm:$0xff]  ;;  %v227_v61 = vld [vmem:[%s760_s20 + $0x1a8] sm:$0xff] }
  0x42   : > { %v286_v15 = vmul.f32 %v755_v0, %v215_v3  ;;  %v544_v16 = vsel %vm416_vm4, %v352_v62, %v480_v10  ;;  %v287_v18 = vmul.f32 %v755_v0, %v216_v8  ;;  %v288_v19 = vmul.f32 %v755_v0, %v217_v9  ;;  %v228_v10 = vld [vmem:[%s760_s20 + $0x1b0] sm:$0xff] }
  0x43   : > { %v545_v17 = vsel %vm417_vm5, %v353_v63, %v481_v11  ;;  %608 = vst [vmem:[%s793_s25 + $0x120] sm:$0xff] %v544_v16  ;;  %vm418_vm6 = vcmp.gt.f32.partialorder %v354_v12, 0.0  ;;  %v482_v22 = vmul.f32 0.2, %v354_v12  ;;  %vm419_vm7 = vcmp.gt.f32.partialorder %v355_v13, 0.0  ;;  %v229_v11 = vld [vmem:[%s760_s20 + $0x1b8] sm:$0xff] }
  0x44   : > { %609 = vst [vmem:[%s793_s25 + $0x128] sm:$0xff] %v545_v17  ;;  %v483_v23 = vmul.f32 0.2, %v355_v13  ;;  %v356_v24 = vadd.f32 %v765_v1, %v285_v14  ;;  %v357_v25 = vadd.f32 %v765_v1, %v286_v15  ;;  %v358_v26 = vadd.f32 %v765_v1, %v287_v18 }
  0x45   : > { %v359_v27 = vadd.f32 %v765_v1, %v288_v19  ;;  %v546_v28 = vsel %vm418_vm6, %v354_v12, %v482_v22  ;;  %v289_v30 = vmul.f32 %v755_v0, %v218_v20  ;;  %v290_v31 = vmul.f32 %v755_v0, %v219_v21  ;;  %v230_v20 = vld [vmem:[%s760_s20 + $0x1c0] sm:$0xff]  ;;  %v231_v21 = vld [vmem:[%s760_s20 + $0x1c8] sm:$0xff] }
  0x46   : > { %v547_v29 = vsel %vm419_vm7, %v355_v13, %v483_v23  ;;  %610 = vst [vmem:[%s793_s25 + $0x130] sm:$0xff] %v546_v28  ;;  %vm420_vm8 = vcmp.gt.f32.partialorder %v356_v24, 0.0  ;;  %v484_v34 = vmul.f32 0.2, %v356_v24  ;;  %vm421_vm9 = vcmp.gt.f32.partialorder %v357_v25, 0.0 }
  0x47   : > { %611 = vst [vmem:[%s793_s25 + $0x138] sm:$0xff] %v547_v29  ;;  %v485_v35 = vmul.f32 0.2, %v357_v25  ;;  %vm422_vm10 = vcmp.gt.f32.partialorder %v358_v26, 0.0  ;;  %v486_v36 = vmul.f32 0.2, %v358_v26  ;;  %v360_v40 = vadd.f32 %v765_v1, %v289_v30 }
  0x48   : > { %vm423_vm11 = vcmp.gt.f32.partialorder %v359_v27, 0.0  ;;  %v487_v37 = vmul.f32 0.2, %v359_v27  ;;  %v548_v38 = vsel %vm420_vm8, %v356_v24, %v484_v34  ;;  %v361_v41 = vadd.f32 %v765_v1, %v290_v31 }
  0x49   : > { %v549_v39 = vsel %vm421_vm9, %v357_v25, %v485_v35  ;;  %612 = vst [vmem:[%s793_s25 + $0x140] sm:$0xff] %v548_v38  ;;  %v550_v44 = vsel %vm422_vm10, %v358_v26, %v486_v36  ;;  %v291_v46 = vmul.f32 %v755_v0, %v220_v32  ;;  %v292_v47 = vmul.f32 %v755_v0, %v221_v33  ;;  %v232_v26 = vld [vmem:[%s760_s20 + $0x1d0] sm:$0xff]  ;;  %v234_v38 = vld [vmem:[%s760_s20 + $0x1e0] sm:$0xff] }
  0x4a   : > { %613 = vst [vmem:[%s793_s25 + $0x148] sm:$0xff] %v549_v39  ;;  %v551_v45 = vsel %vm423_vm11, %v359_v27, %v487_v37  ;;  %614 = vst [vmem:[%s793_s25 + $0x150] sm:$0xff] %v550_v44  ;;  %vm424_vm12 = vcmp.gt.f32.partialorder %v360_v40, 0.0  ;;  %v488_v50 = vmul.f32 0.2, %v360_v40  ;;  %vm425_vm13 = vcmp.gt.f32.partialorder %v361_v41, 0.0 }
  0x4b   : > { %615 = vst [vmem:[%s793_s25 + $0x158] sm:$0xff] %v551_v45  ;;  %v489_v51 = vmul.f32 0.2, %v361_v41  ;;  %v362_v52 = vadd.f32 %v765_v1, %v291_v46  ;;  %v363_v53 = vadd.f32 %v765_v1, %v292_v47  ;;  %v293_v54 = vmul.f32 %v755_v0, %v222_v42  ;;  %v233_v27 = vld [vmem:[%s760_s20 + $0x1d8] sm:$0xff]  ;;  %v235_v39 = vld [vmem:[%s760_s20 + $0x1e8] sm:$0xff] }
  0x4c   : > { %v294_v55 = vmul.f32 %v755_v0, %v223_v43  ;;  %v552_v56 = vsel %vm424_vm12, %v360_v40, %v488_v50  ;;  %v295_v58 = vmul.f32 %v755_v0, %v224_v48  ;;  %v296_v59 = vmul.f32 %v755_v0, %v225_v49  ;;  %v236_v50 = vld [vmem:[%s760_s20 + $0x1f0] sm:$0xff] }
  0x4d   : > { %v553_v57 = vsel %vm425_vm13, %v361_v41, %v489_v51  ;;  %616 = vst [vmem:[%s793_s25 + $0x160] sm:$0xff] %v552_v56  ;;  %vm426_vm14 = vcmp.gt.f32.partialorder %v362_v52, 0.0  ;;  %v490_v62 = vmul.f32 0.2, %v362_v52  ;;  %vm427_vm15 = vcmp.gt.f32.partialorder %v363_v53, 0.0  ;;  %v237_v51 = vld [vmem:[%s760_s20 + $0x1f8] sm:$0xff] }
  0x4e   : > { %617 = vst [vmem:[%s793_s25 + $0x168] sm:$0xff] %v553_v57  ;;  %v491_v63 = vmul.f32 0.2, %v363_v53  ;;  %v364_v2 = vadd.f32 %v765_v1, %v293_v54  ;;  %v365_v3 = vadd.f32 %v765_v1, %v294_v55  ;;  %v366_v4 = vadd.f32 %v765_v1, %v295_v58 }
  0x4f   : > { %v367_v5 = vadd.f32 %v765_v1, %v296_v59  ;;  %v554_v6 = vsel %vm426_vm14, %v362_v52, %v490_v62  ;;  %v297_v8 = vmul.f32 %v755_v0, %v226_v60  ;;  %v298_v9 = vmul.f32 %v755_v0, %v227_v61 }
  0x50   : > { %v555_v7 = vsel %vm427_vm15, %v363_v53, %v491_v63  ;;  %618 = vst [vmem:[%s793_s25 + $0x170] sm:$0xff] %v554_v6  ;;  %vm428_vm0 = vcmp.gt.f32.partialorder %v364_v2, 0.0  ;;  %v492_v12 = vmul.f32 0.2, %v364_v2  ;;  %vm429_vm1 = vcmp.gt.f32.partialorder %v365_v3, 0.0 }
  0x51   : > { %619 = vst [vmem:[%s793_s25 + $0x178] sm:$0xff] %v555_v7  ;;  %v493_v13 = vmul.f32 0.2, %v365_v3  ;;  %vm430_vm2 = vcmp.gt.f32.partialorder %v366_v4, 0.0  ;;  %v494_v14 = vmul.f32 0.2, %v366_v4  ;;  %v368_v18 = vadd.f32 %v765_v1, %v297_v8 }
  0x52   : > { %vm431_vm3 = vcmp.gt.f32.partialorder %v367_v5, 0.0  ;;  %v495_v15 = vmul.f32 0.2, %v367_v5  ;;  %v556_v16 = vsel %vm428_vm0, %v364_v2, %v492_v12  ;;  %v369_v19 = vadd.f32 %v765_v1, %v298_v9 }
  0x53   : > { %v557_v17 = vsel %vm429_vm1, %v365_v3, %v493_v13  ;;  %620 = vst [vmem:[%s793_s25 + $0x180] sm:$0xff] %v556_v16  ;;  %v558_v22 = vsel %vm430_vm2, %v366_v4, %v494_v14  ;;  %v299_v24 = vmul.f32 %v755_v0, %v228_v10  ;;  %v300_v25 = vmul.f32 %v755_v0, %v229_v11 }
  0x54   : > { %621 = vst [vmem:[%s793_s25 + $0x188] sm:$0xff] %v557_v17  ;;  %v559_v23 = vsel %vm431_vm3, %v367_v5, %v495_v15  ;;  %622 = vst [vmem:[%s793_s25 + $0x190] sm:$0xff] %v558_v22  ;;  %vm432_vm4 = vcmp.gt.f32.partialorder %v368_v18, 0.0  ;;  %v496_v28 = vmul.f32 0.2, %v368_v18  ;;  %vm433_vm5 = vcmp.gt.f32.partialorder %v369_v19, 0.0 }
  0x55   : > { %623 = vst [vmem:[%s793_s25 + $0x198] sm:$0xff] %v559_v23  ;;  %v497_v29 = vmul.f32 0.2, %v369_v19  ;;  %v370_v30 = vadd.f32 %v765_v1, %v299_v24  ;;  %v371_v31 = vadd.f32 %v765_v1, %v300_v25  ;;  %v301_v32 = vmul.f32 %v755_v0, %v230_v20 }
  0x56   : > { %v302_v33 = vmul.f32 %v755_v0, %v231_v21  ;;  %v560_v34 = vsel %vm432_vm4, %v368_v18, %v496_v28  ;;  %v303_v36 = vmul.f32 %v755_v0, %v232_v26  ;;  %v304_v37 = vmul.f32 %v755_v0, %v233_v27 }
  0x57   : > { %v561_v35 = vsel %vm433_vm5, %v369_v19, %v497_v29  ;;  %624 = vst [vmem:[%s793_s25 + $0x1a0] sm:$0xff] %v560_v34  ;;  %vm434_vm6 = vcmp.gt.f32.partialorder %v370_v30, 0.0  ;;  %v498_v40 = vmul.f32 0.2, %v370_v30  ;;  %vm435_vm7 = vcmp.gt.f32.partialorder %v371_v31, 0.0 }
  0x58   : > { %625 = vst [vmem:[%s793_s25 + $0x1a8] sm:$0xff] %v561_v35  ;;  %v499_v41 = vmul.f32 0.2, %v371_v31  ;;  %v372_v42 = vadd.f32 %v765_v1, %v301_v32  ;;  %v373_v43 = vadd.f32 %v765_v1, %v302_v33  ;;  %v374_v44 = vadd.f32 %v765_v1, %v303_v36 }
  0x59   : > { %v375_v45 = vadd.f32 %v765_v1, %v304_v37  ;;  %v562_v46 = vsel %vm434_vm6, %v370_v30, %v498_v40  ;;  %v305_v48 = vmul.f32 %v755_v0, %v234_v38  ;;  %v306_v49 = vmul.f32 %v755_v0, %v235_v39 }
  0x5a   : > { %v563_v47 = vsel %vm435_vm7, %v371_v31, %v499_v41  ;;  %626 = vst [vmem:[%s793_s25 + $0x1b0] sm:$0xff] %v562_v46  ;;  %vm436_vm8 = vcmp.gt.f32.partialorder %v372_v42, 0.0  ;;  %v500_v52 = vmul.f32 0.2, %v372_v42  ;;  %vm437_vm9 = vcmp.gt.f32.partialorder %v373_v43, 0.0 }
  0x5b   : > { %627 = vst [vmem:[%s793_s25 + $0x1b8] sm:$0xff] %v563_v47  ;;  %v501_v53 = vmul.f32 0.2, %v373_v43  ;;  %vm438_vm10 = vcmp.gt.f32.partialorder %v374_v44, 0.0  ;;  %v502_v54 = vmul.f32 0.2, %v374_v44  ;;  %v376_v58 = vadd.f32 %v765_v1, %v305_v48 }
  0x5c   : > { %vm439_vm11 = vcmp.gt.f32.partialorder %v375_v45, 0.0  ;;  %v503_v55 = vmul.f32 0.2, %v375_v45  ;;  %v564_v56 = vsel %vm436_vm8, %v372_v42, %v500_v52  ;;  %v377_v59 = vadd.f32 %v765_v1, %v306_v49 }
  0x5d   : > { %v565_v57 = vsel %vm437_vm9, %v373_v43, %v501_v53  ;;  %628 = vst [vmem:[%s793_s25 + $0x1c0] sm:$0xff] %v564_v56  ;;  %v566_v60 = vsel %vm438_vm10, %v374_v44, %v502_v54  ;;  %v307_v62 = vmul.f32 %v755_v0, %v236_v50  ;;  %v308_v63 = vmul.f32 %v755_v0, %v237_v51 }
  0x5e   : > { %629 = vst [vmem:[%s793_s25 + $0x1c8] sm:$0xff] %v565_v57  ;;  %v567_v61 = vsel %vm439_vm11, %v375_v45, %v503_v55  ;;  %630 = vst [vmem:[%s793_s25 + $0x1d0] sm:$0xff] %v566_v60  ;;  %vm440_vm12 = vcmp.gt.f32.partialorder %v376_v58, 0.0  ;;  %v504_v2 = vmul.f32 0.2, %v376_v58  ;;  %vm441_vm13 = vcmp.gt.f32.partialorder %v377_v59, 0.0 }
  0x5f   : > { %631 = vst [vmem:[%s793_s25 + $0x1d8] sm:$0xff] %v567_v61  ;;  %v505_v3 = vmul.f32 0.2, %v377_v59  ;;  %v378_v4 = vadd.f32 %v765_v1, %v307_v62  ;;  %v379_v5 = vadd.f32 %v765_v1, %v308_v63 }
  0x60   : > { %v568_v6 = vsel %vm440_vm12, %v376_v58, %v504_v2 }
  0x61   : > { %v569_v7 = vsel %vm441_vm13, %v377_v59, %v505_v3  ;;  %632 = vst [vmem:[%s793_s25 + $0x1e0] sm:$0xff] %v568_v6  ;;  %vm442_vm14 = vcmp.gt.f32.partialorder %v378_v4, 0.0  ;;  %v506_v8 = vmul.f32 0.2, %v378_v4  ;;  %vm443_vm15 = vcmp.gt.f32.partialorder %v379_v5, 0.0 }
  0x62   : > { %633 = vst [vmem:[%s793_s25 + $0x1e8] sm:$0xff] %v569_v7  ;;  %v507_v0 = vmul.f32 0.2, %v379_v5 }
  0x63   : > { %v570_v9 = vsel %vm442_vm14, %v378_v4, %v506_v8 }
  0x64   : > { %v571_v10 = vsel %vm443_vm15, %v379_v5, %v507_v0  ;;  %634 = vst [vmem:[%s793_s25 + $0x1f0] sm:$0xff] %v570_v9 }
  0x65   : > { %635 = vst [vmem:[%s793_s25 + $0x1f8] sm:$0xff] %v571_v10 }
  0x66 PF: > { %s13_s12 = sadd.s32 1, %s719_s12  }
  0x67   : > { %p10_p4 = scmp.ge.s32.totalorder %s13_s12, 6  }
  0x69   :  { %12 = sbr.rel (!%p10_p4) target bundleno = 1 (0x1), region = 62 }

// kernel: _lambda_.21
= control target key start
LH: loop header
LB: loop body
LE: loop exit
PB: predicated region body
PF: predicated region fallthrough
CT: control target
= control target key end

     0   :  { %s1381_s9 = smov 0   ;;  %s1549_s0 = inlined_call_operand.vmem [shape: bf16[2048,72], index: 0, kind: input, shape index: {}]   ;;  %s1550_s1 = inlined_call_operand.vmem [shape: bf16[72,128], index: 1, kind: input, shape index: {}]   ;;  %s1551_s2 = inlined_call_operand.vmem [shape: f32[2048,128], index: 2, kind: output, shape index: {}]  }
   0x1 LB: > { %s982_s10 = sadd.s32 4294967295, %s1364_s9   ;;  %p986_p0 = scmp.ge.s32.totalorder %s1364_s9, 1  ;;  %s1364_s9 = sphi %s1381_s9, %s12_s9  }
   0x2   : > { %p113_p1 = scmp.lt.s32.totalorder %s1364_s9, 5 }
   0x4   : > { %p114_p2 = pnand %p986_p0, %p113_p1 }
   0x5   : > { %v1193_v0 = vld [vmem:[%s1550_s1] sm:$0xff] (!%p114_p2)   ;;  %v1194_v1 = vld [vmem:[%s1550_s1 + $0x8] sm:$0xff] (!%p114_p2)   ;;  %s987_s15 = sshll.u32 (!%p114_p2), %s982_s10, 6  ;;  %v1195_v2 = vld [vmem:[%s1550_s1 + $0x10] sm:$0xff] (!%p114_p2)   ;;  %vm408_vm0 = vcmask (!%p114_p2), 588800   ;;  %vm505_vm1 = vcmask (!%p114_p2), 1043456  }
   0x6   : > { %117 = sbr.rel (%p114_p2) target bundleno = 316 (0x13c), region = 28  ;;  %1099 = vmatprep.subr.bf16.mxu0 (!%p114_p2), %v1193_v0  ;;  %1173 = vmatprep.subr.bf16.mxu1 (!%p114_p2), %v1193_v0  ;;  %p136_p3 = scmp.lt.s32.totalorder (!%p114_p2), %s987_s15, 255  ;;  %v1196_v3 = vld [vmem:[%s1550_s1 + $0x18] sm:$0xff] (!%p114_p2)   ;;  %v1197_v6 = vld [vmem:[%s1550_s1 + $0x20] ss:$0 sps:$4 sm:$0xff] (!%p114_p2)  }
   0x7   : > { %1100 = vmatpush3.bf16.msra.mxu0 (!%p114_p2), %v1193_v0  ;;  %1178 = vmatpush3.bf16.msra.mxu1 (!%p114_p2), %v1193_v0  ;;  %v507_v7 = vsel (!%p114_p2), %vm505_vm1, %v1197_v6, 0 }
   0x8   : > { %1101 = vmatprep.subr.bf16.mxu0 (!%p114_p2), %v1194_v1  ;;  %1174 = vmatprep.subr.bf16.mxu1 (!%p114_p2), %v1194_v1 }
   0xb   : > { %1102 = vmatpush3.bf16.msra.mxu0 (!%p114_p2), %v1194_v1  ;;  %1179 = vmatpush3.bf16.msra.mxu1 (!%p114_p2), %v1194_v1 }
   0xc   : > { %1103 = vmatprep.subr.bf16.mxu0 (!%p114_p2), %v1195_v2  ;;  %1175 = vmatprep.subr.bf16.mxu1 (!%p114_p2), %v1195_v2 }
   0xd   : > { %s1553_s15 = smov (!%p136_p3, %s987_s15), 255 }
   0xe   : > { %s988_s18 = sshll.u32 %s1553_s15, 2  ;;  %s990_s26 = sshll.u32 %s1553_s15, 3 }
   0xf   : > { %s1407_s23 = scalar_lea.vmem %s1549_s0, %s988_s18  ;;  %1104 = vmatpush3.bf16.msra.mxu0 %v1195_v2  ;;  %1180 = vmatpush3.bf16.msra.mxu1 %v1195_v2  ;;  %s1480_s29 = scalar_lea.vmem %s1551_s2, %s990_s26 }
  0x10   : > { %v1198_v4 = vld [vmem:[%s1407_s23] sm:$0xff]   ;;  %1105 = vmatprep.subr.bf16.mxu0 %v1196_v3  ;;  %1176 = vmatprep.subr.bf16.mxu1 %v1196_v3  ;;  %v1200_v8 = vld [vmem:[%s1407_s23 + $0x8] sm:$0xff]   ;;  %v1202_v10 = vld [vmem:[%s1407_s23 + $0x10] sm:$0xff]  }
  0x11   : > { %v1199_v5 = vld [vmem:[%s1407_s23 + $0x80] sm:$0xff]   ;;  %1109 = vmatprep.mubr.msk.bf16.mxu0 %vm408_vm0, %v1198_v4  ;;  %v1201_v9 = vld [vmem:[%s1407_s23 + $0x88] sm:$0xff]   ;;  %v1203_v11 = vld [vmem:[%s1407_s23 + $0x90] sm:$0xff]  }
  0x12   : > { %1141 = vmatprep.mubr.msk.bf16.mxu1 %vm408_vm0, %v1199_v5  ;;  %v1204_v12 = vld [vmem:[%s1407_s23 + $0x18] sm:$0xff]   ;;  %v1206_v14 = vld [vmem:[%s1407_s23 + $0x20] sm:$0xff]   ;;  %v1208_v16 = vld [vmem:[%s1407_s23 + $0x28] sm:$0xff]  }
  0x13   : > { %1106 = vmatpush3.bf16.msra.mxu0 %v1196_v3  ;;  %1181 = vmatpush3.bf16.msra.mxu1 %v1196_v3  ;;  %v1205_v13 = vld [vmem:[%s1407_s23 + $0x98] sm:$0xff]   ;;  %v1207_v15 = vld [vmem:[%s1407_s23 + $0xa0] sm:$0xff]   ;;  %v1209_v17 = vld [vmem:[%s1407_s23 + $0xa8] sm:$0xff]  }
  0x14   : > { %1183 = vmatprep.subr.msk.bf16.mxu0 %vm505_vm1, %v1197_v6  ;;  %1184 = vmatprep.subr.msk.bf16.mxu1 %vm505_vm1, %v1197_v6  ;;  %v1210_v18 = vld [vmem:[%s1407_s23 + $0x30] sm:$0xff]   ;;  %v1212_v20 = vld [vmem:[%s1407_s23 + $0x38] sm:$0xff]   ;;  %v1214_v22 = vld [vmem:[%s1407_s23 + $0x40] sm:$0xff]  }
  0x15   : > { %v1211_v19 = vld [vmem:[%s1407_s23 + $0xb0] sm:$0xff]   ;;  %v1213_v21 = vld [vmem:[%s1407_s23 + $0xb8] sm:$0xff]   ;;  %v1215_v23 = vld [vmem:[%s1407_s23 + $0xc0] sm:$0xff]  }
  0x16   : > { %v1216_v24 = vld [vmem:[%s1407_s23 + $0x48] sm:$0xff]   ;;  %v1218_v26 = vld [vmem:[%s1407_s23 + $0x50] sm:$0xff]   ;;  %v1220_v28 = vld [vmem:[%s1407_s23 + $0x58] sm:$0xff]  }
  0x17   : > { %1108 = vmatpush3.bf16.msra.mxu0 %v507_v7  ;;  %1182 = vmatpush3.bf16.msra.mxu1 %v507_v7  ;;  %v1217_v25 = vld [vmem:[%s1407_s23 + $0xc8] sm:$0xff]   ;;  %v1219_v27 = vld [vmem:[%s1407_s23 + $0xd0] sm:$0xff]   ;;  %v1221_v29 = vld [vmem:[%s1407_s23 + $0xd8] sm:$0xff]  }
  0x18   : > { %v1222_v30 = vld [vmem:[%s1407_s23 + $0x60] sm:$0xff]   ;;  %v1224_v32 = vld [vmem:[%s1407_s23 + $0x68] sm:$0xff]   ;;  %v1226_v34 = vld [vmem:[%s1407_s23 + $0x70] sm:$0xff]  }
  0x19   : > { %v1223_v31 = vld [vmem:[%s1407_s23 + $0xe0] sm:$0xff]   ;;  %v1225_v33 = vld [vmem:[%s1407_s23 + $0xe8] sm:$0xff]   ;;  %v1227_v35 = vld [vmem:[%s1407_s23 + $0xf0] sm:$0xff]  }
  0x1a   : > { %1110 = vmatmul.mubr.msk.bf16.vlgmr.msra.gmra.mrb[0].mxu0 %vm408_vm0, %v1200_v8  ;;  %1142 = vmatmul.mubr.msk.bf16.vlgmr.msra.gmra.mrb[0].mxu1 %vm408_vm0, %v1201_v9  ;;  %v1228_v36 = vld [vmem:[%s1407_s23 + $0x78] sm:$0xff]  }
  0x1b   : > { %1113 = vmatprep.mubr.msk.bf16.mxu0 %vm408_vm0, %v1202_v10  ;;  %1145 = vmatprep.mubr.msk.bf16.mxu1 %vm408_vm0, %v1203_v11  ;;  %v1229_v37 = vld [vmem:[%s1407_s23 + $0xf8] sm:$0xff]  }
  0x22   : > { %1114 = vmatmul.mubr.msk.bf16.gmra.mrb[4].mxu0 %vm408_vm0, %v1204_v12  ;;  %1146 = vmatmul.mubr.msk.bf16.gmra.mrb[4].mxu1 %vm408_vm0, %v1205_v13 }
  0x23   : > { %1117 = vmatprep.mubr.msk.bf16.mxu0 %vm408_vm0, %v1206_v14  ;;  %1149 = vmatprep.mubr.msk.bf16.mxu1 %vm408_vm0, %v1207_v15 }
  0x2a   : > { %1118 = vmatmul.mubr.msk.bf16.gmra.mrb[8].mxu0 %vm408_vm0, %v1208_v16  ;;  %1150 = vmatmul.mubr.msk.bf16.gmra.mrb[8].mxu1 %vm408_vm0, %v1209_v17 }
  0x2b   : > { %1121 = vmatprep.mubr.msk.bf16.mxu0 %vm408_vm0, %v1210_v18  ;;  %1153 = vmatprep.mubr.msk.bf16.mxu1 %vm408_vm0, %v1211_v19 }
  0x32   : > { %1122 = vmatmul.mubr.msk.bf16.gmra.mrb[12].mxu0 %vm408_vm0, %v1212_v20  ;;  %1154 = vmatmul.mubr.msk.bf16.gmra.mrb[12].mxu1 %vm408_vm0, %v1213_v21 }
  0x33   : > { %1125 = vmatprep.mubr.msk.bf16.mxu0 %vm408_vm0, %v1214_v22  ;;  %1157 = vmatprep.mubr.msk.bf16.mxu1 %vm408_vm0, %v1215_v23 }
  0x3a   : > { %1126 = vmatmul.mubr.msk.bf16.gmra.mrb[16].mxu0 %vm408_vm0, %v1216_v24  ;;  %1158 = vmatmul.mubr.msk.bf16.gmra.mrb[16].mxu1 %vm408_vm0, %v1217_v25 }
  0x3b   : > { %1129 = vmatprep.mubr.msk.bf16.mxu0 %vm408_vm0, %v1218_v26  ;;  %1161 = vmatprep.mubr.msk.bf16.mxu1 %vm408_vm0, %v1219_v27 }
  0x42   : > { %1130 = vmatmul.mubr.msk.bf16.gmra.mrb[20].mxu0 %vm408_vm0, %v1220_v28  ;;  %1162 = vmatmul.mubr.msk.bf16.gmra.mrb[20].mxu1 %vm408_vm0, %v1221_v29 }
  0x43   : > { %1133 = vmatprep.mubr.msk.bf16.mxu0 %vm408_vm0, %v1222_v30  ;;  %1165 = vmatprep.mubr.msk.bf16.mxu1 %vm408_vm0, %v1223_v31 }
  0x4a   : > { %1134 = vmatmul.mubr.msk.bf16.gmra.mrb[24].mxu0 %vm408_vm0, %v1224_v32  ;;  %1166 = vmatmul.mubr.msk.bf16.gmra.mrb[24].mxu1 %vm408_vm0, %v1225_v33 }
  0x4b   : > { %1137 = vmatprep.mubr.msk.bf16.mxu0 %vm408_vm0, %v1226_v34  ;;  %1169 = vmatprep.mubr.msk.bf16.mxu1 %vm408_vm0, %v1227_v35 }
  0x52   : > { %1138 = vmatmul.mubr.msk.bf16.gmra.mrb[28].mxu0 %vm408_vm0, %v1228_v36  ;;  %1170 = vmatmul.mubr.msk.bf16.gmra.mrb[28].mxu1 %vm408_vm0, %v1229_v37 }
  0xed   : > { %v1111_v38 = vpop.f32.mrb[0].mxu0  ;;  %v1143_v39 = vpop.f32.mrb[0].mxu1 }
  0xee   : > { %1230 = vtanh.f32 %v1111_v38  ;;  %v543_v40 = vpop.f32.mrb[1].mxu0  ;;  %v671_v41 = vpop.f32.mrb[1].mxu1 }
  0xef   : > { %1232 = vtanh.f32 %v1143_v39  ;;  %v1112_v42 = vpop.f32.mrb[2].mxu0  ;;  %v1144_v43 = vpop.f32.mrb[2].mxu1 }
  0xf0   : > { %1234 = vtanh.f32 %v543_v40  ;;  %v546_v44 = vpop.f32.mrb[3].mxu0  ;;  %v674_v45 = vpop.f32.mrb[3].mxu1 }
  0xf1   : > { %1236 = vtanh.f32 %v671_v41 }
  0xf2   : > { %1238 = vtanh.f32 %v1112_v42 }
  0xf3   : > { %1240 = vtanh.f32 %v1144_v43 }
  0xf4   : > { %1242 = vtanh.f32 %v546_v44 }
  0xf5   : > { %1244 = vtanh.f32 %v674_v45  ;;  %v1115_v46 = vpop.f32.mrb[4].mxu0  ;;  %v1147_v47 = vpop.f32.mrb[4].mxu1 }
  0xf6   : > { %1246 = vtanh.f32 %v1115_v46  ;;  %v559_v48 = vpop.f32.mrb[5].mxu0  ;;  %v687_v49 = vpop.f32.mrb[5].mxu1 }
  0xf7   : > { %1248 = vtanh.f32 %v1147_v47  ;;  %v1116_v50 = vpop.f32.mrb[6].mxu0  ;;  %v1148_v51 = vpop.f32.mrb[6].mxu1 }
  0xf8   : > { %v1231_v52 = vpop.eup %1230  ;;  %1250 = vtanh.f32 %v559_v48  ;;  %v562_v53 = vpop.f32.mrb[7].mxu0 }
  0xf9   : > { %v690_v54 = vpop.f32.mrb[7].mxu1  ;;  %v1233_v55 = vpop.eup %1232  ;;  %864 = vst [vmem:[%s1480_s29 + $0x10] sm:$0xff] %v1231_v52  ;;  %1252 = vtanh.f32 %v687_v49 }
  0xfa   : > { %v1235_v56 = vpop.eup %1234  ;;  %896 = vst [vmem:[%s1480_s29 + $0x110] sm:$0xff] %v1233_v55  ;;  %1254 = vtanh.f32 %v1116_v50 }
  0xfb   : > { %v1237_v57 = vpop.eup %1236  ;;  %862 = vst [vmem:[%s1480_s29] sm:$0xff] %v1235_v56  ;;  %1256 = vtanh.f32 %v1148_v51 }
  0xfc   : > { %v1239_v58 = vpop.eup %1238  ;;  %894 = vst [vmem:[%s1480_s29 + $0x100] sm:$0xff] %v1237_v57  ;;  %1258 = vtanh.f32 %v562_v53 }
  0xfd   : > { %v1241_v59 = vpop.eup %1240  ;;  %865 = vst [vmem:[%s1480_s29 + $0x18] sm:$0xff] %v1239_v58  ;;  %1260 = vtanh.f32 %v690_v54  ;;  %v1119_v60 = vpop.f32.mrb[8].mxu0 }
  0xfe   : > { %v1151_v61 = vpop.f32.mrb[8].mxu1  ;;  %v1243_v62 = vpop.eup %1242  ;;  %897 = vst [vmem:[%s1480_s29 + $0x118] sm:$0xff] %v1241_v59  ;;  %1262 = vtanh.f32 %v1119_v60 }
  0xff   : > { %v575_v63 = vpop.f32.mrb[9].mxu0  ;;  %v703_v0 = vpop.f32.mrb[9].mxu1  ;;  %863 = vst [vmem:[%s1480_s29 + $0x8] sm:$0xff] %v1243_v62  ;;  %1264 = vtanh.f32 %v1151_v61 }
 0x100   : > { %v1245_v1 = vpop.eup %1244  ;;  %v1120_v2 = vpop.f32.mrb[10].mxu0  ;;  %1266 = vtanh.f32 %v575_v63 }
 0x101   : > { %v1152_v3 = vpop.f32.mrb[10].mxu1  ;;  %v1247_v4 = vpop.eup %1246  ;;  %895 = vst [vmem:[%s1480_s29 + $0x108] sm:$0xff] %v1245_v1  ;;  %1268 = vtanh.f32 %v703_v0 }
 0x102   : > { %v578_v5 = vpop.f32.mrb[11].mxu0  ;;  %v706_v6 = vpop.f32.mrb[11].mxu1  ;;  %868 = vst [vmem:[%s1480_s29 + $0x30] sm:$0xff] %v1247_v4  ;;  %1270 = vtanh.f32 %v1120_v2 }
 0x103   : > { %v1249_v7 = vpop.eup %1248  ;;  %1272 = vtanh.f32 %v1152_v3 }
 0x104   : > { %v1251_v8 = vpop.eup %1250  ;;  %900 = vst [vmem:[%s1480_s29 + $0x130] sm:$0xff] %v1249_v7  ;;  %1274 = vtanh.f32 %v578_v5 }
 0x105   : > { %v1253_v9 = vpop.eup %1252  ;;  %866 = vst [vmem:[%s1480_s29 + $0x20] sm:$0xff] %v1251_v8  ;;  %1276 = vtanh.f32 %v706_v6  ;;  %v1123_v12 = vpop.f32.mrb[12].mxu0 }
 0x106   : > { %v1255_v10 = vpop.eup %1254  ;;  %898 = vst [vmem:[%s1480_s29 + $0x120] sm:$0xff] %v1253_v9  ;;  %v1155_v13 = vpop.f32.mrb[12].mxu1  ;;  %1278 = vtanh.f32 %v1123_v12 }
 0x107   : > { %v1257_v11 = vpop.eup %1256  ;;  %869 = vst [vmem:[%s1480_s29 + $0x38] sm:$0xff] %v1255_v10  ;;  %v591_v15 = vpop.f32.mrb[13].mxu0  ;;  %1280 = vtanh.f32 %v1155_v13 }
 0x108   : > { %v1259_v14 = vpop.eup %1258  ;;  %901 = vst [vmem:[%s1480_s29 + $0x138] sm:$0xff] %v1257_v11  ;;  %v719_v16 = vpop.f32.mrb[13].mxu1  ;;  %1282 = vtanh.f32 %v591_v15 }
 0x109   : > { %v1261_v17 = vpop.eup %1260  ;;  %867 = vst [vmem:[%s1480_s29 + $0x28] sm:$0xff] %v1259_v14  ;;  %v1124_v18 = vpop.f32.mrb[14].mxu0  ;;  %1284 = vtanh.f32 %v719_v16 }
 0x10a   : > { %v1156_v19 = vpop.f32.mrb[14].mxu1  ;;  %v1263_v20 = vpop.eup %1262  ;;  %899 = vst [vmem:[%s1480_s29 + $0x128] sm:$0xff] %v1261_v17  ;;  %1286 = vtanh.f32 %v1124_v18 }
 0x10b   : > { %v594_v21 = vpop.f32.mrb[15].mxu0  ;;  %v722_v22 = vpop.f32.mrb[15].mxu1  ;;  %872 = vst [vmem:[%s1480_s29 + $0x50] sm:$0xff] %v1263_v20  ;;  %1288 = vtanh.f32 %v1156_v19 }
 0x10c   : > { %v1265_v23 = vpop.eup %1264  ;;  %1290 = vtanh.f32 %v594_v21 }
 0x10d   : > { %v1267_v24 = vpop.eup %1266  ;;  %904 = vst [vmem:[%s1480_s29 + $0x150] sm:$0xff] %v1265_v23  ;;  %1292 = vtanh.f32 %v722_v22  ;;  %v1127_v28 = vpop.f32.mrb[16].mxu0 }
 0x10e   : > { %v1269_v25 = vpop.eup %1268  ;;  %870 = vst [vmem:[%s1480_s29 + $0x40] sm:$0xff] %v1267_v24  ;;  %v1159_v29 = vpop.f32.mrb[16].mxu1  ;;  %1294 = vtanh.f32 %v1127_v28 }
 0x10f   : > { %v1271_v26 = vpop.eup %1270  ;;  %902 = vst [vmem:[%s1480_s29 + $0x140] sm:$0xff] %v1269_v25  ;;  %v607_v31 = vpop.f32.mrb[17].mxu0  ;;  %1296 = vtanh.f32 %v1159_v29 }
 0x110   : > { %v1273_v27 = vpop.eup %1272  ;;  %873 = vst [vmem:[%s1480_s29 + $0x58] sm:$0xff] %v1271_v26  ;;  %v735_v32 = vpop.f32.mrb[17].mxu1  ;;  %1298 = vtanh.f32 %v607_v31 }
 0x111   : > { %v1275_v30 = vpop.eup %1274  ;;  %905 = vst [vmem:[%s1480_s29 + $0x158] sm:$0xff] %v1273_v27  ;;  %v1128_v34 = vpop.f32.mrb[18].mxu0  ;;  %1300 = vtanh.f32 %v735_v32 }
 0x112   : > { %v1277_v33 = vpop.eup %1276  ;;  %871 = vst [vmem:[%s1480_s29 + $0x48] sm:$0xff] %v1275_v30  ;;  %v1160_v35 = vpop.f32.mrb[18].mxu1  ;;  %1302 = vtanh.f32 %v1128_v34 }
 0x113   : > { %v1279_v36 = vpop.eup %1278  ;;  %903 = vst [vmem:[%s1480_s29 + $0x148] sm:$0xff] %v1277_v33  ;;  %v610_v37 = vpop.f32.mrb[19].mxu0  ;;  %1304 = vtanh.f32 %v1160_v35 }
 0x114   : > { %v738_v38 = vpop.f32.mrb[19].mxu1  ;;  %v1281_v39 = vpop.eup %1280  ;;  %876 = vst [vmem:[%s1480_s29 + $0x70] sm:$0xff] %v1279_v36  ;;  %1306 = vtanh.f32 %v610_v37 }
 0x115   : > { %v1283_v40 = vpop.eup %1282  ;;  %908 = vst [vmem:[%s1480_s29 + $0x170] sm:$0xff] %v1281_v39  ;;  %1308 = vtanh.f32 %v738_v38  ;;  %v1131_v44 = vpop.f32.mrb[20].mxu0 }
 0x116   : > { %v1285_v41 = vpop.eup %1284  ;;  %874 = vst [vmem:[%s1480_s29 + $0x60] sm:$0xff] %v1283_v40  ;;  %v1163_v45 = vpop.f32.mrb[20].mxu1  ;;  %1310 = vtanh.f32 %v1131_v44 }
 0x117   : > { %v1287_v42 = vpop.eup %1286  ;;  %906 = vst [vmem:[%s1480_s29 + $0x160] sm:$0xff] %v1285_v41  ;;  %v623_v47 = vpop.f32.mrb[21].mxu0  ;;  %1312 = vtanh.f32 %v1163_v45 }
 0x118   : > { %v1289_v43 = vpop.eup %1288  ;;  %877 = vst [vmem:[%s1480_s29 + $0x78] sm:$0xff] %v1287_v42  ;;  %v751_v48 = vpop.f32.mrb[21].mxu1  ;;  %1314 = vtanh.f32 %v623_v47 }
 0x119   : > { %v1291_v46 = vpop.eup %1290  ;;  %909 = vst [vmem:[%s1480_s29 + $0x178] sm:$0xff] %v1289_v43  ;;  %v1132_v50 = vpop.f32.mrb[22].mxu0  ;;  %1316 = vtanh.f32 %v751_v48 }
 0x11a   : > { %v1293_v49 = vpop.eup %1292  ;;  %875 = vst [vmem:[%s1480_s29 + $0x68] sm:$0xff] %v1291_v46  ;;  %v1164_v51 = vpop.f32.mrb[22].mxu1  ;;  %1318 = vtanh.f32 %v1132_v50 }
 0x11b   : > { %v1295_v52 = vpop.eup %1294  ;;  %907 = vst [vmem:[%s1480_s29 + $0x168] sm:$0xff] %v1293_v49  ;;  %v626_v53 = vpop.f32.mrb[23].mxu0  ;;  %1320 = vtanh.f32 %v1164_v51 }
 0x11c   : > { %v754_v54 = vpop.f32.mrb[23].mxu1  ;;  %v1297_v55 = vpop.eup %1296  ;;  %880 = vst [vmem:[%s1480_s29 + $0x90] sm:$0xff] %v1295_v52  ;;  %1322 = vtanh.f32 %v626_v53 }
 0x11d   : > { %v1299_v56 = vpop.eup %1298  ;;  %912 = vst [vmem:[%s1480_s29 + $0x190] sm:$0xff] %v1297_v55  ;;  %1324 = vtanh.f32 %v754_v54  ;;  %v1135_v60 = vpop.f32.mrb[24].mxu0 }
 0x11e   : > { %v1301_v57 = vpop.eup %1300  ;;  %878 = vst [vmem:[%s1480_s29 + $0x80] sm:$0xff] %v1299_v56  ;;  %v1167_v61 = vpop.f32.mrb[24].mxu1  ;;  %1326 = vtanh.f32 %v1135_v60 }
 0x11f   : > { %v1303_v58 = vpop.eup %1302  ;;  %910 = vst [vmem:[%s1480_s29 + $0x180] sm:$0xff] %v1301_v57  ;;  %v639_v63 = vpop.f32.mrb[25].mxu0  ;;  %1328 = vtanh.f32 %v1167_v61 }
 0x120   : > { %v1305_v59 = vpop.eup %1304  ;;  %881 = vst [vmem:[%s1480_s29 + $0x98] sm:$0xff] %v1303_v58  ;;  %v767_v0 = vpop.f32.mrb[25].mxu1  ;;  %1330 = vtanh.f32 %v639_v63 }
 0x121   : > { %v1307_v62 = vpop.eup %1306  ;;  %913 = vst [vmem:[%s1480_s29 + $0x198] sm:$0xff] %v1305_v59  ;;  %v1136_v2 = vpop.f32.mrb[26].mxu0  ;;  %1332 = vtanh.f32 %v767_v0 }
 0x122   : > { %v1309_v1 = vpop.eup %1308  ;;  %879 = vst [vmem:[%s1480_s29 + $0x88] sm:$0xff] %v1307_v62  ;;  %v1168_v3 = vpop.f32.mrb[26].mxu1  ;;  %1334 = vtanh.f32 %v1136_v2 }
 0x123   : > { %v1311_v4 = vpop.eup %1310  ;;  %911 = vst [vmem:[%s1480_s29 + $0x188] sm:$0xff] %v1309_v1  ;;  %v642_v5 = vpop.f32.mrb[27].mxu0  ;;  %1336 = vtanh.f32 %v1168_v3 }
 0x124   : > { %v770_v6 = vpop.f32.mrb[27].mxu1  ;;  %v1313_v7 = vpop.eup %1312  ;;  %884 = vst [vmem:[%s1480_s29 + $0xb0] sm:$0xff] %v1311_v4  ;;  %1338 = vtanh.f32 %v642_v5 }
 0x125   : > { %v1315_v8 = vpop.eup %1314  ;;  %916 = vst [vmem:[%s1480_s29 + $0x1b0] sm:$0xff] %v1313_v7  ;;  %1340 = vtanh.f32 %v770_v6  ;;  %v1139_v12 = vpop.f32.mrb[28].mxu0 }
 0x126   : > { %v1317_v9 = vpop.eup %1316  ;;  %882 = vst [vmem:[%s1480_s29 + $0xa0] sm:$0xff] %v1315_v8  ;;  %v1171_v13 = vpop.f32.mrb[28].mxu1  ;;  %1342 = vtanh.f32 %v1139_v12 }
 0x127   : > { %v1319_v10 = vpop.eup %1318  ;;  %914 = vst [vmem:[%s1480_s29 + $0x1a0] sm:$0xff] %v1317_v9  ;;  %v655_v15 = vpop.f32.mrb[29].mxu0  ;;  %1344 = vtanh.f32 %v1171_v13 }
 0x128   : > { %v1321_v11 = vpop.eup %1320  ;;  %885 = vst [vmem:[%s1480_s29 + $0xb8] sm:$0xff] %v1319_v10  ;;  %v783_v16 = vpop.f32.mrb[29].mxu1  ;;  %1346 = vtanh.f32 %v655_v15 }
 0x129   : > { %v1323_v14 = vpop.eup %1322  ;;  %917 = vst [vmem:[%s1480_s29 + $0x1b8] sm:$0xff] %v1321_v11  ;;  %v1140_v18 = vpop.f32.mrb[30].mxu0  ;;  %1348 = vtanh.f32 %v783_v16 }
 0x12a   : > { %v1325_v17 = vpop.eup %1324  ;;  %883 = vst [vmem:[%s1480_s29 + $0xa8] sm:$0xff] %v1323_v14  ;;  %v1172_v19 = vpop.f32.mrb[30].mxu1  ;;  %1350 = vtanh.f32 %v1140_v18 }
 0x12b   : > { %v1327_v20 = vpop.eup %1326  ;;  %915 = vst [vmem:[%s1480_s29 + $0x1a8] sm:$0xff] %v1325_v17  ;;  %v658_v21 = vpop.f32.mrb[31].mxu0  ;;  %1352 = vtanh.f32 %v1172_v19 }
 0x12c   : > { %v786_v22 = vpop.f32.mrb[31].mxu1  ;;  %v1329_v23 = vpop.eup %1328  ;;  %888 = vst [vmem:[%s1480_s29 + $0xd0] sm:$0xff] %v1327_v20  ;;  %1354 = vtanh.f32 %v658_v21 }
 0x12d   : > { %v1331_v24 = vpop.eup %1330  ;;  %920 = vst [vmem:[%s1480_s29 + $0x1d0] sm:$0xff] %v1329_v23  ;;  %1356 = vtanh.f32 %v786_v22 }
 0x12e   : > { %v1333_v25 = vpop.eup %1332  ;;  %886 = vst [vmem:[%s1480_s29 + $0xc0] sm:$0xff] %v1331_v24 }
 0x12f   : > { %v1335_v26 = vpop.eup %1334  ;;  %918 = vst [vmem:[%s1480_s29 + $0x1c0] sm:$0xff] %v1333_v25 }
 0x130   : > { %v1337_v27 = vpop.eup %1336  ;;  %889 = vst [vmem:[%s1480_s29 + $0xd8] sm:$0xff] %v1335_v26 }
 0x131   : > { %v1339_v28 = vpop.eup %1338  ;;  %921 = vst [vmem:[%s1480_s29 + $0x1d8] sm:$0xff] %v1337_v27 }
 0x132   : > { %v1341_v29 = vpop.eup %1340  ;;  %887 = vst [vmem:[%s1480_s29 + $0xc8] sm:$0xff] %v1339_v28 }
 0x133   : > { %v1343_v30 = vpop.eup %1342  ;;  %919 = vst [vmem:[%s1480_s29 + $0x1c8] sm:$0xff] %v1341_v29 }
 0x134   : > { %v1345_v31 = vpop.eup %1344  ;;  %892 = vst [vmem:[%s1480_s29 + $0xf0] sm:$0xff] %v1343_v30 }
 0x135   : > { %v1347_v32 = vpop.eup %1346  ;;  %924 = vst [vmem:[%s1480_s29 + $0x1f0] sm:$0xff] %v1345_v31 }
 0x136   : > { %v1349_v33 = vpop.eup %1348  ;;  %890 = vst [vmem:[%s1480_s29 + $0xe0] sm:$0xff] %v1347_v32 }
 0x137   : > { %v1351_v34 = vpop.eup %1350  ;;  %922 = vst [vmem:[%s1480_s29 + $0x1e0] sm:$0xff] %v1349_v33 }
 0x138   : > { %v1353_v35 = vpop.eup %1352  ;;  %893 = vst [vmem:[%s1480_s29 + $0xf8] sm:$0xff] %v1351_v34 }
 0x139   : > { %v1355_v36 = vpop.eup %1354  ;;  %925 = vst [vmem:[%s1480_s29 + $0x1f8] sm:$0xff] %v1353_v35 }
 0x13a   : > { %v1357_v37 = vpop.eup %1356  ;;  %891 = vst [vmem:[%s1480_s29 + $0xe8] sm:$0xff] %v1355_v36 }
 0x13b   : > { %923 = vst [vmem:[%s1480_s29 + $0x1e8] sm:$0xff] %v1357_v37 }
 0x13c PF: > { %s12_s9 = sadd.s32 1, %s1364_s9  }
 0x13d   : > { %p9_p4 = scmp.ge.s32.totalorder %s12_s9, 6  }
 0x13f   :  { %11 = sbr.rel (!%p9_p4) target bundleno = 1 (0x1), region = 58 }

</bundles_post_ra>
